<compile_context>
chip_gen: v6e
topology: v6e:2x2x1
jax: 0.10.0
libtpu: 0.0.40
codegen_flags: <defaults>
</compile_context>

<pallas_src>
import jax
import jax.numpy as jnp
from jax.experimental import pallas as pl
from jax.experimental.pallas import tpu as pltpu

LAYER_SIZES = [(2, 256), (256, 128), (128, 64), (64, 32), (32, 32), (32, 1)]
ROW_TILE = 512  # multiple of both 128 (v5e MXU) and 256 (v6e/v7x MXU)


def _round_up(a, b):
    return ((a + b - 1) // b) * b


def mlp_kernel(x_ref,
               w1, b1, w2, b2, w3, b3, w4, b4, w5, b5, w6, b6,
               o_ref):
    """Whole MLP forward for one tile of rows; all weights live in VMEM."""
    x = x_ref[...]                       # (row_tile, 2) f32

    # Layer 1 (K=2): run on the VPU as broadcast multiply-adds — the MXU
    # would pad the contraction dim from 2 up to 128/256 for 2 useful rows.
    w1v = w1[...]                        # (2, 256) f32
    pre1 = x[:, 0:1] * w1v[0:1, :] + x[:, 1:2] * w1v[1:2, :] + b1[...]
    h = jnp.tanh(pre1)                   # f32

    # Layers 2..5: bf16 MXU operands, f32 accumulation, f32 tanh (EUP).
    h = jnp.tanh(jnp.dot(h.astype(jnp.bfloat16), w2[...],
                         preferred_element_type=jnp.float32) + b2[...])
    h = jnp.tanh(jnp.dot(h.astype(jnp.bfloat16), w3[...],
                         preferred_element_type=jnp.float32) + b3[...])
    h = jnp.tanh(jnp.dot(h.astype(jnp.bfloat16), w4[...],
                         preferred_element_type=jnp.float32) + b4[...])
    h = jnp.tanh(jnp.dot(h.astype(jnp.bfloat16), w5[...],
                         preferred_element_type=jnp.float32) + b5[...])

    # Final layer (no activation).
    o_ref[...] = (jnp.dot(h.astype(jnp.bfloat16), w6[...],
                          preferred_element_type=jnp.float32)
                  + b6[...]).astype(o_ref.dtype)


def init_params(key):
    """Deterministic init matching PyTorch Linear's U(-1/sqrt(fan_in), +1/sqrt(fan_in))."""
    params = []
    for (fan_in, fan_out) in LAYER_SIZES:
        key, kw, kb = jax.random.split(key, 3)
        bound = 1.0 / jnp.sqrt(jnp.float32(fan_in))
        w = jax.random.uniform(kw, (fan_in, fan_out), jnp.float32, -bound, bound)
        b = jax.random.uniform(kb, (1, fan_out), jnp.float32, -bound, bound)
        params.append((w, b))
    # TODO(synk): lambda_1 / lambda_2 parameters exist in __init__ but are not
    # used in forward(), so they are intentionally not part of the kernel.
    return params


def prepare_kernel_params(params):
    """Flatten params; cast MXU-fed weights (layers 2..6) to bf16 once."""
    flat = []
    for idx, (w, b) in enumerate(params):
        w_k = w if idx == 0 else w.astype(jnp.bfloat16)  # layer 1 stays f32 (VPU path)
        flat.extend([w_k, b])
    return flat


@jax.jit
def mlp_forward(x, *flat_params):
    n = x.shape[0]
    # Big tiles for real batches, shrink (multiple of 8) for tiny batches so we
    # don't pad 8 rows up to 512.
    row_tile = min(ROW_TILE, _round_up(n, 8))
    n_pad = _round_up(n, row_tile)
    if n_pad != n:
        x = jnp.pad(x, ((0, n_pad - n), (0, 0)))

    grid = (n_pad // row_tile,)

    in_specs = [pl.BlockSpec((row_tile, LAYER_SIZES[0][0]), lambda i: (i, 0))]
    for p in flat_params:
        # each weight / bias is passed whole (block == full array), index (0, 0)
        in_specs.append(pl.BlockSpec(p.shape, lambda i: (0, 0)))

    flops = 2 * n_pad * sum(fi * fo for fi, fo in LAYER_SIZES)
    transcendentals = n_pad * sum(fo for _, fo in LAYER_SIZES[:-1])
    bytes_accessed = (n_pad * LAYER_SIZES[0][0] * 4
                      + n_pad * LAYER_SIZES[-1][1] * 4
                      + sum(int(p.size) * p.dtype.itemsize for p in flat_params))

    out = pl.pallas_call(
        mlp_kernel,
        out_shape=jax.ShapeDtypeStruct((n_pad, LAYER_SIZES[-1][1]), jnp.float32),
        grid=grid,
        in_specs=in_specs,
        out_specs=pl.BlockSpec((row_tile, LAYER_SIZES[-1][1]), lambda i: (i, 0)),
        compiler_params=pltpu.CompilerParams(
            dimension_semantics=("parallel",)),
        cost_estimate=pl.CostEstimate(
            flops=flops,
            transcendentals=transcendentals,
            bytes_accessed=bytes_accessed),
    )(x, *flat_params)
    return out[:n]


def reference_forward(x, params):
    h = x
    for i, (w, b) in enumerate(params):
        h = h @ w + b
        if i != len(params) - 1:
            h = jnp.tanh(h)
    return h


if __name__ == "__main__":
    key = jax.random.PRNGKey(0)
    key, kx1, kx2 = jax.random.split(key, 3)

    params = init_params(key)
    flat_params = prepare_kernel_params(params)

    # Case 1: batch large enough to exercise the 512-row tile, a 2-step grid
    # and the row-padding path (600 -> 1024 padded rows).
    x_big = jax.random.normal(kx1, (600, 2), jnp.float32)
    y_big = jax.block_until_ready(mlp_forward(x_big, *flat_params))
    y_big_ref = reference_forward(x_big, params)
    assert y_big.shape == (600, 1), y_big.shape
    assert jnp.allclose(y_big, y_big_ref, atol=5e-2, rtol=5e-2), (
        float(jnp.max(jnp.abs(y_big - y_big_ref))))

    # Case 2: tiny batch, adaptive tile (row_tile = 8, single grid step).
    x_small = jax.random.normal(kx2, (8, 2), jnp.float32)
    y_small = jax.block_until_ready(mlp_forward(x_small, *flat_params))
    y_small_ref = reference_forward(x_small, params)
    assert y_small.shape == (8, 1), y_small.shape
    assert jnp.allclose(y_small, y_small_ref, atol=5e-2, rtol=5e-2), (
        float(jnp.max(jnp.abs(y_small - y_small_ref))))

    print("KERNEL_OK")
</pallas_src>

<mosaic_0001>
module attributes {stable_mosaic.version = 11 : i64} {
  func.func @mlp_kernel(%arg0: i32, %arg1: memref<512x2xf32, #tpu.memory_space<vmem>>, %arg2: memref<2x256xf32, #tpu.memory_space<vmem>>, %arg3: memref<1x256xf32, #tpu.memory_space<vmem>>, %arg4: memref<256x128xbf16, #tpu.memory_space<vmem>>, %arg5: memref<1x128xf32, #tpu.memory_space<vmem>>, %arg6: memref<128x64xbf16, #tpu.memory_space<vmem>>, %arg7: memref<1x64xf32, #tpu.memory_space<vmem>>, %arg8: memref<64x32xbf16, #tpu.memory_space<vmem>>, %arg9: memref<1x32xf32, #tpu.memory_space<vmem>>, %arg10: memref<32x32xbf16, #tpu.memory_space<vmem>>, %arg11: memref<1x32xf32, #tpu.memory_space<vmem>>, %arg12: memref<32x1xbf16, #tpu.memory_space<vmem>>, %arg13: memref<1x1xf32, #tpu.memory_space<vmem>>, %arg14: memref<512x1xf32, #tpu.memory_space<vmem>>) attributes {dimension_semantics = [#tpu.dimension_semantics<parallel>], iteration_bounds = array<i64: 2>, scalar_prefetch = 0 : i64, scratch_operands = 0 : i64, tpu.core_type = #tpu.core_type<tc>, window_params = [{transform_indices = @transform_0, window_bounds = array<i64: 512, 2>}, {pipeline_mode = #tpu.pipeline_mode<synchronous>, transform_indices = @transform_1, window_bounds = array<i64: 2, 256>}, {pipeline_mode = #tpu.pipeline_mode<synchronous>, transform_indices = @transform_2, window_bounds = array<i64: 1, 256>}, {pipeline_mode = #tpu.pipeline_mode<synchronous>, transform_indices = @transform_3, window_bounds = array<i64: 256, 128>}, {pipeline_mode = #tpu.pipeline_mode<synchronous>, transform_indices = @transform_4, window_bounds = array<i64: 1, 128>}, {pipeline_mode = #tpu.pipeline_mode<synchronous>, transform_indices = @transform_5, window_bounds = array<i64: 128, 64>}, {pipeline_mode = #tpu.pipeline_mode<synchronous>, transform_indices = @transform_6, window_bounds = array<i64: 1, 64>}, {pipeline_mode = #tpu.pipeline_mode<synchronous>, transform_indices = @transform_7, window_bounds = array<i64: 64, 32>}, {pipeline_mode = #tpu.pipeline_mode<synchronous>, transform_indices = @transform_8, window_bounds = array<i64: 1, 32>}, {pipeline_mode = #tpu.pipeline_mode<synchronous>, transform_indices = @transform_9, window_bounds = array<i64: 32, 32>}, {pipeline_mode = #tpu.pipeline_mode<synchronous>, transform_indices = @transform_10, window_bounds = array<i64: 1, 32>}, {pipeline_mode = #tpu.pipeline_mode<synchronous>, transform_indices = @transform_11, window_bounds = array<i64: 32, 1>}, {pipeline_mode = #tpu.pipeline_mode<synchronous>, transform_indices = @transform_12, window_bounds = array<i64: 1, 1>}, {transform_indices = @transform_13, window_bounds = array<i64: 512, 1>}]} {
    %c0 = arith.constant 0 : index
    %c0_0 = arith.constant 0 : index
    %0 = vector.load %arg1[%c0, %c0_0] : memref<512x2xf32, #tpu.memory_space<vmem>>, vector<512x2xf32>
    %c0_1 = arith.constant 0 : index
    %c0_2 = arith.constant 0 : index
    %1 = vector.load %arg2[%c0_1, %c0_2] : memref<2x256xf32, #tpu.memory_space<vmem>>, vector<2x256xf32>
    %2 = vector.extract_strided_slice %0 {offsets = [0, 0], sizes = [512, 1], strides = [1, 1]} : vector<512x2xf32> to vector<512x1xf32>
    %3 = vector.extract_strided_slice %1 {offsets = [0, 0], sizes = [1, 256], strides = [1, 1]} : vector<2x256xf32> to vector<1x256xf32>
    %4 = vector.broadcast %2 : vector<512x1xf32> to vector<512x256xf32>
    %5 = vector.broadcast %3 : vector<1x256xf32> to vector<512x256xf32>
    %6 = arith.mulf %4, %5 : vector<512x256xf32>
    %7 = vector.extract_strided_slice %0 {offsets = [0, 1], sizes = [512, 1], strides = [1, 1]} : vector<512x2xf32> to vector<512x1xf32>
    %8 = vector.extract_strided_slice %1 {offsets = [1, 0], sizes = [1, 256], strides = [1, 1]} : vector<2x256xf32> to vector<1x256xf32>
    %9 = vector.broadcast %7 : vector<512x1xf32> to vector<512x256xf32>
    %10 = vector.broadcast %8 : vector<1x256xf32> to vector<512x256xf32>
    %11 = arith.mulf %9, %10 : vector<512x256xf32>
    %12 = arith.addf %6, %11 : vector<512x256xf32>
    %c0_3 = arith.constant 0 : index
    %c0_4 = arith.constant 0 : index
    %13 = vector.load %arg3[%c0_3, %c0_4] : memref<1x256xf32, #tpu.memory_space<vmem>>, vector<1x256xf32>
    %14 = vector.broadcast %13 : vector<1x256xf32> to vector<512x256xf32>
    %15 = arith.addf %12, %14 : vector<512x256xf32>
    %16 = math.tanh %15 : vector<512x256xf32>
    %17 = arith.truncf %16 : vector<512x256xf32> to vector<512x256xbf16>
    %c0_5 = arith.constant 0 : index
    %c0_6 = arith.constant 0 : index
    %18 = vector.load %arg4[%c0_5, %c0_6] : memref<256x128xbf16, #tpu.memory_space<vmem>>, vector<256x128xbf16>
    %cst = arith.constant dense<0.000000e+00> : vector<512x128xf32>
    %19 = tpu.matmul %17, %18, %cst {dimension_numbers = #tpu.dot_dimension_numbers<[1], [0], [0], [1], [0, 0, 1, 1], [], []>} : vector<512x256xbf16>, vector<256x128xbf16>, vector<512x128xf32> -> vector<512x128xf32>
    %c0_7 = arith.constant 0 : index
    %c0_8 = arith.constant 0 : index
    %20 = vector.load %arg5[%c0_7, %c0_8] : memref<1x128xf32, #tpu.memory_space<vmem>>, vector<1x128xf32>
    %21 = vector.broadcast %20 : vector<1x128xf32> to vector<512x128xf32>
    %22 = arith.addf %19, %21 : vector<512x128xf32>
    %23 = math.tanh %22 : vector<512x128xf32>
    %24 = arith.truncf %23 : vector<512x128xf32> to vector<512x128xbf16>
    %c0_9 = arith.constant 0 : index
    %c0_10 = arith.constant 0 : index
    %25 = vector.load %arg6[%c0_9, %c0_10] : memref<128x64xbf16, #tpu.memory_space<vmem>>, vector<128x64xbf16>
    %cst_11 = arith.constant dense<0.000000e+00> : vector<512x64xf32>
    %26 = tpu.matmul %24, %25, %cst_11 {dimension_numbers = #tpu.dot_dimension_numbers<[1], [0], [0], [1], [0, 0, 1, 1], [], []>} : vector<512x128xbf16>, vector<128x64xbf16>, vector<512x64xf32> -> vector<512x64xf32>
    %c0_12 = arith.constant 0 : index
    %c0_13 = arith.constant 0 : index
    %27 = vector.load %arg7[%c0_12, %c0_13] : memref<1x64xf32, #tpu.memory_space<vmem>>, vector<1x64xf32>
    %28 = vector.broadcast %27 : vector<1x64xf32> to vector<512x64xf32>
    %29 = arith.addf %26, %28 : vector<512x64xf32>
    %30 = math.tanh %29 : vector<512x64xf32>
    %31 = arith.truncf %30 : vector<512x64xf32> to vector<512x64xbf16>
    %c0_14 = arith.constant 0 : index
    %c0_15 = arith.constant 0 : index
    %32 = vector.load %arg8[%c0_14, %c0_15] : memref<64x32xbf16, #tpu.memory_space<vmem>>, vector<64x32xbf16>
    %cst_16 = arith.constant dense<0.000000e+00> : vector<512x32xf32>
    %33 = tpu.matmul %31, %32, %cst_16 {dimension_numbers = #tpu.dot_dimension_numbers<[1], [0], [0], [1], [0, 0, 1, 1], [], []>} : vector<512x64xbf16>, vector<64x32xbf16>, vector<512x32xf32> -> vector<512x32xf32>
    %c0_17 = arith.constant 0 : index
    %c0_18 = arith.constant 0 : index
    %34 = vector.load %arg9[%c0_17, %c0_18] : memref<1x32xf32, #tpu.memory_space<vmem>>, vector<1x32xf32>
    %35 = vector.broadcast %34 : vector<1x32xf32> to vector<512x32xf32>
    %36 = arith.addf %33, %35 : vector<512x32xf32>
    %37 = math.tanh %36 : vector<512x32xf32>
    %38 = arith.truncf %37 : vector<512x32xf32> to vector<512x32xbf16>
    %c0_19 = arith.constant 0 : index
    %c0_20 = arith.constant 0 : index
    %39 = vector.load %arg10[%c0_19, %c0_20] : memref<32x32xbf16, #tpu.memory_space<vmem>>, vector<32x32xbf16>
    %cst_21 = arith.constant dense<0.000000e+00> : vector<512x32xf32>
    %40 = tpu.matmul %38, %39, %cst_21 {dimension_numbers = #tpu.dot_dimension_numbers<[1], [0], [0], [1], [0, 0, 1, 1], [], []>} : vector<512x32xbf16>, vector<32x32xbf16>, vector<512x32xf32> -> vector<512x32xf32>
    %c0_22 = arith.constant 0 : index
    %c0_23 = arith.constant 0 : index
    %41 = vector.load %arg11[%c0_22, %c0_23] : memref<1x32xf32, #tpu.memory_space<vmem>>, vector<1x32xf32>
    %42 = vector.broadcast %41 : vector<1x32xf32> to vector<512x32xf32>
    %43 = arith.addf %40, %42 : vector<512x32xf32>
    %44 = math.tanh %43 : vector<512x32xf32>
    %45 = arith.truncf %44 : vector<512x32xf32> to vector<512x32xbf16>
    %c0_24 = arith.constant 0 : index
    %c0_25 = arith.constant 0 : index
    %46 = vector.load %arg12[%c0_24, %c0_25] : memref<32x1xbf16, #tpu.memory_space<vmem>>, vector<32x1xbf16>
    %cst_26 = arith.constant dense<0.000000e+00> : vector<512x1xf32>
    %47 = tpu.matmul %45, %46, %cst_26 {dimension_numbers = #tpu.dot_dimension_numbers<[1], [0], [0], [1], [0, 0, 1, 1], [], []>} : vector<512x32xbf16>, vector<32x1xbf16>, vector<512x1xf32> -> vector<512x1xf32>
    %c0_27 = arith.constant 0 : index
    %c0_28 = arith.constant 0 : index
    %48 = vector.load %arg13[%c0_27, %c0_28] : memref<1x1xf32, #tpu.memory_space<vmem>>, vector<1x1xf32>
    %49 = vector.broadcast %48 : vector<1x1xf32> to vector<512x1xf32>
    %50 = arith.addf %47, %49 : vector<512x1xf32>
    %c0_29 = arith.constant 0 : index
    %c0_30 = arith.constant 0 : index
    %51 = vector.load %arg14[%c0_29, %c0_30] : memref<512x1xf32, #tpu.memory_space<vmem>>, vector<512x1xf32>
    tpu.vector_store %arg14[%c0_29, %c0_30], %50 {strides = array<i32>} : memref<512x1xf32, #tpu.memory_space<vmem>>, vector<512x1xf32>,
    return
  }
  func.func @transform_0(%arg0: i32) -> (i32, i32) {
    %c0_i32 = arith.constant 0 : i32
    %c0_i32_0 = arith.constant 0 : i32
    return %arg0, %c0_i32 : i32, i32
  }
  func.func @transform_1(%arg0: i32) -> (i32, i32) {
    %c0_i32 = arith.constant 0 : i32
    %c0_i32_0 = arith.constant 0 : i32
    %c0_i32_1 = arith.constant 0 : i32
    return %c0_i32, %c0_i32_0 : i32, i32
  }
  func.func @transform_2(%arg0: i32) -> (i32, i32) {
    %c0_i32 = arith.constant 0 : i32
    %c0_i32_0 = arith.constant 0 : i32
    %c0_i32_1 = arith.constant 0 : i32
    return %c0_i32, %c0_i32_0 : i32, i32
  }
  func.func @transform_3(%arg0: i32) -> (i32, i32) {
    %c0_i32 = arith.constant 0 : i32
    %c0_i32_0 = arith.constant 0 : i32
    %c0_i32_1 = arith.constant 0 : i32
    return %c0_i32, %c0_i32_0 : i32, i32
  }
  func.func @transform_4(%arg0: i32) -> (i32, i32) {
    %c0_i32 = arith.constant 0 : i32
    %c0_i32_0 = arith.constant 0 : i32
    %c0_i32_1 = arith.constant 0 : i32
    return %c0_i32, %c0_i32_0 : i32, i32
  }
  func.func @transform_5(%arg0: i32) -> (i32, i32) {
    %c0_i32 = arith.constant 0 : i32
    %c0_i32_0 = arith.constant 0 : i32
    %c0_i32_1 = arith.constant 0 : i32
    return %c0_i32, %c0_i32_0 : i32, i32
  }
  func.func @transform_6(%arg0: i32) -> (i32, i32) {
    %c0_i32 = arith.constant 0 : i32
    %c0_i32_0 = arith.constant 0 : i32
    %c0_i32_1 = arith.constant 0 : i32
    return %c0_i32, %c0_i32_0 : i32, i32
  }
  func.func @transform_7(%arg0: i32) -> (i32, i32) {
    %c0_i32 = arith.constant 0 : i32
    %c0_i32_0 = arith.constant 0 : i32
    %c0_i32_1 = arith.constant 0 : i32
    return %c0_i32, %c0_i32_0 : i32, i32
  }
  func.func @transform_8(%arg0: i32) -> (i32, i32) {
    %c0_i32 = arith.constant 0 : i32
    %c0_i32_0 = arith.constant 0 : i32
    %c0_i32_1 = arith.constant 0 : i32
    return %c0_i32, %c0_i32_0 : i32, i32
  }
  func.func @transform_9(%arg0: i32) -> (i32, i32) {
    %c0_i32 = arith.constant 0 : i32
    %c0_i32_0 = arith.constant 0 : i32
    %c0_i32_1 = arith.constant 0 : i32
    return %c0_i32, %c0_i32_0 : i32, i32
  }
  func.func @transform_10(%arg0: i32) -> (i32, i32) {
    %c0_i32 = arith.constant 0 : i32
    %c0_i32_0 = arith.constant 0 : i32
    %c0_i32_1 = arith.constant 0 : i32
    return %c0_i32, %c0_i32_0 : i32, i32
  }
  func.func @transform_11(%arg0: i32) -> (i32, i32) {
    %c0_i32 = arith.constant 0 : i32
    %c0_i32_0 = arith.constant 0 : i32
    %c0_i32_1 = arith.constant 0 : i32
    return %c0_i32, %c0_i32_0 : i32, i32
  }
  func.func @transform_12(%arg0: i32) -> (i32, i32) {
    %c0_i32 = arith.constant 0 : i32
    %c0_i32_0 = arith.constant 0 : i32
    %c0_i32_1 = arith.constant 0 : i32
    return %c0_i32, %c0_i32_0 : i32, i32
  }
  func.func @transform_13(%arg0: i32) -> (i32, i32) {
    %c0_i32 = arith.constant 0 : i32
    %c0_i32_0 = arith.constant 0 : i32
    return %arg0, %c0_i32 : i32, i32
  }
}

</mosaic_0001>

<bundles_post_ra>
// kernel: mlp_forward.1
= control target key start
LH: loop header
LB: loop body
LE: loop exit
PB: predicated region body
PF: predicated region fallthrough
CT: control target
= control target key end

     0   :  { %s5927_s27 = smov 0   ;;  %s7304_s0 = inlined_call_operand.vmem [shape: f32[1024,2], index: 0, kind: input, shape index: {}]   ;;  %s7305_s1 = inlined_call_operand.vmem [shape: f32[2,256], index: 1, kind: input, shape index: {}]   ;;  %s7306_s2 = inlined_call_operand.vmem [shape: f32[1,256], index: 2, kind: input, shape index: {}]   ;;  %s7307_s3 = inlined_call_operand.vmem [shape: bf16[256,128], index: 3, kind: input, shape index: {}]   ;;  %s7308_s4 = inlined_call_operand.vmem [shape: f32[1,128], index: 4, kind: input, shape index: {}]   ;;  %s7309_s5 = inlined_call_operand.vmem [shape: bf16[128,64], index: 5, kind: input, shape index: {}]   ;;  %s7310_s6 = inlined_call_operand.vmem [shape: f32[1,64], index: 6, kind: input, shape index: {}]   ;;  %s7311_s7 = inlined_call_operand.vmem [shape: bf16[64,32], index: 7, kind: input, shape index: {}]   ;;  %s7312_s8 = inlined_call_operand.vmem [shape: f32[1,32], index: 8, kind: input, shape index: {}]   ;;  %s7313_s9 = inlined_call_operand.vmem [shape: bf16[32,32], index: 9, kind: input, shape index: {}]   ;;  %s7314_s10 = inlined_call_operand.vmem [shape: f32[1,32], index: 10, kind: input, shape index: {}]   ;;  %s7315_s11 = inlined_call_operand.vmem [shape: bf16[32,1], index: 11, kind: input, shape index: {}]   ;;  %s7316_s12 = inlined_call_operand.<no memory space> [shape: f32[1,1], index: 12, kind: input, shape index: {}]   ;;  %s7317_s13 = inlined_call_operand.vmem [shape: f32[1024,1], index: 13, kind: output, shape index: {}]  }
   0x1   :  { %v18_v0 = vstv %s7316_s12 }
   0x2   :  { %19 = vst [vmem:[#allocation2] sm:$0x1] %v18_v0 }
   0x3 LB: > { %s4372_s28 = sadd.s32 4294967295, %s5850_s27   ;;  %p4376_p0 = scmp.ge.s32.totalorder %s5850_s27, 1  ;;  %s5850_s27 = sphi %s5927_s27, %s25_s27  }
   0x4   : > { %p390_p1 = scmp.lt.s32.totalorder %s5850_s27, 3 }
   0x6   : > { %p391_p2 = pnand %p4376_p0, %p390_p1 }
   0x7   : > { %s4377_s29 = sshll.u32 (!%p391_p2), %s4372_s28, 6 }
   0x8   : > { %394 = sbr.rel (%p391_p2) target bundleno = 1613 (0x64d), region = 72  ;;  %p435_p3 = scmp.lt.s32.totalorder (!%p391_p2), %s4377_s29, 127 }
   0xd   : > { %v5043_v1 = vld [vmem:[%s7307_s3 + $0x38] sm:$0xff]   ;;  %v5852_v2 = vmov 1   ;;  %v5853_v3 = vmov 0   ;;  %s7319_s29 = smov (!%p435_p3, %s4377_s29), 127  ;;  %v5044_v4 = vld [vmem:[%s7307_s3 + $0x30] sm:$0xff]   ;;  %v5045_v6 = vld [vmem:[%s7307_s3 + $0x28] sm:$0xff]   ;;  %v833_v45 = vlaneseq }
   0xe   : > { %4963 = vset.pattern.permute.xlu1 %v5852_v2  ;;  %4962 = vset.pattern.permute.xlu0 %v5853_v3  ;;  %s4378_s16 = sshll.u32 %s7319_s29, 3  ;;  %v5046_v8 = vld [vmem:[%s7307_s3 + $0x20] sm:$0xff]   ;;  %v5047_v11 = vld [vmem:[%s7307_s3 + $0x18] sm:$0xff]   ;;  %v5048_v12 = vld [vmem:[%s7307_s3 + $0x10] sm:$0xff]   ;;  %vm2856_vm0 = vcmask 523264   ;;  %vm3361_vm1 = vcmask 261120  }
   0xf   : > { %1976 = vmatprep.subr.bf16.mxu0 %v5853_v3  ;;  %s5953_s19 = scalar_lea.vmem %s7304_s0, %s4378_s16  ;;  %v5049_v14 = vld [vmem:[%s7307_s3 + $0x8] sm:$0xff]   ;;  %v5050_v17 = vld [vmem:[%s7307_s3] sm:$0xff]   ;;  %v5051_v18 = vld [vmem:[%s7307_s3 + $0x78] sm:$0xff]   ;;  %v834_v47 = vshrl.u32 %v833_v45, 7  ;;  %s7105_s24 = scalar_lea.vmem %s7317_s13, %s4378_s16  ;;  %vm4251_vm2 = vcmask 7168  }
  0x10   : > { %1977 = vmatpush1.bf16.msra.mxu0 %v5043_v1  ;;  %v447_v5 = vld [vmem:[%s5953_s19] sm:$0xff]  ;;  %v448_v7 = vld [vmem:[%s5953_s19 + $0x8] sm:$0xff]  ;;  %v449_v9 = vld [vmem:[%s5953_s19 + $0x10] sm:$0xff] }
  0x11   : > { %1978 = vmatprep.subr.bf16.mxu0 %v5853_v3  ;;  %980 = vperm.xlu1 %4963, %v447_v5   ;;  %v450_v10 = vld [vmem:[%s5953_s19 + $0x18] sm:$0xff]  ;;  %v453_v13 = vld [vmem:[%s5953_s19 + $0x30] sm:$0xff]  ;;  %v451_v15 = vld [vmem:[%s5953_s19 + $0x20] sm:$0xff]  ;;  %v1237_v50 = vsub.s32 1, %v834_v47  ;;  %v1241_v51 = vsub.s32 3, %v834_v47  ;;  %v835_v52 = vsub.s32 0, %v834_v47 }
  0x12   : > { %514 = vperm.xlu0 %4962, %v447_v5   ;;  %v452_v16 = vld [vmem:[%s5953_s19 + $0x28] sm:$0xff]  ;;  %v5052_v20 = vld [vmem:[%s7307_s3 + $0x70] sm:$0xff]   ;;  %v454_v21 = vld [vmem:[%s5953_s19 + $0x38] sm:$0xff]  ;;  %v839_v53 = vsub.s32 2, %v834_v47 }
  0x13   : > { %v456_v19 = vld [vmem:[%s5953_s19 + $0x48] sm:$0xff]  ;;  %v457_v22 = vld [vmem:[%s5953_s19 + $0x50] sm:$0xff]  ;;  %v5054_v24 = vld [vmem:[%s7307_s3 + $0x60] sm:$0xff]  }
  0x14   : > { %1979 = vmatpush1.bf16.msra.mxu0 %v5044_v4  ;;  %v5053_v23 = vld [vmem:[%s7307_s3 + $0x68] sm:$0xff]   ;;  %v455_v25 = vld [vmem:[%s5953_s19 + $0x40] sm:$0xff]  ;;  %v461_v26 = vld [vmem:[%s5953_s19 + $0x70] sm:$0xff] }
  0x15   : > { %1980 = vmatprep.subr.bf16.mxu0 %v5853_v3  ;;  %984 = vperm.xlu1 %4963, %v448_v7   ;;  %v5055_v27 = vld [vmem:[%s7307_s3 + $0x58] sm:$0xff]   ;;  %v460_v28 = vld [vmem:[%s5953_s19 + $0x68] sm:$0xff]  ;;  %v5056_v29 = vld [vmem:[%s7307_s3 + $0x50] sm:$0xff]  }
  0x16   : > { %519 = vperm.xlu0 %4962, %v448_v7   ;;  %v5057_v30 = vld [vmem:[%s7307_s3 + $0x48] sm:$0xff]   ;;  %v5058_v32 = vld [vmem:[%s7307_s3 + $0x40] sm:$0xff]   ;;  %v458_v33 = vld [vmem:[%s5953_s19 + $0x58] sm:$0xff] }
  0x17   : > { %v464_v31 = vld [vmem:[%s5953_s19 + $0x88] sm:$0xff]  ;;  %v465_v34 = vld [vmem:[%s5953_s19 + $0x90] sm:$0xff]  ;;  %v459_v35 = vld [vmem:[%s5953_s19 + $0x60] sm:$0xff] }
  0x18   : > { %1981 = vmatpush1.bf16.msra.mxu0 %v5045_v6  ;;  %v469_v36 = vld [vmem:[%s5953_s19 + $0xb0] sm:$0xff]  ;;  %v6047_v37 = vld [vmem:[%s5953_s19 + $0xa8] sm:$0xff]  ;;  %v462_v38 = vld [vmem:[%s5953_s19 + $0x78] sm:$0xff] }
  0x19   : > { %1982 = vmatprep.subr.bf16.mxu0 %v5853_v3  ;;  %4964 = vset.pattern.permute.xlu1 %v5853_v3  ;;  %v6053_v39 = vld [vmem:[%s5953_s19 + $0xc8] sm:$0xff]  ;;  %v473_v40 = vld [vmem:[%s5953_s19 + $0xd0] sm:$0xff]  ;;  %v463_v41 = vld [vmem:[%s5953_s19 + $0x80] sm:$0xff] }
  0x1a   : > { %524 = vperm.xlu0 %4962, %v449_v9   ;;  %529 = vperm.xlu1 %4964, %v450_v10   ;;  %v477_v42 = vld [vmem:[%s5953_s19 + $0xf0] sm:$0xff]  ;;  %v6065_v43 = vld [vmem:[%s5953_s19 + $0xe8] sm:$0xff]  ;;  %v466_v44 = vld [vmem:[%s5953_s19 + $0x98] sm:$0xff] }
  0x1b   : > { %v6072_v46 = vld [vmem:[%s5953_s19 + $0x108] sm:$0xff]  ;;  %v481_v48 = vld [vmem:[%s5953_s19 + $0x110] sm:$0xff]  ;;  %v467_v49 = vld [vmem:[%s5953_s19 + $0xa0] sm:$0xff] }
  0x1c   : > { %1983 = vmatpush1.bf16.msra.mxu0 %v5046_v8  ;;  %v511_v54 = vld [vmem:[%s7305_s1] sm:$0xf]  ;;  %v485_v59 = vld [vmem:[%s5953_s19 + $0x130] sm:$0xff]  ;;  %v6097_v5 = vld [vmem:[%s5953_s19 + $0x128] sm:$0xff] }
  0x1d   : > { %1984 = vmatprep.subr.bf16.mxu0 %v5853_v3  ;;  %v1238_v55 = vrot.slane %v511_v54, %v1237_v50  ;;  %v1242_v56 = vrot.slane %v511_v54, %v1241_v51  ;;  %v836_v57 = vrot.slane %v511_v54, %v835_v52  ;;  %v840_v58 = vrot.slane %v511_v54, %v839_v53  ;;  %v1509_v0 = vld [vmem:[%s7306_s2] sm:$0x3] }
  0x1e   : > { %4965 = vset.pattern.permute.xlu0 %v5852_v2  ;;  %4966 = vset.pattern.permute.xlu1 %v5852_v2 }
  0x1f   : > { %988 = vperm.xlu0 %4965, %v449_v9   ;;  %992 = vperm.xlu1 %4966, %v450_v10   ;;  %v6085_v60 = vrot.slane %v1238_v55, %v1237_v50  ;;  %v6087_v61 = vrot.slane %v1242_v56, %v1237_v50  ;;  %v6089_v62 = vrot.slane %v836_v57, %v835_v52  ;;  %v493_v55 = vld [vmem:[%s5953_s19 + $0x170] sm:$0xff] }
  0x20   : > { %1985 = vmatpush1.bf16.msra.mxu0 %v5047_v11  ;;  %v6091_v63 = vrot.slane %v840_v58, %v835_v52  ;;  %v6104_v10 = vrot.slane %v1509_v0, %v835_v52  ;;  %v6107_v11 = vrot.slane %v1509_v0, %v1237_v50 }
  0x21   : > { %1986 = vmatprep.subr.bf16.mxu0 %v5853_v3 }
  0x23   : > { %1004 = vperm.xlu0 %4965, %v453_v13   ;;  %4967 = vset.pattern.permute.xlu1 %v5853_v3 }
  0x24   : > { %1987 = vmatpush1.bf16.msra.mxu0 %v5048_v12  ;;  %534 = vperm.xlu1 %4967, %v451_v15  }
  0x25   : > { %1988 = vmatprep.subr.bf16.mxu0 %v5853_v3 }
  0x27   : > { %4970 = vset.pattern.permute.xlu0 %v5853_v3 }
  0x28   : > { %1989 = vmatpush1.bf16.msra.mxu0 %v5049_v14  ;;  %539 = vperm.xlu0 %4970, %v452_v16   ;;  %v470_v14 = vld [vmem:[%s5953_s19 + $0xb8] sm:$0xff] }
  0x29   : > { %1990 = vmatprep.subr.bf16.mxu0 %v5853_v3  ;;  %4968 = vset.pattern.permute.xlu1 %v5852_v2 }
  0x2a   : > { %996 = vperm.xlu1 %4968, %v451_v15  }
  0x2c   : > { %1991 = vmatpush1.bf16.msra.mxu0 %v5050_v17  ;;  %544 = vperm.xlu0 %4970, %v453_v13  }
  0x2d   : > { %1992 = vmatprep.subr.bf16.mxu0 %v5853_v3 }
  0x2e   : > { %1000 = vperm.xlu1 %4968, %v452_v16  }
  0x30   : > { %1993 = vmatpush2.bf16.msra.mxu0 %v5051_v18  ;;  %559 = vperm.xlu0 %4970, %v456_v19  }
  0x31   : > { %1994 = vmatprep.subr.bf16.mxu0 %v5853_v3 }
  0x32   : > { %4969 = vset.pattern.permute.xlu1 %v5853_v3 }
  0x33   : > { %549 = vperm.xlu1 %4969, %v454_v21  }
  0x34   : > { %1995 = vmatpush2.bf16.msra.mxu0 %v5052_v20  ;;  %564 = vperm.xlu0 %4970, %v457_v22  }
  0x35   : > { %1996 = vmatprep.subr.bf16.mxu0 %v5853_v3 }
  0x37   : > { %4971 = vset.pattern.permute.xlu1 %v5852_v2 }
  0x38   : > { %1997 = vmatpush2.bf16.msra.mxu0 %v5053_v23  ;;  %1008 = vperm.xlu1 %4971, %v454_v21  }
  0x39   : > { %1998 = vmatprep.subr.bf16.mxu0 %v5853_v3  ;;  %4975 = vset.pattern.permute.xlu0 %v5852_v2 }
  0x3a   : > { %1020 = vperm.xlu0 %4975, %v457_v22  }
  0x3c   : > { %1999 = vmatpush2.bf16.msra.mxu0 %v5054_v24  ;;  %4972 = vset.pattern.permute.xlu1 %v5853_v3 }
  0x3d   : > { %2000 = vmatprep.subr.bf16.mxu0 %v5853_v3  ;;  %554 = vperm.xlu1 %4972, %v455_v25  }
  0x3e   : > { %1036 = vperm.xlu0 %4975, %v461_v26  }
  0x40   : > { %2001 = vmatpush2.bf16.msra.mxu0 %v5055_v27 }
  0x41   : > { %2002 = vmatprep.subr.bf16.mxu0 %v5853_v3  ;;  %4973 = vset.pattern.permute.xlu1 %v5852_v2 }
  0x42   : > { %4980 = vset.pattern.permute.xlu0 %v5853_v3  ;;  %1012 = vperm.xlu1 %4973, %v455_v25  }
  0x43   : > { %579 = vperm.xlu0 %4980, %v460_v28  }
  0x44   : > { %2003 = vmatpush2.bf16.msra.mxu0 %v5056_v29 }
  0x45   : > { %2004 = vmatprep.subr.bf16.mxu0 %v5853_v3 }
  0x46   : > { %1016 = vperm.xlu1 %4973, %v456_v19  }
  0x47   : > { %584 = vperm.xlu0 %4980, %v461_v26   ;;  %v6119_v26 = vld [vmem:[%s5953_s19 + $0x148] sm:$0xff] }
  0x48   : > { %2005 = vmatpush2.bf16.msra.mxu0 %v5057_v30 }
  0x49   : > { %2006 = vmatprep.subr.bf16.mxu0 %v5853_v3 }
  0x4a   : > { %4974 = vset.pattern.permute.xlu1 %v5853_v3 }
  0x4b   : > { %599 = vperm.xlu0 %4980, %v464_v31   ;;  %569 = vperm.xlu1 %4974, %v458_v33  }
  0x4c   : > { %2007 = vmatpush2.bf16.msra.mxu0 %v5058_v32  ;;  %v489_v32 = vld [vmem:[%s5953_s19 + $0x150] sm:$0xff] }
  0x4f   : > { %604 = vperm.xlu0 %4980, %v465_v34   ;;  %4976 = vset.pattern.permute.xlu1 %v5852_v2 }
  0x50   : > { %1024 = vperm.xlu1 %4976, %v458_v33  }
  0x53   : > { %4985 = vset.pattern.permute.xlu0 %v5852_v2 }
  0x54   : > { %1052 = vperm.xlu0 %4985, %v465_v34   ;;  %4977 = vset.pattern.permute.xlu1 %v5853_v3  ;;  %v471_v34 = vld [vmem:[%s5953_s19 + $0xc0] sm:$0xff] }
  0x55   : > { %574 = vperm.xlu1 %4977, %v459_v35  }
  0x58   : > { %1068 = vperm.xlu0 %4985, %v469_v36  }
  0x59   : > { %4978 = vset.pattern.permute.xlu1 %v5852_v2 }
  0x5a   : > { %1028 = vperm.xlu1 %4978, %v459_v35  }
  0x5c   : > { %4990 = vset.pattern.permute.xlu0 %v5853_v3 }
  0x5d   : > { %619 = vperm.xlu0 %4990, %v6047_v37  }
  0x5e   : > { %1032 = vperm.xlu1 %4978, %v460_v28  }
  0x61   : > { %624 = vperm.xlu0 %4990, %v469_v36  }
  0x62   : > { %4979 = vset.pattern.permute.xlu1 %v5853_v3 }
  0x63   : > { %589 = vperm.xlu1 %4979, %v462_v38  }
  0x65   : > { %639 = vperm.xlu0 %4990, %v6053_v39  }
  0x67   : > { %4981 = vset.pattern.permute.xlu1 %v5852_v2 }
  0x68   : > { %1040 = vperm.xlu1 %4981, %v462_v38  }
  0x69   : > { %644 = vperm.xlu0 %4990, %v473_v40  }
  0x6c   : > { %4982 = vset.pattern.permute.xlu1 %v5853_v3 }
  0x6d   : > { %4995 = vset.pattern.permute.xlu0 %v5852_v2  ;;  %594 = vperm.xlu1 %4982, %v463_v41  }
  0x6e   : > { %1084 = vperm.xlu0 %4995, %v473_v40  }
  0x71   : > { %4983 = vset.pattern.permute.xlu1 %v5852_v2 }
  0x72   : > { %1100 = vperm.xlu0 %4995, %v477_v42   ;;  %1044 = vperm.xlu1 %4983, %v463_v41  }
  0x76   : > { %5000 = vset.pattern.permute.xlu0 %v5853_v3  ;;  %1048 = vperm.xlu1 %4983, %v464_v31  }
  0x77   : > { %659 = vperm.xlu0 %5000, %v6065_v43  }
  0x7a   : > { %4984 = vset.pattern.permute.xlu1 %v5853_v3 }
  0x7b   : > { %664 = vperm.xlu0 %5000, %v477_v42   ;;  %609 = vperm.xlu1 %4984, %v466_v44  }
  0x7f   : > { %679 = vperm.xlu0 %5000, %v6072_v46   ;;  %4986 = vset.pattern.permute.xlu1 %v5852_v2 }
  0x80   : > { %1056 = vperm.xlu1 %4986, %v466_v44  }
  0x83   : > { %684 = vperm.xlu0 %5000, %v481_v48  }
  0x84   : > { %4987 = vset.pattern.permute.xlu1 %v5853_v3 }
  0x85   : > { %614 = vperm.xlu1 %4987, %v467_v49  }
  0x87   : > { %5005 = vset.pattern.permute.xlu0 %v5852_v2 }
  0x88   : > { %1116 = vperm.xlu0 %5005, %v481_v48  }
  0x89   : > { %4988 = vset.pattern.permute.xlu1 %v5852_v2 }
  0x8a   : > { %1060 = vperm.xlu1 %4988, %v467_v49  }
  0x8c   : > { %1132 = vperm.xlu0 %5005, %v485_v59   ;;  %v981_v1 = vpop.permute.xlu1 %980 }
  0x8d   : > { %v515_v4 = vpop.permute.xlu0 %514  ;;  %v1253_v6 = vmul.f32 %v6085_v60, %v981_v1  ;;  %v1254_v7 = vmul.f32 %v6087_v61, %v981_v1 }
  0x8e   : > { %v851_v8 = vmul.f32 %v6089_v62, %v515_v4  ;;  %v852_v9 = vmul.f32 %v6091_v63, %v515_v4  ;;  %1064 = vperm.xlu1 %4988, %v6047_v37  }
  0x90   : > { %5010 = vset.pattern.permute.xlu0 %v5853_v3  ;;  %v1381_v12 = vadd.f32 %v1253_v6, %v851_v8  ;;  %v1382_v13 = vadd.f32 %v1254_v7, %v852_v9  ;;  %v985_v15 = vpop.permute.xlu1 %984 }
  0x91   : > { %699 = vperm.xlu0 %5010, %v6097_v5   ;;  %v520_v16 = vpop.permute.xlu0 %519  ;;  %v1255_v17 = vmul.f32 %v6085_v60, %v985_v15  ;;  %v1256_v18 = vmul.f32 %v6087_v61, %v985_v15 }
  0x92   : > { %4989 = vset.pattern.permute.xlu1 %v5853_v3  ;;  %v1521_v19 = vadd.f32 %v6104_v10, %v1381_v12  ;;  %v853_v20 = vmul.f32 %v6089_v62, %v520_v16  ;;  %v854_v21 = vmul.f32 %v6091_v63, %v520_v16  ;;  %v1522_v22 = vadd.f32 %v6107_v11, %v1382_v13 }
  0x93   : > { %629 = vperm.xlu1 %4989, %v470_v14  }
  0x94   : > { %v1383_v23 = vadd.f32 %v1255_v17, %v853_v20  ;;  %v1384_v24 = vadd.f32 %v1256_v18, %v854_v21  ;;  %5075 = vtanh.f32 %v1521_v19  ;;  %v474_v19 = vld [vmem:[%s5953_s19 + $0xd8] sm:$0xff]  ;;  %v6153_v20 = vld [vmem:[%s5953_s19 + $0x168] sm:$0xff] }
  0x95   : > { %704 = vperm.xlu0 %5010, %v485_v59   ;;  %v525_v25 = vpop.permute.xlu0 %524  ;;  %v530_v27 = vpop.permute.xlu1 %529  ;;  %5077 = vtanh.f32 %v1522_v22 }
  0x96   : > { %v1523_v28 = vadd.f32 %v6104_v10, %v1383_v23  ;;  %v1524_v29 = vadd.f32 %v6107_v11, %v1384_v24  ;;  %v855_v30 = vmul.f32 %v6089_v62, %v525_v25  ;;  %v856_v31 = vmul.f32 %v6091_v63, %v525_v25 }
  0x97   : > { %4991 = vset.pattern.permute.xlu1 %v5852_v2  ;;  %v857_v35 = vmul.f32 %v6089_v62, %v530_v27  ;;  %v858_v40 = vmul.f32 %v6091_v63, %v530_v27 }
  0x98   : > { %1072 = vperm.xlu1 %4991, %v470_v14   ;;  %5079 = vtanh.f32 %v1523_v28 }
  0x99   : > { %719 = vperm.xlu0 %5010, %v6119_v26   ;;  %5081 = vtanh.f32 %v1524_v29 }
  0x9a   : > { %v989_v33 = vpop.permute.xlu0 %988  ;;  %v993_v36 = vpop.permute.xlu1 %992 }
  0x9b   : > { %v1257_v37 = vmul.f32 %v6085_v60, %v989_v33  ;;  %v1258_v38 = vmul.f32 %v6087_v61, %v989_v33  ;;  %v1259_v41 = vmul.f32 %v6085_v60, %v993_v36  ;;  %v1260_v42 = vmul.f32 %v6087_v61, %v993_v36 }
  0x9c   : > { %4992 = vset.pattern.permute.xlu1 %v5853_v3 }
  0x9d   : > { %724 = vperm.xlu0 %5010, %v489_v32   ;;  %v1385_v44 = vadd.f32 %v1257_v37, %v855_v30  ;;  %v1386_v45 = vadd.f32 %v1258_v38, %v856_v31  ;;  %634 = vperm.xlu1 %4992, %v471_v34   ;;  %v1387_v47 = vadd.f32 %v1259_v41, %v857_v35 }
  0x9e   : > { %v1388_v48 = vadd.f32 %v1260_v42, %v858_v40  ;;  %v1005_v49 = vpop.permute.xlu0 %1004 }
  0x9f   : > { %v1525_v50 = vadd.f32 %v6104_v10, %v1385_v44  ;;  %v1527_v51 = vadd.f32 %v6104_v10, %v1387_v47  ;;  %v1526_v53 = vadd.f32 %v6107_v11, %v1386_v45  ;;  %v535_v54 = vpop.permute.xlu1 %534  ;;  %v1265_v24 = vmul.f32 %v6085_v60, %v1005_v49  ;;  %v475_v47 = vld [vmem:[%s5953_s19 + $0xe0] sm:$0xff] }
  0xa0   : > { %v1528_v52 = vadd.f32 %v6107_v11, %v1388_v48  ;;  %v859_v1 = vmul.f32 %v6089_v62, %v535_v54  ;;  %v860_v4 = vmul.f32 %v6091_v63, %v535_v54  ;;  %v1266_v29 = vmul.f32 %v6087_v61, %v1005_v49 }
  0xa1   : > { %5015 = vset.pattern.permute.xlu0 %v5852_v2  ;;  %5083 = vtanh.f32 %v1525_v50  ;;  %4993 = vset.pattern.permute.xlu1 %v5852_v2  ;;  %v5076_v56 = vpop.eup %5075 }
  0xa2   : > { %1148 = vperm.xlu0 %5015, %v489_v32   ;;  %5085 = vtanh.f32 %v1527_v51  ;;  %1076 = vperm.xlu1 %4993, %v471_v34   ;;  %v5078_v58 = vpop.eup %5077 }
  0xa3   : > { %5087 = vtanh.f32 %v1528_v52  ;;  %v540_v57 = vpop.permute.xlu0 %539 }
  0xa4   : > { %5089 = vtanh.f32 %v1526_v53  ;;  %v861_v12 = vmul.f32 %v6089_v62, %v540_v57  ;;  %v862_v16 = vmul.f32 %v6091_v63, %v540_v57 }
  0xa5   : > { %v997_v59 = vpop.permute.xlu1 %996  ;;  %v5080_v0 = vpop.eup %5079 }
  0xa6   : > { %1164 = vperm.xlu0 %5015, %v493_v55   ;;  %v1261_v6 = vmul.f32 %v6085_v60, %v997_v59  ;;  %v1262_v7 = vmul.f32 %v6087_v61, %v997_v59  ;;  %1080 = vperm.xlu1 %4993, %v6053_v39   ;;  %v5082_v8 = vpop.eup %5081  ;;  %v1777_v9 = vpack.c.bf16 %v5080_v0, %v5076_v56  ;;  %v6177_v56 = vld [vmem:[%s5953_s19 + $0x188] sm:$0xff] }
  0xa7   : > { %v1778_v15 = vpack.c.bf16 %v5082_v8, %v5078_v58  ;;  %v545_v17 = vpop.permute.xlu0 %544 }
  0xa8   : > { %v1389_v13 = vadd.f32 %v1261_v6, %v859_v1  ;;  %v1390_v14 = vadd.f32 %v1262_v7, %v860_v4  ;;  %v863_v25 = vmul.f32 %v6089_v62, %v545_v17  ;;  %v864_v30 = vmul.f32 %v6091_v63, %v545_v17  ;;  %v497_v6 = vld [vmem:[%s5953_s19 + $0x190] sm:$0xff] }
  0xa9   : > { %v1001_v18 = vpop.permute.xlu1 %1000  ;;  %2008 = vmatprep.mubr.bf16.mxu0 %v1778_v15 }
  0xaa   : > { %5020 = vset.pattern.permute.xlu0 %v5853_v3  ;;  %v1529_v21 = vadd.f32 %v6104_v10, %v1389_v13  ;;  %v1263_v39 = vmul.f32 %v6085_v60, %v1001_v18  ;;  %v1264_v22 = vmul.f32 %v6087_v61, %v1001_v18  ;;  %v1530_v23 = vadd.f32 %v6107_v11, %v1390_v14 }
  0xab   : > { %2009 = vmatmul.mubr.bf16.vlgmr.msra.gmra.mxu0 %v1777_v9  ;;  %4994 = vset.pattern.permute.xlu1 %v5853_v3  ;;  %v1393_v36 = vadd.f32 %v1265_v24, %v863_v25  ;;  %v1394_v41 = vadd.f32 %v1266_v29, %v864_v30  ;;  %v478_v24 = vld [vmem:[%s5953_s19 + $0xf8] sm:$0xff] }
  0xac   : > { %v1391_v27 = vadd.f32 %v1263_v39, %v861_v12  ;;  %v1392_v28 = vadd.f32 %v1264_v22, %v862_v16  ;;  %649 = vperm.xlu1 %4994, %v474_v19   ;;  %739 = vperm.xlu0 %5020, %v6153_v20   ;;  %5091 = vtanh.f32 %v1529_v21 }
  0xad   : > { %5093 = vtanh.f32 %v1530_v23  ;;  %v1533_v45 = vadd.f32 %v6104_v10, %v1393_v36  ;;  %v1534_v52 = vadd.f32 %v6107_v11, %v1394_v41 }
  0xae   : > { %v5084_v31 = vpop.eup %5083  ;;  %v1531_v32 = vadd.f32 %v6104_v10, %v1391_v27  ;;  %v1532_v33 = vadd.f32 %v6107_v11, %v1392_v28  ;;  %v550_v34 = vpop.permute.xlu1 %549 }
  0xaf   : > { %v5086_v35 = vpop.eup %5085  ;;  %v865_v48 = vmul.f32 %v6089_v62, %v550_v34  ;;  %v866_v49 = vmul.f32 %v6091_v63, %v550_v34 }
  0xb0   : > { %v5088_v37 = vpop.eup %5087  ;;  %5095 = vtanh.f32 %v1531_v32  ;;  %4996 = vset.pattern.permute.xlu1 %v5852_v2  ;;  %744 = vperm.xlu0 %5020, %v493_v55   ;;  %v1779_v40 = vpack.c.bf16 %v5086_v35, %v5084_v31  ;;  %v560_v55 = vpop.permute.xlu0 %559 }
  0xb1   : > { %v5090_v38 = vpop.eup %5089  ;;  %5097 = vtanh.f32 %v1532_v33  ;;  %1088 = vperm.xlu1 %4996, %v474_v19   ;;  %v869_v21 = vmul.f32 %v6089_v62, %v560_v55  ;;  %v870_v39 = vmul.f32 %v6091_v63, %v560_v55 }
  0xb2   : > { %v1780_v42 = vpack.c.bf16 %v5088_v37, %v5090_v38  ;;  %5099 = vtanh.f32 %v1533_v45 }
  0xb3   : > { %v1009_v44 = vpop.permute.xlu1 %1008  ;;  %5101 = vtanh.f32 %v1534_v52  ;;  %v479_v52 = vld [vmem:[%s5953_s19 + $0x100] sm:$0xff] }
  0xb4   : > { %2016 = vmatprep.mubr.bf16.mxu0 %v1780_v42  ;;  %v1267_v50 = vmul.f32 %v6085_v60, %v1009_v44  ;;  %v1268_v51 = vmul.f32 %v6087_v61, %v1009_v44  ;;  %759 = vperm.xlu0 %5020, %v6177_v56   ;;  %v565_v0 = vpop.permute.xlu0 %564 }
  0xb5   : > { %2017 = vmatmul.mubr.bf16.gmra.mxu0 %v1779_v40  ;;  %4997 = vset.pattern.permute.xlu1 %v5853_v3  ;;  %v871_v29 = vmul.f32 %v6089_v62, %v565_v0  ;;  %v872_v34 = vmul.f32 %v6091_v63, %v565_v0 }
  0xb6   : > { %v1395_v53 = vadd.f32 %v1267_v50, %v865_v48  ;;  %v1396_v54 = vadd.f32 %v1268_v51, %v866_v49  ;;  %654 = vperm.xlu1 %4997, %v475_v47   ;;  %v501_v49 = vld [vmem:[%s5953_s19 + $0x1b0] sm:$0xff] }
  0xb8   : > { %v1535_v57 = vadd.f32 %v6104_v10, %v1395_v53  ;;  %v1536_v58 = vadd.f32 %v6107_v11, %v1396_v54  ;;  %v555_v59 = vpop.permute.xlu1 %554  ;;  %764 = vperm.xlu0 %5020, %v497_v6   ;;  %v1021_v22 = vpop.permute.xlu0 %1020 }
  0xb9   : > { %v5092_v1 = vpop.eup %5091  ;;  %v867_v8 = vmul.f32 %v6089_v62, %v555_v59  ;;  %v868_v13 = vmul.f32 %v6091_v63, %v555_v59  ;;  %v1273_v30 = vmul.f32 %v6085_v60, %v1021_v22  ;;  %v1274_v35 = vmul.f32 %v6087_v61, %v1021_v22 }
  0xba   : > { %5103 = vtanh.f32 %v1535_v57  ;;  %4998 = vset.pattern.permute.xlu1 %v5852_v2  ;;  %v5094_v4 = vpop.eup %5093 }
  0xbb   : > { %5105 = vtanh.f32 %v1536_v58  ;;  %1092 = vperm.xlu1 %4998, %v475_v47   ;;  %v1401_v42 = vadd.f32 %v1273_v30, %v871_v29  ;;  %v1402_v48 = vadd.f32 %v1274_v35, %v872_v34  ;;  %v482_v29 = vld [vmem:[%s5953_s19 + $0x118] sm:$0xff] }
  0xbc   : > { %5025 = vset.pattern.permute.xlu0 %v5852_v2 }
  0xbd   : > { %v5096_v7 = vpop.eup %5095  ;;  %v1013_v9 = vpop.permute.xlu1 %1012  ;;  %1180 = vperm.xlu0 %5025, %v497_v6   ;;  %v1541_v51 = vadd.f32 %v6104_v10, %v1401_v42  ;;  %v1542_v58 = vadd.f32 %v6107_v11, %v1402_v48 }
  0xbe   : > { %v5098_v12 = vpop.eup %5097  ;;  %v1269_v14 = vmul.f32 %v6085_v60, %v1013_v9  ;;  %v1270_v15 = vmul.f32 %v6087_v61, %v1013_v9  ;;  %v1781_v16 = vpack.c.bf16 %v5096_v7, %v5092_v1  ;;  %v1037_v1 = vpop.permute.xlu0 %1036 }
  0xbf   : > { %1096 = vperm.xlu1 %4998, %v6065_v43   ;;  %v1782_v17 = vpack.c.bf16 %v5098_v12, %v5094_v4  ;;  %v5100_v33 = vpop.eup %5099  ;;  %v6216_v4 = vld [vmem:[%s5953_s19 + $0x1a8] sm:$0xff] }
  0xc0   : > { %v1397_v18 = vadd.f32 %v1269_v14, %v867_v8  ;;  %v1398_v19 = vadd.f32 %v1270_v15, %v868_v13  ;;  %v5102_v36 = vpop.eup %5101 }
  0xc1   : > { %2024 = vmatprep.mubr.bf16.mxu0 %v1782_v17  ;;  %v1017_v23 = vpop.permute.xlu1 %1016  ;;  %1196 = vperm.xlu0 %5025, %v501_v49  }
  0xc2   : > { %v1537_v25 = vadd.f32 %v6104_v10, %v1397_v18  ;;  %v1271_v27 = vmul.f32 %v6085_v60, %v1017_v23  ;;  %v1272_v28 = vmul.f32 %v6087_v61, %v1017_v23  ;;  %2025 = vmatmul.mubr.bf16.gmra.mxu0 %v1781_v16  ;;  %v1538_v43 = vadd.f32 %v6107_v11, %v1398_v19  ;;  %v580_v13 = vpop.permute.xlu0 %579 }
  0xc3   : > { %4999 = vset.pattern.permute.xlu1 %v5853_v3 }
  0xc4   : > { %v1399_v31 = vadd.f32 %v1271_v27, %v869_v21  ;;  %v1400_v32 = vadd.f32 %v1272_v28, %v870_v39  ;;  %669 = vperm.xlu1 %4999, %v478_v24   ;;  %5107 = vtanh.f32 %v1537_v25  ;;  %v877_v25 = vmul.f32 %v6089_v62, %v580_v13 }
  0xc5   : > { %5109 = vtanh.f32 %v1538_v43  ;;  %5030 = vset.pattern.permute.xlu0 %v5853_v3  ;;  %v878_v27 = vmul.f32 %v6091_v63, %v580_v13 }
  0xc6   : > { %v1539_v37 = vadd.f32 %v6104_v10, %v1399_v31  ;;  %v1540_v38 = vadd.f32 %v6107_v11, %v1400_v32  ;;  %v570_v40 = vpop.permute.xlu1 %569  ;;  %779 = vperm.xlu0 %5030, %v6216_v4   ;;  %v585_v28 = vpop.permute.xlu0 %584 }
  0xc7   : > { %v5104_v41 = vpop.eup %5103  ;;  %v873_v53 = vmul.f32 %v6089_v62, %v570_v40  ;;  %v874_v54 = vmul.f32 %v6091_v63, %v570_v40  ;;  %v879_v34 = vmul.f32 %v6089_v62, %v585_v28  ;;  %v880_v40 = vmul.f32 %v6091_v63, %v585_v28 }
  0xc8   : > { %v5106_v44 = vpop.eup %5105  ;;  %5111 = vtanh.f32 %v1539_v37  ;;  %5001 = vset.pattern.permute.xlu1 %v5852_v2  ;;  %v1783_v45 = vpack.c.bf16 %v5104_v41, %v5100_v33  ;;  %v1281_v33 = vmul.f32 %v6085_v60, %v1037_v1 }
  0xc9   : > { %5113 = vtanh.f32 %v1540_v38  ;;  %1104 = vperm.xlu1 %5001, %v478_v24   ;;  %v1784_v47 = vpack.c.bf16 %v5106_v44, %v5102_v36  ;;  %v1282_v38 = vmul.f32 %v6087_v61, %v1037_v1 }
  0xca   : > { %5115 = vtanh.f32 %v1541_v51  ;;  %784 = vperm.xlu0 %5030, %v501_v49   ;;  %v1409_v48 = vadd.f32 %v1281_v33, %v879_v34 }
  0xcb   : > { %2032 = vmatprep.mubr.bf16.mxu0 %v1784_v47  ;;  %v1025_v50 = vpop.permute.xlu1 %1024  ;;  %5117 = vtanh.f32 %v1542_v58 }
  0xcc   : > { %v1275_v55 = vmul.f32 %v6085_v60, %v1025_v50  ;;  %v1276_v57 = vmul.f32 %v6087_v61, %v1025_v50  ;;  %2033 = vmatmul.mubr.bf16.gmra.mxu0 %v1783_v45 }
  0xcd   : > { %5002 = vset.pattern.permute.xlu1 %v5853_v3 }
  0xce   : > { %v1403_v59 = vadd.f32 %v1275_v55, %v873_v53  ;;  %v1404_v0 = vadd.f32 %v1276_v57, %v874_v54  ;;  %674 = vperm.xlu1 %5002, %v479_v52   ;;  %v6243_v53 = vld [vmem:[%s5953_s19 + $0x1c8] sm:$0xff]  ;;  %v1549_v55 = vadd.f32 %v6104_v10, %v1409_v48  ;;  %v483_v57 = vld [vmem:[%s5953_s19 + $0x120] sm:$0xff] }
  0xcf   : > { %799 = vperm.xlu0 %5030, %v6243_v53  }
  0xd0   : > { %v1543_v6 = vadd.f32 %v6104_v10, %v1403_v59  ;;  %v1544_v7 = vadd.f32 %v6107_v11, %v1404_v0  ;;  %v575_v8 = vpop.permute.xlu1 %574 }
  0xd1   : > { %v5108_v9 = vpop.eup %5107  ;;  %v875_v15 = vmul.f32 %v6089_v62, %v575_v8  ;;  %v876_v18 = vmul.f32 %v6091_v63, %v575_v8 }
  0xd2   : > { %5119 = vtanh.f32 %v1543_v6  ;;  %5003 = vset.pattern.permute.xlu1 %v5852_v2  ;;  %v5110_v12 = vpop.eup %5109 }
  0xd3   : > { %5121 = vtanh.f32 %v1544_v7  ;;  %1108 = vperm.xlu1 %5003, %v479_v52   ;;  %v1410_v52 = vadd.f32 %v1282_v38, %v880_v40  ;;  %5035 = vset.pattern.permute.xlu0 %v5852_v2 }
  0xd5   : > { %v5112_v14 = vpop.eup %5111  ;;  %v1029_v16 = vpop.permute.xlu1 %1028  ;;  %v1550_v6 = vadd.f32 %v6107_v11, %v1410_v52 }
  0xd6   : > { %v5114_v17 = vpop.eup %5113  ;;  %v1277_v19 = vmul.f32 %v6085_v60, %v1029_v16  ;;  %v1278_v21 = vmul.f32 %v6087_v61, %v1029_v16  ;;  %v1785_v39 = vpack.c.bf16 %v5112_v14, %v5108_v9  ;;  %v600_v9 = vpop.permute.xlu0 %599 }
  0xd7   : > { %1112 = vperm.xlu1 %5003, %v6072_v46   ;;  %v1786_v22 = vpack.c.bf16 %v5114_v17, %v5110_v12  ;;  %v5116_v37 = vpop.eup %5115  ;;  %v505_v12 = vld [vmem:[%s5953_s19 + $0x1d0] sm:$0xff] }
  0xd8   : > { %v1405_v23 = vadd.f32 %v1277_v19, %v875_v15  ;;  %v1406_v24 = vadd.f32 %v1278_v21, %v876_v18  ;;  %v5118_v41 = vpop.eup %5117  ;;  %1212 = vperm.xlu0 %5035, %v505_v12   ;;  %v5059_v18 = vld [vmem:[%s7309_s5 + $0x38] sm:$0xff]  }
  0xd9   : > { %2040 = vmatprep.mubr.bf16.mxu0 %v1786_v22  ;;  %v1033_v43 = vpop.permute.xlu1 %1032  ;;  %4660 = vmatprep.subr.bf16.mxu1 %v5059_v18 }
  0xda   : > { %v1545_v30 = vadd.f32 %v6104_v10, %v1405_v23  ;;  %v1279_v31 = vmul.f32 %v6085_v60, %v1033_v43  ;;  %v1280_v32 = vmul.f32 %v6087_v61, %v1033_v43  ;;  %2041 = vmatmul.mubr.bf16.gmra.mxu0 %v1785_v39  ;;  %v1546_v46 = vadd.f32 %v6107_v11, %v1406_v24  ;;  %v605_v16 = vpop.permute.xlu0 %604 }
  0xdb   : > { %5004 = vset.pattern.permute.xlu1 %v5853_v3  ;;  %4661 = vmatpush3.bf16.msra.mxu1 %v5059_v18 }
  0xdc   : > { %v1407_v35 = vadd.f32 %v1279_v31, %v877_v25  ;;  %v1408_v36 = vadd.f32 %v1280_v32, %v878_v27  ;;  %689 = vperm.xlu1 %5004, %v482_v29   ;;  %5123 = vtanh.f32 %v1545_v30  ;;  %5036 = vset.pattern.permute.xlu0 %v5853_v3  ;;  %v885_v32 = vmul.f32 %v6089_v62, %v600_v9 }
  0xdd   : > { %5125 = vtanh.f32 %v1546_v46  ;;  %804 = vperm.xlu0 %5036, %v505_v12   ;;  %v886_v46 = vmul.f32 %v6091_v63, %v600_v9 }
  0xde   : > { %v1547_v42 = vadd.f32 %v6104_v10, %v1407_v35  ;;  %v1548_v44 = vadd.f32 %v6107_v11, %v1408_v36  ;;  %v590_v45 = vpop.permute.xlu1 %589  ;;  %v1053_v33 = vpop.permute.xlu0 %1052  ;;  %v486_v35 = vld [vmem:[%s5953_s19 + $0x138] sm:$0xff]  ;;  %v6275_v36 = vld [vmem:[%s5953_s19 + $0x1e8] sm:$0xff] }
  0xdf   : > { %v5120_v47 = vpop.eup %5119  ;;  %v881_v58 = vmul.f32 %v6089_v62, %v590_v45  ;;  %v882_v59 = vmul.f32 %v6091_v63, %v590_v45 }
  0xe0   : > { %v5122_v49 = vpop.eup %5121  ;;  %5127 = vtanh.f32 %v1547_v42  ;;  %5006 = vset.pattern.permute.xlu1 %v5852_v2  ;;  %v1787_v50 = vpack.c.bf16 %v5120_v47, %v5116_v37  ;;  %v1289_v42 = vmul.f32 %v6085_v60, %v1053_v33 }
  0xe1   : > { %5129 = vtanh.f32 %v1548_v44  ;;  %1120 = vperm.xlu1 %5006, %v482_v29   ;;  %v1788_v51 = vpack.c.bf16 %v5122_v49, %v5118_v41  ;;  %v5060_v29 = vld [vmem:[%s7309_s5 + $0x30] sm:$0xff]   ;;  %v887_v41 = vmul.f32 %v6089_v62, %v605_v16  ;;  %v5061_v44 = vld [vmem:[%s7309_s5 + $0x28] sm:$0xff]   ;;  %819 = vperm.xlu0 %5036, %v6275_v36   ;;  %v888_v49 = vmul.f32 %v6091_v63, %v605_v16 }
  0xe2   : > { %5131 = vtanh.f32 %v1549_v55  ;;  %4662 = vmatprep.subr.bf16.mxu1 %v5060_v29 }
  0xe3   : > { %2048 = vmatprep.mubr.bf16.mxu0 %v1788_v51  ;;  %v1041_v54 = vpop.permute.xlu1 %1040  ;;  %5133 = vtanh.f32 %v1550_v6  ;;  %4663 = vmatpush3.bf16.msra.mxu1 %v5060_v29  ;;  %v509_v51 = vld [vmem:[%s5953_s19 + $0x1f0] sm:$0xff] }
  0xe4   : > { %v1283_v0 = vmul.f32 %v6085_v60, %v1041_v54  ;;  %v1284_v1 = vmul.f32 %v6087_v61, %v1041_v54  ;;  %2049 = vmatmul.mubr.bf16.gmra.mxu0 %v1787_v50  ;;  %v1290_v50 = vmul.f32 %v6087_v61, %v1053_v33  ;;  %4664 = vmatprep.subr.bf16.mxu1 %v5061_v44 }
  0xe5   : > { %5007 = vset.pattern.permute.xlu1 %v5853_v3  ;;  %824 = vperm.xlu0 %5036, %v509_v51  }
  0xe6   : > { %v1411_v7 = vadd.f32 %v1283_v0, %v881_v58  ;;  %v1412_v8 = vadd.f32 %v1284_v1, %v882_v59  ;;  %694 = vperm.xlu1 %5007, %v483_v57   ;;  %v1417_v59 = vadd.f32 %v1289_v42, %v887_v41  ;;  %v5062_v0 = vld [vmem:[%s7309_s5 + $0x20] sm:$0xff]  }
  0xe7   : > { %4665 = vmatpush3.bf16.msra.mxu1 %v5061_v44 }
  0xe8   : > { %v1551_v13 = vadd.f32 %v6104_v10, %v1411_v7  ;;  %v1552_v14 = vadd.f32 %v6107_v11, %v1412_v8  ;;  %v595_v15 = vpop.permute.xlu1 %594  ;;  %v1418_v8 = vadd.f32 %v1290_v50, %v888_v49  ;;  %4666 = vmatprep.subr.bf16.mxu1 %v5062_v0  ;;  %v490_v49 = vld [vmem:[%s5953_s19 + $0x158] sm:$0xff] }
  0xe9   : > { %v5124_v17 = vpop.eup %5123  ;;  %v883_v39 = vmul.f32 %v6089_v62, %v595_v15  ;;  %v884_v22 = vmul.f32 %v6091_v63, %v595_v15  ;;  %v5063_v15 = vld [vmem:[%s7309_s5 + $0x18] sm:$0xff]   ;;  %5041 = vset.pattern.permute.xlu0 %v5852_v2 }
  0xea   : > { %5135 = vtanh.f32 %v1551_v13  ;;  %5008 = vset.pattern.permute.xlu1 %v5852_v2  ;;  %v5126_v19 = vpop.eup %5125  ;;  %v1557_v13 = vadd.f32 %v6104_v10, %v1417_v59  ;;  %1228 = vperm.xlu0 %5041, %v509_v51  }
  0xeb   : > { %5137 = vtanh.f32 %v1552_v14  ;;  %1124 = vperm.xlu1 %5008, %v483_v57   ;;  %v487_v14 = vld [vmem:[%s5953_s19 + $0x140] sm:$0xff]  ;;  %4667 = vmatpush3.bf16.msra.mxu1 %v5062_v0 }
  0xec   : > { %4668 = vmatprep.subr.bf16.mxu1 %v5063_v15 }
  0xed   : > { %v5128_v21 = vpop.eup %5127  ;;  %v1045_v23 = vpop.permute.xlu1 %1044 }
  0xee   : > { %v5130_v24 = vpop.eup %5129  ;;  %v1285_v25 = vmul.f32 %v6085_v60, %v1045_v23  ;;  %v1286_v27 = vmul.f32 %v6087_v61, %v1045_v23  ;;  %v1789_v28 = vpack.c.bf16 %v5128_v21, %v5124_v17  ;;  %v5064_v23 = vld [vmem:[%s7309_s5 + $0x10] sm:$0xff]  }
  0xef   : > { %1128 = vperm.xlu1 %5008, %v6097_v5   ;;  %v1790_v43 = vpack.c.bf16 %v5130_v24, %v5126_v19  ;;  %v5132_v48 = vpop.eup %5131  ;;  %v1558_v19 = vadd.f32 %v6107_v11, %v1418_v8  ;;  %4669 = vmatpush3.bf16.msra.mxu1 %v5063_v15 }
  0xf0   : > { %v1413_v30 = vadd.f32 %v1285_v25, %v883_v39  ;;  %v1414_v31 = vadd.f32 %v1286_v27, %v884_v22  ;;  %v5134_v52 = vpop.eup %5133  ;;  %v1069_v22 = vpop.permute.xlu0 %1068  ;;  %4670 = vmatprep.subr.bf16.mxu1 %v5064_v23 }
  0xf1   : > { %2056 = vmatprep.mubr.bf16.mxu0 %v1790_v43  ;;  %v1049_v34 = vpop.permute.xlu1 %1048  ;;  %v5065_v43 = vld [vmem:[%s7309_s5 + $0x8] sm:$0xff]   ;;  %v1298_v0 = vmul.f32 %v6087_v61, %v1069_v22 }
  0xf2   : > { %v1553_v5 = vadd.f32 %v6104_v10, %v1413_v30  ;;  %v1287_v37 = vmul.f32 %v6085_v60, %v1049_v34  ;;  %v1288_v38 = vmul.f32 %v6087_v61, %v1049_v34  ;;  %2057 = vmatmul.mubr.bf16.gmra.mxu0 %v1789_v28  ;;  %v1554_v40 = vadd.f32 %v6107_v11, %v1414_v31 }
  0xf3   : > { %5009 = vset.pattern.permute.xlu1 %v5853_v3  ;;  %4671 = vmatpush3.bf16.msra.mxu1 %v5064_v23 }
  0xf4   : > { %v1415_v45 = vadd.f32 %v1287_v37, %v885_v32  ;;  %v1416_v47 = vadd.f32 %v1288_v38, %v886_v46  ;;  %709 = vperm.xlu1 %5009, %v486_v35   ;;  %5139 = vtanh.f32 %v1553_v5  ;;  %v620_v30 = vpop.permute.xlu0 %619  ;;  %4672 = vmatprep.subr.bf16.mxu1 %v5065_v43 }
  0xf5   : > { %5141 = vtanh.f32 %v1554_v40  ;;  %v5066_v40 = vld [vmem:[%s7309_s5] sm:$0xff]   ;;  %v893_v44 = vmul.f32 %v6089_v62, %v620_v30 }
  0xf6   : > { %v1555_v54 = vadd.f32 %v6104_v10, %v1415_v45  ;;  %v1556_v55 = vadd.f32 %v6107_v11, %v1416_v47  ;;  %v610_v57 = vpop.permute.xlu1 %609  ;;  %v894_v45 = vmul.f32 %v6091_v63, %v620_v30 }
  0xf7   : > { %v5136_v58 = vpop.eup %5135  ;;  %v889_v9 = vmul.f32 %v6089_v62, %v610_v57  ;;  %v890_v16 = vmul.f32 %v6091_v63, %v610_v57  ;;  %4673 = vmatpush3.bf16.msra.mxu1 %v5065_v43 }
  0xf8   : > { %v5138_v1 = vpop.eup %5137  ;;  %5143 = vtanh.f32 %v1555_v54  ;;  %5011 = vset.pattern.permute.xlu1 %v5852_v2  ;;  %v1791_v6 = vpack.c.bf16 %v5136_v58, %v5132_v48  ;;  %v625_v47 = vpop.permute.xlu0 %624  ;;  %4674 = vmatprep.subr.bf16.mxu1 %v5066_v40  ;;  %v1297_v54 = vmul.f32 %v6085_v60, %v1069_v22 }
  0xf9   : > { %5145 = vtanh.f32 %v1556_v55  ;;  %1136 = vperm.xlu1 %5011, %v486_v35   ;;  %v1792_v7 = vpack.c.bf16 %v5138_v1, %v5134_v52  ;;  %v895_v55 = vmul.f32 %v6089_v62, %v625_v47  ;;  %v896_v1 = vmul.f32 %v6091_v63, %v625_v47 }
  0xfa   : > { %5147 = vtanh.f32 %v1557_v13 }
  0xfb   : > { %2064 = vmatprep.mubr.bf16.mxu0 %v1792_v7  ;;  %v1057_v12 = vpop.permute.xlu1 %1056  ;;  %5149 = vtanh.f32 %v1558_v19  ;;  %4675 = vmatpush3.bf16.msra.mxu1 %v5066_v40  ;;  %v1425_v13 = vadd.f32 %v1297_v54, %v895_v55 }
  0xfc   : > { %v1291_v17 = vmul.f32 %v6085_v60, %v1057_v12  ;;  %v1292_v18 = vmul.f32 %v6087_v61, %v1057_v12  ;;  %2065 = vmatmul.mubr.bf16.gmra.mxu0 %v1791_v6  ;;  %v640_v43 = vpop.permute.xlu0 %639 }
  0xfd   : > { %5012 = vset.pattern.permute.xlu1 %v5853_v3  ;;  %v1565_v19 = vadd.f32 %v6104_v10, %v1425_v13 }
  0xfe   : > { %v1419_v21 = vadd.f32 %v1291_v17, %v889_v9  ;;  %v1420_v39 = vadd.f32 %v1292_v18, %v890_v16  ;;  %714 = vperm.xlu1 %5012, %v487_v14   ;;  %v1426_v17 = vadd.f32 %v1298_v0, %v896_v1 }
 0x100   : > { %v1559_v24 = vadd.f32 %v6104_v10, %v1419_v21  ;;  %v1560_v25 = vadd.f32 %v6107_v11, %v1420_v39  ;;  %v615_v27 = vpop.permute.xlu1 %614  ;;  %v491_v21 = vld [vmem:[%s5953_s19 + $0x160] sm:$0xff] }
 0x101   : > { %v5140_v28 = vpop.eup %5139  ;;  %v891_v32 = vmul.f32 %v6089_v62, %v615_v27  ;;  %v892_v34 = vmul.f32 %v6091_v63, %v615_v27 }
 0x102   : > { %5151 = vtanh.f32 %v1559_v24  ;;  %5013 = vset.pattern.permute.xlu1 %v5852_v2  ;;  %v5142_v29 = vpop.eup %5141 }
 0x103   : > { %5153 = vtanh.f32 %v1560_v25  ;;  %1140 = vperm.xlu1 %5013, %v487_v14   ;;  %v1566_v25 = vadd.f32 %v6107_v11, %v1426_v17 }
 0x105   : > { %v5144_v31 = vpop.eup %5143  ;;  %v1061_v46 = vpop.permute.xlu1 %1060 }
 0x106   : > { %v5146_v33 = vpop.eup %5145  ;;  %v1293_v35 = vmul.f32 %v6085_v60, %v1061_v46  ;;  %v1294_v5 = vmul.f32 %v6087_v61, %v1061_v46  ;;  %v1793_v37 = vpack.c.bf16 %v5144_v31, %v5140_v28  ;;  %v645_v46 = vpop.permute.xlu0 %644 }
 0x107   : > { %1144 = vperm.xlu1 %5013, %v6119_v26   ;;  %v1794_v38 = vpack.c.bf16 %v5146_v33, %v5142_v29  ;;  %v5148_v59 = vpop.eup %5147 }
 0x108   : > { %v1421_v41 = vadd.f32 %v1293_v35, %v891_v32  ;;  %v1422_v42 = vadd.f32 %v1294_v5, %v892_v34  ;;  %v5150_v6 = vpop.eup %5149 }
 0x109   : > { %2072 = vmatprep.mubr.bf16.mxu0 %v1794_v38  ;;  %v1065_v48 = vpop.permute.xlu1 %1064 }
 0x10a   : > { %v1561_v50 = vadd.f32 %v6104_v10, %v1421_v41  ;;  %v1295_v26 = vmul.f32 %v6085_v60, %v1065_v48  ;;  %v1296_v51 = vmul.f32 %v6087_v61, %v1065_v48  ;;  %2073 = vmatmul.mubr.bf16.gmra.mxu0 %v1793_v37  ;;  %v1562_v52 = vadd.f32 %v6107_v11, %v1422_v42 }
 0x10b   : > { %5014 = vset.pattern.permute.xlu1 %v5853_v3  ;;  %v901_v48 = vmul.f32 %v6089_v62, %v640_v43 }
 0x10c   : > { %v1423_v57 = vadd.f32 %v1295_v26, %v893_v44  ;;  %v1424_v58 = vadd.f32 %v1296_v51, %v894_v45  ;;  %729 = vperm.xlu1 %5014, %v490_v49   ;;  %5155 = vtanh.f32 %v1561_v50  ;;  %v494_v26 = vld [vmem:[%s5953_s19 + $0x178] sm:$0xff]  ;;  %v1085_v51 = vpop.permute.xlu0 %1084 }
 0x10d   : > { %5157 = vtanh.f32 %v1562_v52  ;;  %v1305_v0 = vmul.f32 %v6085_v60, %v1085_v51 }
 0x10e   : > { %v1563_v7 = vadd.f32 %v6104_v10, %v1423_v57  ;;  %v1564_v8 = vadd.f32 %v6107_v11, %v1424_v58  ;;  %v630_v9 = vpop.permute.xlu1 %629 }
 0x10f   : > { %v5152_v12 = vpop.eup %5151  ;;  %v897_v39 = vmul.f32 %v6089_v62, %v630_v9  ;;  %v898_v22 = vmul.f32 %v6091_v63, %v630_v9 }
 0x110   : > { %v5154_v14 = vpop.eup %5153  ;;  %5159 = vtanh.f32 %v1563_v7  ;;  %5016 = vset.pattern.permute.xlu1 %v5852_v2  ;;  %v1795_v15 = vpack.c.bf16 %v5152_v12, %v5148_v59  ;;  %v903_v59 = vmul.f32 %v6089_v62, %v645_v46  ;;  %v1306_v12 = vmul.f32 %v6087_v61, %v1085_v51  ;;  %v498_v51 = vld [vmem:[%s5953_s19 + $0x198] sm:$0xff] }
 0x111   : > { %5161 = vtanh.f32 %v1564_v8  ;;  %1152 = vperm.xlu1 %5016, %v490_v49   ;;  %v1796_v16 = vpack.c.bf16 %v5154_v14, %v5150_v6  ;;  %v902_v49 = vmul.f32 %v6091_v63, %v640_v43  ;;  %v904_v6 = vmul.f32 %v6091_v63, %v645_v46 }
 0x112   : > { %5163 = vtanh.f32 %v1565_v19  ;;  %v1433_v17 = vadd.f32 %v1305_v0, %v903_v59 }
 0x113   : > { %2080 = vmatprep.mubr.bf16.mxu0 %v1796_v16  ;;  %v1073_v18 = vpop.permute.xlu1 %1072  ;;  %5165 = vtanh.f32 %v1566_v25  ;;  %v1434_v19 = vadd.f32 %v1306_v12, %v904_v6 }
 0x114   : > { %v1299_v23 = vmul.f32 %v6085_v60, %v1073_v18  ;;  %v1300_v24 = vmul.f32 %v6087_v61, %v1073_v18  ;;  %2081 = vmatmul.mubr.bf16.gmra.mxu0 %v1795_v15 }
 0x115   : > { %5017 = vset.pattern.permute.xlu1 %v5853_v3 }
 0x116   : > { %v1427_v27 = vadd.f32 %v1299_v23, %v897_v39  ;;  %v1428_v28 = vadd.f32 %v1300_v24, %v898_v22  ;;  %734 = vperm.xlu1 %5017, %v491_v21   ;;  %v1573_v22 = vadd.f32 %v6104_v10, %v1433_v17 }
 0x118   : > { %v1567_v29 = vadd.f32 %v6104_v10, %v1427_v27  ;;  %v1568_v30 = vadd.f32 %v6107_v11, %v1428_v28  ;;  %v635_v31 = vpop.permute.xlu1 %634  ;;  %v1574_v28 = vadd.f32 %v6107_v11, %v1434_v19 }
 0x119   : > { %v5156_v32 = vpop.eup %5155  ;;  %v899_v35 = vmul.f32 %v6089_v62, %v635_v31  ;;  %v900_v38 = vmul.f32 %v6091_v63, %v635_v31 }
 0x11a   : > { %5167 = vtanh.f32 %v1567_v29  ;;  %5018 = vset.pattern.permute.xlu1 %v5852_v2  ;;  %v5158_v33 = vpop.eup %5157 }
 0x11b   : > { %5169 = vtanh.f32 %v1568_v30  ;;  %1156 = vperm.xlu1 %5018, %v491_v21   ;;  %v495_v21 = vld [vmem:[%s5953_s19 + $0x180] sm:$0xff]  ;;  %v1101_v30 = vpop.permute.xlu0 %1100 }
 0x11d   : > { %v5160_v34 = vpop.eup %5159  ;;  %v1077_v5 = vpop.permute.xlu1 %1076 }
 0x11e   : > { %v5162_v37 = vpop.eup %5161  ;;  %v1301_v40 = vmul.f32 %v6085_v60, %v1077_v5  ;;  %v1302_v41 = vmul.f32 %v6087_v61, %v1077_v5  ;;  %v1797_v42 = vpack.c.bf16 %v5160_v34, %v5156_v32 }
 0x11f   : > { %1160 = vperm.xlu1 %5018, %v6153_v20   ;;  %v1798_v44 = vpack.c.bf16 %v5162_v37, %v5158_v33  ;;  %v5164_v1 = vpop.eup %5163  ;;  %v660_v5 = vpop.permute.xlu0 %659 }
 0x120   : > { %v1429_v45 = vadd.f32 %v1301_v40, %v899_v35  ;;  %v1430_v47 = vadd.f32 %v1302_v41, %v900_v38  ;;  %v5166_v7 = vpop.eup %5165 }
 0x121   : > { %2088 = vmatprep.mubr.bf16.mxu0 %v1798_v44  ;;  %v1081_v50 = vpop.permute.xlu1 %1080 }
 0x122   : > { %v1569_v52 = vadd.f32 %v6104_v10, %v1429_v45  ;;  %v1303_v54 = vmul.f32 %v6085_v60, %v1081_v50  ;;  %v1304_v55 = vmul.f32 %v6087_v61, %v1081_v50  ;;  %2089 = vmatmul.mubr.bf16.gmra.mxu0 %v1797_v42  ;;  %v1570_v20 = vadd.f32 %v6107_v11, %v1430_v47 }
 0x123   : > { %5019 = vset.pattern.permute.xlu1 %v5853_v3  ;;  %v909_v50 = vmul.f32 %v6089_v62, %v660_v5 }
 0x124   : > { %v1431_v57 = vadd.f32 %v1303_v54, %v901_v48  ;;  %v1432_v58 = vadd.f32 %v1304_v55, %v902_v49  ;;  %749 = vperm.xlu1 %5019, %v494_v26   ;;  %5171 = vtanh.f32 %v1569_v52  ;;  %v665_v52 = vpop.permute.xlu0 %664 }
 0x125   : > { %5173 = vtanh.f32 %v1570_v20  ;;  %v911_v59 = vmul.f32 %v6089_v62, %v665_v52 }
 0x126   : > { %v1571_v8 = vadd.f32 %v6104_v10, %v1431_v57  ;;  %v1572_v9 = vadd.f32 %v6107_v11, %v1432_v58  ;;  %v1313_v58 = vmul.f32 %v6085_v60, %v1101_v30 }
 0x127   : > { %v5168_v13 = vpop.eup %5167  ;;  %v650_v14 = vpop.permute.xlu1 %649 }
 0x128   : > { %v5170_v15 = vpop.eup %5169  ;;  %5175 = vtanh.f32 %v1571_v8  ;;  %5021 = vset.pattern.permute.xlu1 %v5852_v2  ;;  %v1799_v16 = vpack.c.bf16 %v5168_v13, %v5164_v1  ;;  %v905_v23 = vmul.f32 %v6089_v62, %v650_v14  ;;  %v906_v24 = vmul.f32 %v6091_v63, %v650_v14 }
 0x129   : > { %5177 = vtanh.f32 %v1572_v9  ;;  %1168 = vperm.xlu1 %5021, %v494_v26   ;;  %v1800_v18 = vpack.c.bf16 %v5170_v15, %v5166_v7  ;;  %v910_v26 = vmul.f32 %v6091_v63, %v660_v5  ;;  %v1314_v7 = vmul.f32 %v6087_v61, %v1101_v30 }
 0x12a   : > { %5179 = vtanh.f32 %v1573_v22  ;;  %v912_v8 = vmul.f32 %v6091_v63, %v665_v52 }
 0x12b   : > { %2096 = vmatprep.mubr.bf16.mxu0 %v1800_v18  ;;  %5181 = vtanh.f32 %v1574_v28 }
 0x12c   : > { %v1089_v39 = vpop.permute.xlu1 %1088  ;;  %2097 = vmatmul.mubr.bf16.gmra.mxu0 %v1799_v16  ;;  %v1441_v16 = vadd.f32 %v1313_v58, %v911_v59 }
 0x12d   : > { %v1307_v25 = vmul.f32 %v6085_v60, %v1089_v39  ;;  %v1308_v27 = vmul.f32 %v6087_v61, %v1089_v39  ;;  %5022 = vset.pattern.permute.xlu1 %v5853_v3  ;;  %v499_v39 = vld [vmem:[%s5953_s19 + $0x1a0] sm:$0xff] }
 0x12e   : > { %754 = vperm.xlu1 %5022, %v495_v21  }
 0x12f   : > { %v1435_v43 = vadd.f32 %v1307_v25, %v905_v23  ;;  %v1436_v29 = vadd.f32 %v1308_v27, %v906_v24  ;;  %v1581_v24 = vadd.f32 %v6104_v10, %v1441_v16 }
 0x131   : > { %v1575_v31 = vadd.f32 %v6104_v10, %v1435_v43  ;;  %v1576_v32 = vadd.f32 %v6107_v11, %v1436_v29  ;;  %v655_v46 = vpop.permute.xlu1 %654  ;;  %v5172_v33 = vpop.eup %5171 }
 0x132   : > { %5023 = vset.pattern.permute.xlu1 %v5852_v2  ;;  %v5174_v34 = vpop.eup %5173  ;;  %v907_v38 = vmul.f32 %v6089_v62, %v655_v46  ;;  %v908_v42 = vmul.f32 %v6091_v63, %v655_v46 }
 0x133   : > { %5183 = vtanh.f32 %v1575_v31  ;;  %1172 = vperm.xlu1 %5023, %v495_v21   ;;  %v1442_v21 = vadd.f32 %v1314_v7, %v912_v8  ;;  %v680_v31 = vpop.permute.xlu0 %679 }
 0x134   : > { %5185 = vtanh.f32 %v1576_v32 }
 0x135   : > { %v5176_v35 = vpop.eup %5175  ;;  %v1582_v43 = vadd.f32 %v6107_v11, %v1442_v21 }
 0x136   : > { %v5178_v37 = vpop.eup %5177  ;;  %v1093_v40 = vpop.permute.xlu1 %1092  ;;  %v1801_v41 = vpack.c.bf16 %v5176_v35, %v5172_v33 }
 0x137   : > { %v1309_v44 = vmul.f32 %v6085_v60, %v1093_v40  ;;  %v1310_v45 = vmul.f32 %v6087_v61, %v1093_v40  ;;  %1176 = vperm.xlu1 %5023, %v6177_v56   ;;  %v1802_v47 = vpack.c.bf16 %v5178_v37, %v5174_v34  ;;  %v5180_v6 = vpop.eup %5179  ;;  %v685_v34 = vpop.permute.xlu0 %684 }
 0x138   : > { %v5182_v9 = vpop.eup %5181  ;;  %v919_v58 = vmul.f32 %v6089_v62, %v685_v34  ;;  %v920_v7 = vmul.f32 %v6091_v63, %v685_v34 }
 0x139   : > { %v1437_v48 = vadd.f32 %v1309_v44, %v907_v38  ;;  %v1438_v49 = vadd.f32 %v1310_v45, %v908_v42  ;;  %2104 = vmatprep.mubr.bf16.mxu0 %v1802_v47 }
 0x13a   : > { %v1097_v54 = vpop.permute.xlu1 %1096  ;;  %2105 = vmatmul.mubr.bf16.gmra.mxu0 %v1801_v41 }
 0x13b   : > { %v1577_v55 = vadd.f32 %v6104_v10, %v1437_v48  ;;  %v1311_v20 = vmul.f32 %v6085_v60, %v1097_v54  ;;  %v1312_v57 = vmul.f32 %v6087_v61, %v1097_v54  ;;  %5024 = vset.pattern.permute.xlu1 %v5853_v3  ;;  %v1578_v56 = vadd.f32 %v6107_v11, %v1438_v49  ;;  %v1117_v52 = vpop.permute.xlu0 %1116 }
 0x13c   : > { %769 = vperm.xlu1 %5024, %v498_v51   ;;  %v1321_v59 = vmul.f32 %v6085_v60, %v1117_v52  ;;  %v1322_v8 = vmul.f32 %v6087_v61, %v1117_v52 }
 0x13d   : > { %v1439_v0 = vadd.f32 %v1311_v20, %v909_v50  ;;  %v1440_v1 = vadd.f32 %v1312_v57, %v910_v26  ;;  %5187 = vtanh.f32 %v1577_v55  ;;  %v917_v26 = vmul.f32 %v6089_v62, %v680_v31  ;;  %v502_v55 = vld [vmem:[%s5953_s19 + $0x1b8] sm:$0xff] }
 0x13e   : > { %5189 = vtanh.f32 %v1578_v56  ;;  %v1449_v16 = vadd.f32 %v1321_v59, %v919_v58  ;;  %v1450_v21 = vadd.f32 %v1322_v8, %v920_v7 }
 0x13f   : > { %v1579_v12 = vadd.f32 %v6104_v10, %v1439_v0  ;;  %v1580_v13 = vadd.f32 %v6107_v11, %v1440_v1  ;;  %v670_v14 = vpop.permute.xlu1 %669 }
 0x140   : > { %v5184_v15 = vpop.eup %5183  ;;  %5026 = vset.pattern.permute.xlu1 %v5852_v2  ;;  %v913_v22 = vmul.f32 %v6089_v62, %v670_v14  ;;  %v914_v25 = vmul.f32 %v6091_v63, %v670_v14 }
 0x141   : > { %v5186_v17 = vpop.eup %5185  ;;  %5191 = vtanh.f32 %v1579_v12  ;;  %1184 = vperm.xlu1 %5026, %v498_v51   ;;  %v1803_v18 = vpack.c.bf16 %v5184_v15, %v5180_v6  ;;  %v918_v51 = vmul.f32 %v6091_v63, %v680_v31  ;;  %v1133_v31 = vpop.permute.xlu0 %1132 }
 0x142   : > { %5193 = vtanh.f32 %v1580_v13  ;;  %v1804_v19 = vpack.c.bf16 %v5186_v17, %v5182_v9 }
 0x143   : > { %5195 = vtanh.f32 %v1581_v24 }
 0x144   : > { %2112 = vmatprep.mubr.bf16.mxu0 %v1804_v19  ;;  %v1105_v23 = vpop.permute.xlu1 %1104  ;;  %5197 = vtanh.f32 %v1582_v43  ;;  %v1590_v43 = vadd.f32 %v6107_v11, %v1450_v21 }
 0x145   : > { %v1315_v27 = vmul.f32 %v6085_v60, %v1105_v23  ;;  %v1316_v28 = vmul.f32 %v6087_v61, %v1105_v23  ;;  %2113 = vmatmul.mubr.bf16.gmra.mxu0 %v1803_v18  ;;  %5027 = vset.pattern.permute.xlu1 %v5853_v3  ;;  %v503_v23 = vld [vmem:[%s5953_s19 + $0x1c0] sm:$0xff] }
 0x146   : > { %774 = vperm.xlu1 %5027, %v499_v39  }
 0x147   : > { %v1443_v29 = vadd.f32 %v1315_v27, %v913_v22  ;;  %v1444_v30 = vadd.f32 %v1316_v28, %v914_v25  ;;  %v1589_v22 = vadd.f32 %v6104_v10, %v1449_v16 }
 0x149   : > { %v1583_v32 = vadd.f32 %v6104_v10, %v1443_v29  ;;  %v1584_v46 = vadd.f32 %v6107_v11, %v1444_v30  ;;  %v675_v33 = vpop.permute.xlu1 %674 }
 0x14a   : > { %5028 = vset.pattern.permute.xlu1 %v5852_v2  ;;  %v5188_v35 = vpop.eup %5187  ;;  %v915_v38 = vmul.f32 %v6089_v62, %v675_v33  ;;  %v916_v42 = vmul.f32 %v6091_v63, %v675_v33 }
 0x14b   : > { %5199 = vtanh.f32 %v1583_v32  ;;  %1188 = vperm.xlu1 %5028, %v499_v39   ;;  %v5190_v5 = vpop.eup %5189 }
 0x14c   : > { %5201 = vtanh.f32 %v1584_v46 }
 0x14e   : > { %v5192_v37 = vpop.eup %5191  ;;  %v1109_v40 = vpop.permute.xlu1 %1108 }
 0x14f   : > { %v5194_v41 = vpop.eup %5193  ;;  %v1317_v44 = vmul.f32 %v6085_v60, %v1109_v40  ;;  %v1318_v45 = vmul.f32 %v6087_v61, %v1109_v40  ;;  %1192 = vperm.xlu1 %5028, %v6216_v4   ;;  %v1805_v47 = vpack.c.bf16 %v5192_v37, %v5188_v35 }
 0x150   : > { %v1806_v48 = vpack.c.bf16 %v5194_v41, %v5190_v5  ;;  %v5196_v6 = vpop.eup %5195  ;;  %v700_v5 = vpop.permute.xlu0 %699 }
 0x151   : > { %v1445_v49 = vadd.f32 %v1317_v44, %v915_v38  ;;  %v1446_v50 = vadd.f32 %v1318_v45, %v916_v42  ;;  %v5198_v9 = vpop.eup %5197  ;;  %v926_v52 = vmul.f32 %v6091_v63, %v700_v5 }
 0x152   : > { %2120 = vmatprep.mubr.bf16.mxu0 %v1806_v48  ;;  %v1113_v54 = vpop.permute.xlu1 %1112 }
 0x153   : > { %v1585_v20 = vadd.f32 %v6104_v10, %v1445_v49  ;;  %v1319_v57 = vmul.f32 %v6085_v60, %v1113_v54  ;;  %v1320_v56 = vmul.f32 %v6087_v61, %v1113_v54  ;;  %2121 = vmatmul.mubr.bf16.gmra.mxu0 %v1805_v47  ;;  %v1586_v4 = vadd.f32 %v6107_v11, %v1446_v50 }
 0x154   : > { %5029 = vset.pattern.permute.xlu1 %v5853_v3  ;;  %v705_v54 = vpop.permute.xlu0 %704 }
 0x155   : > { %v1447_v0 = vadd.f32 %v1319_v57, %v917_v26  ;;  %v1448_v1 = vadd.f32 %v1320_v56, %v918_v51  ;;  %789 = vperm.xlu1 %5029, %v502_v55   ;;  %5203 = vtanh.f32 %v1585_v20  ;;  %v6453_v26 = vld [vmem:[%s7308_s4] ss:$0 sm:$0xff]  ;;  %v925_v51 = vmul.f32 %v6089_v62, %v700_v5  ;;  %v506_v57 = vld [vmem:[%s5953_s19 + $0x1d8] sm:$0xff] }
 0x156   : > { %5205 = vtanh.f32 %v1586_v4  ;;  %v928_v7 = vmul.f32 %v6091_v63, %v705_v54 }
 0x157   : > { %v1587_v12 = vadd.f32 %v6104_v10, %v1447_v0  ;;  %v1588_v13 = vadd.f32 %v6107_v11, %v1448_v1  ;;  %v690_v14 = vpop.permute.xlu1 %689  ;;  %v1330_v0 = vmul.f32 %v6087_v61, %v1133_v31 }
 0x158   : > { %v5200_v15 = vpop.eup %5199  ;;  %v921_v24 = vmul.f32 %v6089_v62, %v690_v14  ;;  %v922_v25 = vmul.f32 %v6091_v63, %v690_v14 }
 0x159   : > { %v5202_v17 = vpop.eup %5201  ;;  %5207 = vtanh.f32 %v1587_v12  ;;  %5031 = vset.pattern.permute.xlu1 %v5852_v2  ;;  %v1807_v18 = vpack.c.bf16 %v5200_v15, %v5196_v6  ;;  %v927_v6 = vmul.f32 %v6089_v62, %v705_v54 }
 0x15a   : > { %5209 = vtanh.f32 %v1588_v13  ;;  %1200 = vperm.xlu1 %5031, %v502_v55   ;;  %v1808_v19 = vpack.c.bf16 %v5202_v17, %v5198_v9  ;;  %v1329_v55 = vmul.f32 %v6085_v60, %v1133_v31 }
 0x15b   : > { %5211 = vtanh.f32 %v1589_v22  ;;  %v1458_v22 = vadd.f32 %v1330_v0, %v928_v7 }
 0x15c   : > { %2128 = vmatprep.mubr.bf16.mxu0 %v1808_v19  ;;  %v1121_v39 = vpop.permute.xlu1 %1120  ;;  %5213 = vtanh.f32 %v1590_v43 }
 0x15d   : > { %v1323_v27 = vmul.f32 %v6085_v60, %v1121_v39  ;;  %v1324_v28 = vmul.f32 %v6087_v61, %v1121_v39  ;;  %2129 = vmatmul.mubr.bf16.gmra.mxu0 %v1807_v18  ;;  %v1457_v39 = vadd.f32 %v1329_v55, %v927_v6 }
 0x15e   : > { %5032 = vset.pattern.permute.xlu1 %v5853_v3 }
 0x15f   : > { %v1451_v29 = vadd.f32 %v1323_v27, %v921_v24  ;;  %v1452_v30 = vadd.f32 %v1324_v28, %v922_v25  ;;  %794 = vperm.xlu1 %5032, %v503_v23   ;;  %v1597_v43 = vadd.f32 %v6104_v10, %v1457_v39 }
 0x161   : > { %v1591_v32 = vadd.f32 %v6104_v10, %v1451_v29  ;;  %v1592_v46 = vadd.f32 %v6107_v11, %v1452_v30  ;;  %v695_v33 = vpop.permute.xlu1 %694  ;;  %v1598_v29 = vadd.f32 %v6107_v11, %v1458_v22  ;;  %v507_v30 = vld [vmem:[%s5953_s19 + $0x1e0] sm:$0xff] }
 0x162   : > { %v5204_v34 = vpop.eup %5203  ;;  %v923_v38 = vmul.f32 %v6089_v62, %v695_v33  ;;  %v924_v42 = vmul.f32 %v6091_v63, %v695_v33 }
 0x163   : > { %5215 = vtanh.f32 %v1591_v32  ;;  %5033 = vset.pattern.permute.xlu1 %v5852_v2  ;;  %v5206_v35 = vpop.eup %5205 }
 0x164   : > { %5217 = vtanh.f32 %v1592_v46  ;;  %1204 = vperm.xlu1 %5033, %v503_v23  }
 0x166   : > { %v5208_v37 = vpop.eup %5207  ;;  %v1125_v40 = vpop.permute.xlu1 %1124 }
 0x167   : > { %v5210_v41 = vpop.eup %5209  ;;  %v1325_v44 = vmul.f32 %v6085_v60, %v1125_v40  ;;  %v1326_v45 = vmul.f32 %v6087_v61, %v1125_v40  ;;  %v1809_v47 = vpack.c.bf16 %v5208_v37, %v5204_v34  ;;  %v720_v40 = vpop.permute.xlu0 %719 }
 0x168   : > { %1208 = vperm.xlu1 %5033, %v6243_v53   ;;  %v1810_v48 = vpack.c.bf16 %v5210_v41, %v5206_v35  ;;  %v5212_v13 = vpop.eup %5211 }
 0x169   : > { %v1453_v49 = vadd.f32 %v1325_v44, %v923_v38  ;;  %v1454_v50 = vadd.f32 %v1326_v45, %v924_v42  ;;  %v5214_v14 = vpop.eup %5213 }
 0x16a   : > { %2136 = vmatprep.mubr.bf16.mxu0 %v1810_v48  ;;  %v1129_v20 = vpop.permute.xlu1 %1128 }
 0x16b   : > { %v1593_v53 = vadd.f32 %v6104_v10, %v1453_v49  ;;  %v1594_v56 = vadd.f32 %v6107_v11, %v1454_v50  ;;  %v1327_v4 = vmul.f32 %v6085_v60, %v1129_v20  ;;  %v1328_v58 = vmul.f32 %v6087_v61, %v1129_v20  ;;  %v2010_v59 = vpop.f32.mrf.mxu0  ;;  %2137 = vmatmul.mubr.bf16.gmra.mxu0 %v1809_v47  ;;  %v725_v50 = vpop.permute.xlu0 %724 }
 0x16c   : > { %v2011_v1 = vadd.f32 %v6453_v26, %v2010_v59  ;;  %5034 = vset.pattern.permute.xlu1 %v5853_v3 }
 0x16d   : > { %v1455_v8 = vadd.f32 %v1327_v4, %v925_v51  ;;  %v1456_v9 = vadd.f32 %v1328_v58, %v926_v52  ;;  %809 = vperm.xlu1 %5034, %v506_v57   ;;  %v2012_v12 = vpop.f32.mrf.mxu0  ;;  %5219 = vtanh.f32 %v1593_v53 }
 0x16e   : > { %5221 = vtanh.f32 %v1594_v56 }
 0x16f   : > { %v1595_v15 = vadd.f32 %v6104_v10, %v1455_v8  ;;  %v1596_v16 = vadd.f32 %v6107_v11, %v1456_v9  ;;  %v2013_v17 = vpop.f32.mrf.mxu0  ;;  %v710_v18 = vpop.permute.xlu1 %709  ;;  %5223 = vtanh.f32 %v2011_v1  ;;  %v933_v1 = vmul.f32 %v6089_v62, %v720_v40 }
 0x170   : > { %v5216_v19 = vpop.eup %5215  ;;  %v2014_v21 = vadd.f32 %v6453_v26, %v2013_v17  ;;  %v929_v31 = vmul.f32 %v6089_v62, %v710_v18  ;;  %v930_v32 = vmul.f32 %v6091_v63, %v710_v18  ;;  %v934_v9 = vmul.f32 %v6091_v63, %v720_v40  ;;  %v1149_v12 = vpop.permute.xlu0 %1148 }
 0x171   : > { %v5218_v23 = vpop.eup %5217  ;;  %5225 = vtanh.f32 %v1595_v15  ;;  %5037 = vset.pattern.permute.xlu1 %v5852_v2  ;;  %v2015_v24 = vpop.f32.mrf.mxu0  ;;  %v1811_v25 = vpack.c.bf16 %v5216_v19, %v5212_v13  ;;  %v510_v15 = vld [vmem:[%s5953_s19 + $0x1f8] sm:$0xff]  ;;  %v936_v17 = vmul.f32 %v6091_v63, %v725_v50 }
 0x172   : > { %5227 = vtanh.f32 %v1596_v16  ;;  %1216 = vperm.xlu1 %5037, %v506_v57   ;;  %v1812_v27 = vpack.c.bf16 %v5218_v23, %v5214_v14  ;;  %v935_v16 = vmul.f32 %v6089_v62, %v725_v50  ;;  %v1337_v23 = vmul.f32 %v6085_v60, %v1149_v12 }
 0x173   : > { %5229 = vtanh.f32 %v2014_v21  ;;  %v1338_v24 = vmul.f32 %v6087_v61, %v1149_v12 }
 0x174   : > { %2144 = vmatprep.mubr.bf16.mxu0 %v1812_v27  ;;  %v1137_v28 = vpop.permute.xlu1 %1136  ;;  %5231 = vtanh.f32 %v1597_v43 }
 0x175   : > { %v1331_v46 = vmul.f32 %v6085_v60, %v1137_v28  ;;  %v1332_v33 = vmul.f32 %v6087_v61, %v1137_v28  ;;  %v2018_v34 = vpop.f32.mrf.mxu0  ;;  %2145 = vmatmul.mubr.bf16.gmra.mxu0 %v1811_v25  ;;  %5233 = vtanh.f32 %v1598_v29 }
 0x176   : > { %v2019_v35 = vadd.f32 %v6453_v26, %v2018_v34  ;;  %5038 = vset.pattern.permute.xlu1 %v5853_v3 }
 0x177   : > { %v1459_v5 = vadd.f32 %v1331_v46, %v929_v31  ;;  %v1460_v37 = vadd.f32 %v1332_v33, %v930_v32  ;;  %814 = vperm.xlu1 %5038, %v507_v30   ;;  %v2020_v38 = vpop.f32.mrf.mxu0 }
 0x178   : > { %5235 = vtanh.f32 %v2019_v35  ;;  %v1465_v35 = vadd.f32 %v1337_v23, %v935_v16 }
 0x179   : > { %v1599_v41 = vadd.f32 %v6104_v10, %v1459_v5  ;;  %v1600_v42 = vadd.f32 %v6107_v11, %v1460_v37  ;;  %v2021_v44 = vpop.f32.mrf.mxu0  ;;  %v715_v45 = vpop.permute.xlu1 %714  ;;  %v1466_v5 = vadd.f32 %v1338_v24, %v936_v17 }
 0x17a   : > { %v2022_v47 = vadd.f32 %v6453_v26, %v2021_v44  ;;  %v5220_v48 = vpop.eup %5219  ;;  %v931_v57 = vmul.f32 %v6089_v62, %v715_v45  ;;  %v932_v53 = vmul.f32 %v6091_v63, %v715_v45 }
 0x17b   : > { %5237 = vtanh.f32 %v1599_v41  ;;  %5039 = vset.pattern.permute.xlu1 %v5852_v2  ;;  %v2023_v49 = vpop.f32.mrf.mxu0  ;;  %v5222_v51 = vpop.eup %5221 }
 0x17c   : > { %5239 = vtanh.f32 %v1600_v42  ;;  %1220 = vperm.xlu1 %5039, %v507_v30   ;;  %v5224_v52 = vpop.eup %5223  ;;  %v1606_v49 = vadd.f32 %v6107_v11, %v1466_v5 }
 0x17d   : > { %5241 = vtanh.f32 %v2022_v47 }
 0x17e   : > { %v5226_v54 = vpop.eup %5225  ;;  %v1141_v55 = vpop.permute.xlu1 %1140 }
 0x17f   : > { %v5228_v20 = vpop.eup %5227  ;;  %v1333_v56 = vmul.f32 %v6085_v60, %v1141_v55  ;;  %v1334_v4 = vmul.f32 %v6087_v61, %v1141_v55  ;;  %v1813_v0 = vpack.c.bf16 %v5226_v54, %v5220_v48  ;;  %v1605_v48 = vadd.f32 %v6104_v10, %v1465_v35 }
 0x180   : > { %v5230_v58 = vpop.eup %5229  ;;  %1224 = vperm.xlu1 %5039, %v6275_v36   ;;  %v1814_v59 = vpack.c.bf16 %v5228_v20, %v5222_v51 }
 0x181   : > { %v1461_v6 = vadd.f32 %v1333_v56, %v931_v57  ;;  %v1462_v7 = vadd.f32 %v1334_v4, %v932_v53  ;;  %v2329_v8 = vpack.c.bf16 %v5230_v58, %v5224_v52  ;;  %v5232_v25 = vpop.eup %5231  ;;  %v1165_v57 = vpop.permute.xlu0 %1164 }
 0x182   : > { %2152 = vmatprep.mubr.bf16.mxu0 %v1814_v59  ;;  %v1145_v13 = vpop.permute.xlu1 %1144  ;;  %v2026_v14 = vpop.f32.mrf.mxu0 }
 0x183   : > { %v1601_v36 = vadd.f32 %v6104_v10, %v1461_v6  ;;  %v1602_v18 = vadd.f32 %v6107_v11, %v1462_v7  ;;  %4676 = vmatprep.mubr.bf16.mxu1 %v2329_v8  ;;  %v1335_v19 = vmul.f32 %v6085_v60, %v1145_v13  ;;  %v1336_v21 = vmul.f32 %v6087_v61, %v1145_v13  ;;  %v5234_v43 = vpop.eup %5233 }
 0x184   : > { %v2027_v39 = vadd.f32 %v6453_v26, %v2026_v14  ;;  %2153 = vmatmul.mubr.bf16.gmra.mxu0 %v1813_v0  ;;  %5040 = vset.pattern.permute.xlu1 %v5853_v3  ;;  %v2028_v22 = vpop.f32.mrf.mxu0 }
 0x185   : > { %v1463_v27 = vadd.f32 %v1335_v19, %v933_v1  ;;  %v1464_v28 = vadd.f32 %v1336_v21, %v934_v9  ;;  %829 = vperm.xlu1 %5040, %v510_v15   ;;  %5243 = vtanh.f32 %v1601_v36  ;;  %v5236_v30 = vpop.eup %5235  ;;  %v740_v8 = vpop.permute.xlu0 %739 }
 0x186   : > { %v2029_v29 = vpop.f32.mrf.mxu0  ;;  %5245 = vtanh.f32 %v1602_v18  ;;  %v941_v21 = vmul.f32 %v6089_v62, %v740_v8  ;;  %v942_v24 = vmul.f32 %v6091_v63, %v740_v8 }
 0x187   : > { %v1603_v31 = vadd.f32 %v6104_v10, %v1463_v27  ;;  %v1604_v32 = vadd.f32 %v6107_v11, %v1464_v28  ;;  %v2030_v3 = vadd.f32 %v6453_v26, %v2029_v29  ;;  %v730_v46 = vpop.permute.xlu1 %729  ;;  %5247 = vtanh.f32 %v2027_v39 }
 0x188   : > { %v5238_v33 = vpop.eup %5237  ;;  %v2031_v34 = vpop.f32.mrf.mxu0  ;;  %v937_v44 = vmul.f32 %v6089_v62, %v730_v46  ;;  %v938_v50 = vmul.f32 %v6091_v63, %v730_v46  ;;  %v1345_v27 = vmul.f32 %v6085_v60, %v1165_v57 }
 0x189   : > { %v5240_v37 = vpop.eup %5239  ;;  %5249 = vtanh.f32 %v1603_v31  ;;  %5042 = vset.pattern.permute.xlu1 %v5852_v2  ;;  %v1815_v38 = vpack.c.bf16 %v5238_v33, %v5232_v25  ;;  %v745_v25 = vpop.permute.xlu0 %744 }
 0x18a   : > { %v5242_v40 = vpop.eup %5241  ;;  %5251 = vtanh.f32 %v1604_v32  ;;  %1232 = vperm.xlu1 %5042, %v510_v15   ;;  %v1816_v41 = vpack.c.bf16 %v5240_v37, %v5234_v43  ;;  %v943_v34 = vmul.f32 %v6089_v62, %v745_v25  ;;  %v944_v35 = vmul.f32 %v6091_v63, %v745_v25 }
 0x18b   : > { %5253 = vtanh.f32 %v2030_v3  ;;  %v2330_v42 = vpack.c.bf16 %v5242_v40, %v5236_v30  ;;  %v1346_v3 = vmul.f32 %v6087_v61, %v1165_v57 }
 0x18c   : > { %2160 = vmatprep.mubr.bf16.mxu0 %v1816_v41  ;;  %v1153_v45 = vpop.permute.xlu1 %1152  ;;  %v2034_v47 = vpop.f32.mrf.mxu0  ;;  %5255 = vtanh.f32 %v1605_v48 }
 0x18d   : > { %4677 = vmatmul.mubr.bf16.vlgmr.msra.gmra.mxu1 %v2330_v42  ;;  %v1339_v2 = vmul.f32 %v6085_v60, %v1153_v45  ;;  %v1340_v51 = vmul.f32 %v6087_v61, %v1153_v45  ;;  %2161 = vmatmul.mubr.bf16.gmra.mxu0 %v1815_v38  ;;  %v2035_v52 = vadd.f32 %v6453_v26, %v2034_v47  ;;  %5257 = vtanh.f32 %v1606_v49 }
 0x18e   : > { %v2036_v54 = vpop.f32.mrf.mxu0 }
 0x18f   : > { %v1467_v55 = vadd.f32 %v1339_v2, %v937_v44  ;;  %v1468_v20 = vadd.f32 %v1340_v51, %v938_v50  ;;  %5259 = vtanh.f32 %v2035_v52  ;;  %v1473_v2 = vadd.f32 %v1345_v27, %v943_v34 }
 0x190   : > { %v2037_v53 = vpop.f32.mrf.mxu0  ;;  %v1474_v51 = vadd.f32 %v1346_v3, %v944_v35 }
 0x191   : > { %v1607_v56 = vadd.f32 %v6104_v10, %v1467_v55  ;;  %v1608_v4 = vadd.f32 %v6107_v11, %v1468_v20  ;;  %v2038_v58 = vadd.f32 %v6453_v26, %v2037_v53  ;;  %v735_v59 = vpop.permute.xlu1 %734 }
 0x192   : > { %v2039_v0 = vpop.f32.mrf.mxu0  ;;  %v5244_v1 = vpop.eup %5243  ;;  %v939_v14 = vmul.f32 %v6089_v62, %v735_v59  ;;  %v940_v15 = vmul.f32 %v6091_v63, %v735_v59  ;;  %v1614_v59 = vadd.f32 %v6107_v11, %v1474_v51 }
 0x193   : > { %5261 = vtanh.f32 %v1607_v56  ;;  %v5246_v6 = vpop.eup %5245 }
 0x194   : > { %5263 = vtanh.f32 %v1608_v4  ;;  %v5248_v7 = vpop.eup %5247 }
 0x195   : > { %5265 = vtanh.f32 %v2038_v58  ;;  %v1613_v58 = vadd.f32 %v6104_v10, %v1473_v2 }
 0x196   : > { %v5250_v9 = vpop.eup %5249  ;;  %v1157_v12 = vpop.permute.xlu1 %1156 }
 0x197   : > { %v5252_v13 = vpop.eup %5251  ;;  %v1341_v16 = vmul.f32 %v6085_v60, %v1157_v12  ;;  %v1342_v17 = vmul.f32 %v6087_v61, %v1157_v12  ;;  %v1817_v19 = vpack.c.bf16 %v5250_v9, %v5244_v1 }
 0x198   : > { %v5254_v36 = vpop.eup %5253  ;;  %v1818_v18 = vpack.c.bf16 %v5252_v13, %v5246_v6  ;;  %v760_v13 = vpop.permute.xlu0 %759 }
 0x199   : > { %v1469_v39 = vadd.f32 %v1341_v16, %v939_v14  ;;  %v1470_v22 = vadd.f32 %v1342_v17, %v940_v15  ;;  %v2331_v23 = vpack.c.bf16 %v5254_v36, %v5248_v7  ;;  %v5256_v5 = vpop.eup %5255  ;;  %v949_v3 = vmul.f32 %v6089_v62, %v760_v13 }
 0x19a   : > { %2168 = vmatprep.mubr.bf16.mxu0 %v1818_v18  ;;  %v1161_v28 = vpop.permute.xlu1 %1160  ;;  %v2042_v43 = vpop.f32.mrf.mxu0  ;;  %v950_v35 = vmul.f32 %v6091_v63, %v760_v13 }
 0x19b   : > { %v1609_v29 = vadd.f32 %v6104_v10, %v1469_v39  ;;  %v1610_v30 = vadd.f32 %v6107_v11, %v1470_v22  ;;  %4680 = vmatprep.mubr.bf16.mxu1 %v2331_v23  ;;  %v1343_v31 = vmul.f32 %v6085_v60, %v1161_v28  ;;  %v1344_v32 = vmul.f32 %v6087_v61, %v1161_v28  ;;  %v5258_v40 = vpop.eup %5257 }
 0x19c   : > { %v2043_v46 = vadd.f32 %v6453_v26, %v2042_v43  ;;  %2169 = vmatmul.mubr.bf16.gmra.mxu0 %v1817_v19  ;;  %v2044_v33 = vpop.f32.mrf.mxu0  ;;  %v5260_v42 = vpop.eup %5259 }
 0x19d   : > { %v1471_v37 = vadd.f32 %v1343_v31, %v941_v21  ;;  %v1472_v38 = vadd.f32 %v1344_v32, %v942_v24  ;;  %5267 = vtanh.f32 %v1609_v29  ;;  %v765_v21 = vpop.permute.xlu0 %764 }
 0x19e   : > { %v2045_v41 = vpop.f32.mrf.mxu0  ;;  %5269 = vtanh.f32 %v1610_v30 }
 0x19f   : > { %v1611_v44 = vadd.f32 %v6104_v10, %v1471_v37  ;;  %v1612_v45 = vadd.f32 %v6107_v11, %v1472_v38  ;;  %v2046_v47 = vadd.f32 %v6453_v26, %v2045_v41  ;;  %v750_v48 = vpop.permute.xlu1 %749  ;;  %5271 = vtanh.f32 %v2043_v46 }
 0x1a0   : > { %v5262_v49 = vpop.eup %5261  ;;  %v2047_v50 = vpop.f32.mrf.mxu0  ;;  %v945_v53 = vmul.f32 %v6089_v62, %v750_v48  ;;  %v946_v0 = vmul.f32 %v6091_v63, %v750_v48 }
 0x1a1   : > { %v5264_v52 = vpop.eup %5263  ;;  %5273 = vtanh.f32 %v1611_v44  ;;  %v1819_v54 = vpack.c.bf16 %v5262_v49, %v5256_v5  ;;  %v1181_v5 = vpop.permute.xlu0 %1180  ;;  %v952_v49 = vmul.f32 %v6091_v63, %v765_v21 }
 0x1a2   : > { %v5266_v55 = vpop.eup %5265  ;;  %5275 = vtanh.f32 %v1612_v45  ;;  %v1820_v20 = vpack.c.bf16 %v5264_v52, %v5258_v40  ;;  %v951_v40 = vmul.f32 %v6089_v62, %v765_v21  ;;  %v1353_v50 = vmul.f32 %v6085_v60, %v1181_v5 }
 0x1a3   : > { %5277 = vtanh.f32 %v2046_v47  ;;  %v2332_v57 = vpack.c.bf16 %v5266_v55, %v5260_v42  ;;  %v1354_v2 = vmul.f32 %v6087_v61, %v1181_v5 }
 0x1a4   : > { %2176 = vmatprep.mubr.bf16.mxu0 %v1820_v20  ;;  %v1169_v56 = vpop.permute.xlu1 %1168  ;;  %v2050_v4 = vpop.f32.mrf.mxu0  ;;  %5279 = vtanh.f32 %v1613_v58 }
 0x1a5   : > { %4681 = vmatmul.mubr.bf16.gmra.mxu1 %v2332_v57  ;;  %v1347_v1 = vmul.f32 %v6085_v60, %v1169_v56  ;;  %v1348_v6 = vmul.f32 %v6087_v61, %v1169_v56  ;;  %2177 = vmatmul.mubr.bf16.gmra.mxu0 %v1819_v54  ;;  %v2051_v7 = vadd.f32 %v6453_v26, %v2050_v4  ;;  %5281 = vtanh.f32 %v1614_v59 }
 0x1a6   : > { %v2052_v8 = vpop.f32.mrf.mxu0 }
 0x1a7   : > { %v1475_v9 = vadd.f32 %v1347_v1, %v945_v53  ;;  %v1476_v12 = vadd.f32 %v1348_v6, %v946_v0  ;;  %5283 = vtanh.f32 %v2051_v7  ;;  %v1481_v1 = vadd.f32 %v1353_v50, %v951_v40 }
 0x1a8   : > { %v2053_v14 = vpop.f32.mrf.mxu0  ;;  %v1482_v6 = vadd.f32 %v1354_v2, %v952_v49 }
 0x1a9   : > { %v1615_v15 = vadd.f32 %v6104_v10, %v1475_v9  ;;  %v1616_v16 = vadd.f32 %v6107_v11, %v1476_v12  ;;  %v2054_v17 = vadd.f32 %v6453_v26, %v2053_v14  ;;  %v755_v36 = vpop.permute.xlu1 %754 }
 0x1aa   : > { %v2055_v18 = vpop.f32.mrf.mxu0  ;;  %v5268_v19 = vpop.eup %5267  ;;  %v947_v27 = vmul.f32 %v6089_v62, %v755_v36  ;;  %v948_v28 = vmul.f32 %v6091_v63, %v755_v36  ;;  %v1622_v36 = vadd.f32 %v6107_v11, %v1482_v6 }
 0x1ab   : > { %5285 = vtanh.f32 %v1615_v15  ;;  %v5270_v39 = vpop.eup %5269 }
 0x1ac   : > { %5287 = vtanh.f32 %v1616_v16  ;;  %v5272_v22 = vpop.eup %5271 }
 0x1ad   : > { %5289 = vtanh.f32 %v2054_v17  ;;  %v1621_v17 = vadd.f32 %v6104_v10, %v1481_v1 }
 0x1ae   : > { %v5274_v23 = vpop.eup %5273  ;;  %v1173_v24 = vpop.permute.xlu1 %1172 }
 0x1af   : > { %v5276_v25 = vpop.eup %5275  ;;  %v1349_v43 = vmul.f32 %v6085_v60, %v1173_v24  ;;  %v1350_v29 = vmul.f32 %v6087_v61, %v1173_v24  ;;  %v1821_v32 = vpack.c.bf16 %v5274_v23, %v5268_v19 }
 0x1b0   : > { %v5278_v30 = vpop.eup %5277  ;;  %v1822_v31 = vpack.c.bf16 %v5276_v25, %v5270_v39  ;;  %v1197_v25 = vpop.permute.xlu0 %1196 }
 0x1b1   : > { %v1477_v46 = vadd.f32 %v1349_v43, %v947_v27  ;;  %v1478_v33 = vadd.f32 %v1350_v29, %v948_v28  ;;  %v2333_v34 = vpack.c.bf16 %v5278_v30, %v5272_v22  ;;  %v5280_v51 = vpop.eup %5279  ;;  %v1362_v1 = vmul.f32 %v6087_v61, %v1197_v25 }
 0x1b2   : > { %2184 = vmatprep.mubr.bf16.mxu0 %v1822_v31  ;;  %v1177_v37 = vpop.permute.xlu1 %1176  ;;  %v2058_v38 = vpop.f32.mrf.mxu0 }
 0x1b3   : > { %v1617_v41 = vadd.f32 %v6104_v10, %v1477_v46  ;;  %v1618_v42 = vadd.f32 %v6107_v11, %v1478_v33  ;;  %4684 = vmatprep.mubr.bf16.mxu1 %v2333_v34  ;;  %v1351_v44 = vmul.f32 %v6085_v60, %v1177_v37  ;;  %v1352_v45 = vmul.f32 %v6087_v61, %v1177_v37  ;;  %v5282_v55 = vpop.eup %5281 }
 0x1b4   : > { %v2059_v47 = vadd.f32 %v6453_v26, %v2058_v38  ;;  %2185 = vmatmul.mubr.bf16.gmra.mxu0 %v1821_v32  ;;  %v2060_v48 = vpop.f32.mrf.mxu0  ;;  %v5284_v57 = vpop.eup %5283 }
 0x1b5   : > { %v1479_v52 = vadd.f32 %v1351_v44, %v949_v3  ;;  %v1480_v54 = vadd.f32 %v1352_v45, %v950_v35  ;;  %5291 = vtanh.f32 %v1617_v41  ;;  %v780_v33 = vpop.permute.xlu0 %779 }
 0x1b6   : > { %v2061_v20 = vpop.f32.mrf.mxu0  ;;  %5293 = vtanh.f32 %v1618_v42  ;;  %v958_v2 = vmul.f32 %v6091_v63, %v780_v33 }
 0x1b7   : > { %v1619_v53 = vadd.f32 %v6104_v10, %v1479_v52  ;;  %v1620_v56 = vadd.f32 %v6107_v11, %v1480_v54  ;;  %v2062_v4 = vadd.f32 %v6453_v26, %v2061_v20  ;;  %v770_v58 = vpop.permute.xlu1 %769  ;;  %5295 = vtanh.f32 %v2059_v47 }
 0x1b8   : > { %v5286_v59 = vpop.eup %5285  ;;  %v2063_v0 = vpop.f32.mrf.mxu0  ;;  %v953_v14 = vmul.f32 %v6089_v62, %v770_v58  ;;  %v954_v18 = vmul.f32 %v6091_v63, %v770_v58  ;;  %v957_v47 = vmul.f32 %v6089_v62, %v780_v33 }
 0x1b9   : > { %v5288_v7 = vpop.eup %5287  ;;  %5297 = vtanh.f32 %v1619_v53  ;;  %v1823_v8 = vpack.c.bf16 %v5286_v59, %v5280_v51  ;;  %v785_v51 = vpop.permute.xlu0 %784 }
 0x1ba   : > { %v5290_v9 = vpop.eup %5289  ;;  %5299 = vtanh.f32 %v1620_v56  ;;  %v1824_v12 = vpack.c.bf16 %v5288_v7, %v5282_v55  ;;  %v1361_v56 = vmul.f32 %v6085_v60, %v1197_v25  ;;  %v959_v59 = vmul.f32 %v6089_v62, %v785_v51 }
 0x1bb   : > { %5301 = vtanh.f32 %v2062_v4  ;;  %v2334_v13 = vpack.c.bf16 %v5290_v9, %v5284_v57 }
 0x1bc   : > { %2192 = vmatprep.mubr.bf16.mxu0 %v1824_v12  ;;  %v1185_v15 = vpop.permute.xlu1 %1184  ;;  %v2066_v16 = vpop.f32.mrf.mxu0  ;;  %5303 = vtanh.f32 %v1621_v17 }
 0x1bd   : > { %4685 = vmatmul.mubr.bf16.gmra.mxu1 %v2334_v13  ;;  %v1355_v19 = vmul.f32 %v6085_v60, %v1185_v15  ;;  %v1356_v21 = vmul.f32 %v6087_v61, %v1185_v15  ;;  %2193 = vmatmul.mubr.bf16.gmra.mxu0 %v1823_v8  ;;  %v2067_v39 = vadd.f32 %v6453_v26, %v2066_v16  ;;  %5305 = vtanh.f32 %v1622_v36 }
 0x1be   : > { %v2068_v22 = vpop.f32.mrf.mxu0  ;;  %v960_v8 = vmul.f32 %v6091_v63, %v785_v51 }
 0x1bf   : > { %v1483_v23 = vadd.f32 %v1355_v19, %v953_v14  ;;  %v1484_v24 = vadd.f32 %v1356_v21, %v954_v18  ;;  %5307 = vtanh.f32 %v2067_v39  ;;  %v1489_v19 = vadd.f32 %v1361_v56, %v959_v59 }
 0x1c0   : > { %v2069_v27 = vpop.f32.mrf.mxu0  ;;  %v1490_v39 = vadd.f32 %v1362_v1, %v960_v8 }
 0x1c1   : > { %v1623_v28 = vadd.f32 %v6104_v10, %v1483_v23  ;;  %v1624_v43 = vadd.f32 %v6107_v11, %v1484_v24  ;;  %v2070_v29 = vadd.f32 %v6453_v26, %v2069_v27  ;;  %v775_v30 = vpop.permute.xlu1 %774  ;;  %v1629_v27 = vadd.f32 %v6104_v10, %v1489_v19 }
 0x1c2   : > { %v2071_v31 = vpop.f32.mrf.mxu0  ;;  %v5292_v32 = vpop.eup %5291  ;;  %v955_v37 = vmul.f32 %v6089_v62, %v775_v30  ;;  %v956_v38 = vmul.f32 %v6091_v63, %v775_v30 }
 0x1c3   : > { %5309 = vtanh.f32 %v1623_v28  ;;  %v5294_v3 = vpop.eup %5293 }
 0x1c4   : > { %5311 = vtanh.f32 %v1624_v43  ;;  %v5296_v46 = vpop.eup %5295 }
 0x1c5   : > { %5313 = vtanh.f32 %v2070_v29  ;;  %v1630_v29 = vadd.f32 %v6107_v11, %v1490_v39 }
 0x1c6   : > { %v5298_v34 = vpop.eup %5297  ;;  %v1189_v35 = vpop.permute.xlu1 %1188 }
 0x1c7   : > { %v5300_v5 = vpop.eup %5299  ;;  %v1357_v40 = vmul.f32 %v6085_v60, %v1189_v35  ;;  %v1358_v41 = vmul.f32 %v6087_v61, %v1189_v35  ;;  %v1825_v45 = vpack.c.bf16 %v5298_v34, %v5292_v32 }
 0x1c8   : > { %v5302_v42 = vpop.eup %5301  ;;  %v1826_v44 = vpack.c.bf16 %v5300_v5, %v5294_v3 }
 0x1c9   : > { %v1485_v48 = vadd.f32 %v1357_v40, %v955_v37  ;;  %v1486_v49 = vadd.f32 %v1358_v41, %v956_v38  ;;  %v2335_v50 = vpack.c.bf16 %v5302_v42, %v5296_v46  ;;  %v5304_v0 = vpop.eup %5303  ;;  %v800_v37 = vpop.permute.xlu0 %799 }
 0x1ca   : > { %2200 = vmatprep.mubr.bf16.mxu0 %v1826_v44  ;;  %v1193_v52 = vpop.permute.xlu1 %1192  ;;  %v2074_v54 = vpop.f32.mrf.mxu0  ;;  %v966_v59 = vmul.f32 %v6091_v63, %v800_v37 }
 0x1cb   : > { %v1625_v55 = vadd.f32 %v6104_v10, %v1485_v48  ;;  %v1626_v20 = vadd.f32 %v6107_v11, %v1486_v49  ;;  %4688 = vmatprep.mubr.bf16.mxu1 %v2335_v50  ;;  %v1359_v57 = vmul.f32 %v6085_v60, %v1193_v52  ;;  %v1360_v53 = vmul.f32 %v6087_v61, %v1193_v52  ;;  %v5306_v9 = vpop.eup %5305 }
 0x1cc   : > { %v2075_v4 = vadd.f32 %v6453_v26, %v2074_v54  ;;  %2201 = vmatmul.mubr.bf16.gmra.mxu0 %v1825_v45  ;;  %v2076_v58 = vpop.f32.mrf.mxu0  ;;  %v5308_v13 = vpop.eup %5307 }
 0x1cd   : > { %v1487_v6 = vadd.f32 %v1359_v57, %v957_v47  ;;  %v1488_v7 = vadd.f32 %v1360_v53, %v958_v2  ;;  %5315 = vtanh.f32 %v1625_v55  ;;  %v1213_v48 = vpop.permute.xlu0 %1212  ;;  %v965_v58 = vmul.f32 %v6089_v62, %v800_v37 }
 0x1ce   : > { %v2077_v12 = vpop.f32.mrf.mxu0  ;;  %5317 = vtanh.f32 %v1626_v20  ;;  %v1370_v19 = vmul.f32 %v6087_v61, %v1213_v48 }
 0x1cf   : > { %v1627_v14 = vadd.f32 %v6104_v10, %v1487_v6  ;;  %v1628_v15 = vadd.f32 %v6107_v11, %v1488_v7  ;;  %v2078_v16 = vadd.f32 %v6453_v26, %v2077_v12  ;;  %5319 = vtanh.f32 %v2075_v4 }
 0x1d0   : > { %v5310_v17 = vpop.eup %5309  ;;  %v790_v36 = vpop.permute.xlu1 %789  ;;  %v1369_v12 = vmul.f32 %v6085_v60, %v1213_v48 }
 0x1d1   : > { %v2079_v18 = vpop.f32.mrf.mxu0  ;;  %v5312_v21 = vpop.eup %5311  ;;  %5321 = vtanh.f32 %v1627_v14  ;;  %v1827_v22 = vpack.c.bf16 %v5310_v17, %v5304_v0  ;;  %v961_v43 = vmul.f32 %v6089_v62, %v790_v36  ;;  %v962_v31 = vmul.f32 %v6091_v63, %v790_v36 }
 0x1d2   : > { %v5314_v23 = vpop.eup %5313  ;;  %5323 = vtanh.f32 %v1628_v15  ;;  %v1828_v24 = vpack.c.bf16 %v5312_v21, %v5306_v9  ;;  %v805_v7 = vpop.permute.xlu0 %804 }
 0x1d3   : > { %5325 = vtanh.f32 %v2078_v16  ;;  %v2336_v25 = vpack.c.bf16 %v5314_v23, %v5308_v13  ;;  %v967_v13 = vmul.f32 %v6089_v62, %v805_v7  ;;  %v968_v21 = vmul.f32 %v6091_v63, %v805_v7 }
 0x1d4   : > { %2208 = vmatprep.mubr.bf16.mxu0 %v1828_v24  ;;  %v2082_v28 = vpop.f32.mrf.mxu0  ;;  %5327 = vtanh.f32 %v1629_v27 }
 0x1d5   : > { %4689 = vmatmul.mubr.bf16.gmra.mxu1 %v2336_v25  ;;  %v1201_v30 = vpop.permute.xlu1 %1200  ;;  %2209 = vmatmul.mubr.bf16.gmra.mxu0 %v1827_v22  ;;  %v2083_v46 = vadd.f32 %v6453_v26, %v2082_v28  ;;  %5329 = vtanh.f32 %v1630_v29 }
 0x1d6   : > { %v1363_v32 = vmul.f32 %v6085_v60, %v1201_v30  ;;  %v1364_v3 = vmul.f32 %v6087_v61, %v1201_v30  ;;  %v2084_v33 = vpop.f32.mrf.mxu0 }
 0x1d7   : > { %5331 = vtanh.f32 %v2083_v46  ;;  %v1498_v46 = vadd.f32 %v1370_v19, %v968_v21 }
 0x1d8   : > { %v1491_v34 = vadd.f32 %v1363_v32, %v961_v43  ;;  %v1492_v35 = vadd.f32 %v1364_v3, %v962_v31  ;;  %v2085_v5 = vpop.f32.mrf.mxu0  ;;  %v1497_v32 = vadd.f32 %v1369_v12, %v967_v13 }
 0x1d9   : > { %v2086_v38 = vadd.f32 %v6453_v26, %v2085_v5 }
 0x1da   : > { %v1631_v40 = vadd.f32 %v6104_v10, %v1491_v34  ;;  %v1632_v41 = vadd.f32 %v6107_v11, %v1492_v35  ;;  %v795_v42 = vpop.permute.xlu1 %794  ;;  %v2087_v44 = vpop.f32.mrf.mxu0  ;;  %v1637_v37 = vadd.f32 %v6104_v10, %v1497_v32 }
 0x1db   : > { %v5316_v45 = vpop.eup %5315  ;;  %5333 = vtanh.f32 %v2086_v38  ;;  %v963_v51 = vmul.f32 %v6089_v62, %v795_v42  ;;  %v964_v20 = vmul.f32 %v6091_v63, %v795_v42 }
 0x1dc   : > { %v5318_v47 = vpop.eup %5317  ;;  %5335 = vtanh.f32 %v1631_v40 }
 0x1dd   : > { %v5320_v49 = vpop.eup %5319  ;;  %5337 = vtanh.f32 %v1632_v41  ;;  %v1638_v41 = vadd.f32 %v6107_v11, %v1498_v46 }
 0x1de   : > { %v5322_v50 = vpop.eup %5321 }
 0x1df   : > { %v5324_v2 = vpop.eup %5323  ;;  %v1205_v52 = vpop.permute.xlu1 %1204  ;;  %v1829_v54 = vpack.c.bf16 %v5322_v50, %v5316_v45 }
 0x1e0   : > { %v5326_v55 = vpop.eup %5325  ;;  %v1365_v57 = vmul.f32 %v6085_v60, %v1205_v52  ;;  %v1366_v53 = vmul.f32 %v6087_v61, %v1205_v52  ;;  %v1830_v56 = vpack.c.bf16 %v5324_v2, %v5318_v47 }
 0x1e1   : > { %v2337_v4 = vpack.c.bf16 %v5326_v55, %v5320_v49  ;;  %v5328_v18 = vpop.eup %5327  ;;  %v820_v49 = vpop.permute.xlu0 %819 }
 0x1e2   : > { %v1493_v0 = vadd.f32 %v1365_v57, %v963_v51  ;;  %v1494_v1 = vadd.f32 %v1366_v53, %v964_v20  ;;  %2216 = vmatprep.mubr.bf16.mxu0 %v1830_v56  ;;  %v2090_v6 = vpop.f32.mrf.mxu0  ;;  %v5330_v39 = vpop.eup %5329  ;;  %v973_v21 = vmul.f32 %v6089_v62, %v820_v49 }
 0x1e3   : > { %4692 = vmatprep.mubr.bf16.mxu1 %v2337_v4  ;;  %v1209_v8 = vpop.permute.xlu1 %1208  ;;  %v2091_v9 = vadd.f32 %v6453_v26, %v2090_v6  ;;  %2217 = vmatmul.mubr.bf16.gmra.mxu0 %v1829_v54  ;;  %v6629_v54 = vld [vmem:[%s7308_s4] ss:$0 sm:$0xff] }
 0x1e4   : > { %v1633_v14 = vadd.f32 %v6104_v10, %v1493_v0  ;;  %v1634_v15 = vadd.f32 %v6107_v11, %v1494_v1  ;;  %v1367_v16 = vmul.f32 %v6085_v60, %v1209_v8  ;;  %v1368_v17 = vmul.f32 %v6087_v61, %v1209_v8  ;;  %v2092_v36 = vpop.f32.mrf.mxu0  ;;  %v5332_v25 = vpop.eup %5331 }
 0x1e5   : > { %5339 = vtanh.f32 %v2091_v9 }
 0x1e6   : > { %v1495_v22 = vadd.f32 %v1367_v16, %v965_v58  ;;  %v1496_v23 = vadd.f32 %v1368_v17, %v966_v59  ;;  %v2093_v24 = vpop.f32.mrf.mxu0  ;;  %5341 = vtanh.f32 %v1633_v14  ;;  %v825_v58 = vpop.permute.xlu0 %824 }
 0x1e7   : > { %v2094_v27 = vadd.f32 %v6453_v26, %v2093_v24  ;;  %5343 = vtanh.f32 %v1634_v15 }
 0x1e8   : > { %v5334_v28 = vpop.eup %5333  ;;  %v1635_v43 = vadd.f32 %v6104_v10, %v1495_v22  ;;  %v1636_v29 = vadd.f32 %v6107_v11, %v1496_v23  ;;  %v810_v30 = vpop.permute.xlu1 %809 }
 0x1e9   : > { %v2095_v31 = vpop.f32.mrf.mxu0  ;;  %v5336_v3 = vpop.eup %5335  ;;  %5345 = vtanh.f32 %v2094_v27  ;;  %v2338_v33 = vpack.c.bf16 %v5334_v28, %v5332_v25  ;;  %v969_v40 = vmul.f32 %v6089_v62, %v810_v30  ;;  %v970_v44 = vmul.f32 %v6091_v63, %v810_v30 }
 0x1ea   : > { %v5338_v34 = vpop.eup %5337  ;;  %5347 = vtanh.f32 %v1635_v43  ;;  %v1831_v35 = vpack.c.bf16 %v5336_v3, %v5328_v18  ;;  %v1229_v17 = vpop.permute.xlu0 %1228  ;;  %v975_v30 = vmul.f32 %v6089_v62, %v825_v58  ;;  %v976_v31 = vmul.f32 %v6091_v63, %v825_v58 }
 0x1eb   : > { %5349 = vtanh.f32 %v1636_v29  ;;  %v1832_v5 = vpack.c.bf16 %v5338_v34, %v5330_v39  ;;  %4693 = vmatmul.mubr.bf16.gmra.mxu1 %v2338_v33  ;;  %v974_v39 = vmul.f32 %v6091_v63, %v820_v49  ;;  %v1377_v32 = vmul.f32 %v6085_v60, %v1229_v17 }
 0x1ec   : > { %v2098_v38 = vpop.f32.mrf.mxu0  ;;  %5351 = vtanh.f32 %v1637_v37  ;;  %v1378_v3 = vmul.f32 %v6087_v61, %v1229_v17 }
 0x1ed   : > { %2224 = vmatprep.mubr.bf16.mxu0 %v1832_v5  ;;  %v1217_v42 = vpop.permute.xlu1 %1216  ;;  %v2099_v48 = vadd.f32 %v6453_v26, %v2098_v38  ;;  %5353 = vtanh.f32 %v1638_v41 }
 0x1ee   : > { %v1371_v45 = vmul.f32 %v6085_v60, %v1217_v42  ;;  %v1372_v47 = vmul.f32 %v6087_v61, %v1217_v42  ;;  %2225 = vmatmul.mubr.bf16.gmra.mxu0 %v1831_v35  ;;  %v2100_v50 = vpop.f32.mrf.mxu0 }
 0x1ef   : > { %5355 = vtanh.f32 %v2099_v48  ;;  %v1506_v48 = vadd.f32 %v1378_v3, %v976_v31 }
 0x1f0   : > { %v1499_v2 = vadd.f32 %v1371_v45, %v969_v40  ;;  %v1500_v51 = vadd.f32 %v1372_v47, %v970_v44  ;;  %v2101_v52 = vpop.f32.mrf.mxu0  ;;  %v1505_v47 = vadd.f32 %v1377_v32, %v975_v30 }
 0x1f1   : > { %v2102_v55 = vadd.f32 %v6629_v54, %v2101_v52 }
 0x1f2   : > { %v1639_v20 = vadd.f32 %v6104_v10, %v1499_v2  ;;  %v1640_v57 = vadd.f32 %v6107_v11, %v1500_v51  ;;  %v815_v26 = vpop.permute.xlu1 %814  ;;  %v2103_v53 = vpop.f32.mrf.mxu0  ;;  %v1645_v52 = vadd.f32 %v6104_v10, %v1505_v47 }
 0x1f3   : > { %v5340_v56 = vpop.eup %5339  ;;  %5357 = vtanh.f32 %v2102_v55  ;;  %v971_v6 = vmul.f32 %v6089_v62, %v815_v26  ;;  %v972_v12 = vmul.f32 %v6091_v63, %v815_v26  ;;  %v1646_v55 = vadd.f32 %v6107_v11, %v1506_v48 }
 0x1f4   : > { %v5342_v4 = vpop.eup %5341  ;;  %5359 = vtanh.f32 %v1639_v20 }
 0x1f5   : > { %v5344_v59 = vpop.eup %5343  ;;  %5361 = vtanh.f32 %v1640_v57 }
 0x1f6   : > { %v5346_v0 = vpop.eup %5345 }
 0x1f7   : > { %v5348_v1 = vpop.eup %5347  ;;  %v1221_v7 = vpop.permute.xlu1 %1220  ;;  %v2339_v8 = vpack.c.bf16 %v5346_v0, %v5340_v56 }
 0x1f8   : > { %v5350_v9 = vpop.eup %5349  ;;  %v1373_v13 = vmul.f32 %v6085_v60, %v1221_v7  ;;  %v1374_v14 = vmul.f32 %v6087_v61, %v1221_v7  ;;  %v1833_v15 = vpack.c.bf16 %v5348_v1, %v5342_v4 }
 0x1f9   : > { %v1834_v16 = vpack.c.bf16 %v5350_v9, %v5344_v59  ;;  %4696 = vmatprep.mubr.bf16.mxu1 %v2339_v8  ;;  %v5352_v29 = vpop.eup %5351 }
 0x1fa   : > { %v1501_v36 = vadd.f32 %v1373_v13, %v971_v6  ;;  %v1502_v18 = vadd.f32 %v1374_v14, %v972_v12  ;;  %v2106_v19 = vpop.f32.mrf.mxu0  ;;  %v5354_v46 = vpop.eup %5353 }
 0x1fb   : > { %2232 = vmatprep.mubr.bf16.mxu0 %v1834_v16  ;;  %v1225_v22 = vpop.permute.xlu1 %1224  ;;  %v2107_v23 = vadd.f32 %v6629_v54, %v2106_v19 }
 0x1fc   : > { %v1641_v24 = vadd.f32 %v6104_v10, %v1501_v36  ;;  %v1642_v25 = vadd.f32 %v6107_v11, %v1502_v18  ;;  %v1375_v27 = vmul.f32 %v6085_v60, %v1225_v22  ;;  %v1376_v28 = vmul.f32 %v6087_v61, %v1225_v22  ;;  %2233 = vmatmul.mubr.bf16.gmra.mxu0 %v1833_v15  ;;  %v2108_v43 = vpop.f32.mrf.mxu0  ;;  %v5356_v5 = vpop.eup %5355 }
 0x1fd   : > { %5363 = vtanh.f32 %v2107_v23 }
 0x1fe   : > { %v1503_v33 = vadd.f32 %v1375_v27, %v973_v21  ;;  %v1504_v34 = vadd.f32 %v1376_v28, %v974_v39  ;;  %v2109_v35 = vpop.f32.mrf.mxu0  ;;  %5365 = vtanh.f32 %v1641_v24 }
 0x1ff   : > { %v2110_v37 = vadd.f32 %v6629_v54, %v2109_v35  ;;  %5367 = vtanh.f32 %v1642_v25 }
 0x200   : > { %v5358_v38 = vpop.eup %5357  ;;  %v1643_v40 = vadd.f32 %v6104_v10, %v1503_v33  ;;  %v1644_v41 = vadd.f32 %v6107_v11, %v1504_v34  ;;  %v830_v42 = vpop.permute.xlu1 %829 }
 0x201   : > { %v2111_v44 = vpop.f32.mrf.mxu0  ;;  %v5360_v45 = vpop.eup %5359  ;;  %5369 = vtanh.f32 %v2110_v37  ;;  %v2340_v49 = vpack.c.bf16 %v5358_v38, %v5356_v5  ;;  %v977_v26 = vmul.f32 %v6089_v62, %v830_v42  ;;  %v978_v53 = vmul.f32 %v6091_v63, %v830_v42 }
 0x202   : > { %v5362_v50 = vpop.eup %5361  ;;  %5371 = vtanh.f32 %v1643_v40  ;;  %v1835_v2 = vpack.c.bf16 %v5360_v45, %v5352_v29 }
 0x203   : > { %5373 = vtanh.f32 %v1644_v41  ;;  %v1836_v51 = vpack.c.bf16 %v5362_v50, %v5354_v46  ;;  %4697 = vmatmul.mubr.bf16.gmra.mxu1 %v2340_v49 }
 0x204   : > { %5375 = vtanh.f32 %v1645_v52 }
 0x205   : > { %2240 = vmatprep.mubr.bf16.mxu0 %v1836_v51  ;;  %v1233_v20 = vpop.permute.xlu1 %1232  ;;  %v2114_v57 = vpop.f32.mrf.mxu0  ;;  %5377 = vtanh.f32 %v1646_v55 }
 0x206   : > { %v1379_v56 = vmul.f32 %v6085_v60, %v1233_v20  ;;  %v1380_v4 = vmul.f32 %v6087_v61, %v1233_v20  ;;  %2241 = vmatmul.mubr.bf16.gmra.mxu0 %v1835_v2  ;;  %v2115_v58 = vadd.f32 %v6629_v54, %v2114_v57 }
 0x207   : > { %v2116_v59 = vpop.f32.mrf.mxu0 }
 0x208   : > { %v1507_v0 = vadd.f32 %v1379_v56, %v977_v26  ;;  %v1508_v1 = vadd.f32 %v1380_v4, %v978_v53  ;;  %5379 = vtanh.f32 %v2115_v58 }
 0x209   : > { %v2117_v6 = vpop.f32.mrf.mxu0 }
 0x20a   : > { %v1647_v7 = vadd.f32 %v6104_v10, %v1507_v0  ;;  %v1648_v8 = vadd.f32 %v6107_v11, %v1508_v1  ;;  %v2118_v62 = vadd.f32 %v6629_v54, %v2117_v6  ;;  %v5364_v63 = vpop.eup %5363 }
 0x20b   : > { %v2119_v60 = vpop.f32.mrf.mxu0  ;;  %v5366_v9 = vpop.eup %5365 }
 0x20c   : > { %5381 = vtanh.f32 %v1647_v7  ;;  %v5368_v61 = vpop.eup %5367 }
 0x20d   : > { %5383 = vtanh.f32 %v1648_v8 }
 0x20e   : > { %v5370_v12 = vpop.eup %5369  ;;  %5385 = vtanh.f32 %v2118_v62 }
 0x20f   : > { %v5372_v13 = vpop.eup %5371  ;;  %v2341_v14 = vpack.c.bf16 %v5370_v12, %v5364_v63 }
 0x210   : > { %v5374_v15 = vpop.eup %5373  ;;  %v1837_v16 = vpack.c.bf16 %v5372_v13, %v5366_v9  ;;  %v5067_v13 = vld [vmem:[%s7311_s7 + $0x18] sm:$0xff]  }
 0x211   : > { %v1838_v17 = vpack.c.bf16 %v5374_v15, %v5368_v61  ;;  %4700 = vmatprep.mubr.bf16.mxu1 %v2341_v14  ;;  %v5376_v18 = vpop.eup %5375  ;;  %4740 = vmatprep.subr.bf16.mxu1 %v5067_v13 }
 0x212   : > { %v5378_v19 = vpop.eup %5377  ;;  %4741 = vmatpush3.bf16.msra.mxu1 %v5067_v13 }
 0x213   : > { %2248 = vmatprep.mubr.bf16.mxu0 %v1838_v17  ;;  %v2122_v10 = vpop.f32.mrf.mxu0 }
 0x214   : > { %2249 = vmatmul.mubr.bf16.gmra.mxu0 %v1837_v16  ;;  %v2123_v11 = vadd.f32 %v6629_v54, %v2122_v10 }
 0x215   : > { %v2124_v36 = vpop.f32.mrf.mxu0  ;;  %v5380_v39 = vpop.eup %5379 }
 0x216   : > { %5387 = vtanh.f32 %v2123_v11 }
 0x217   : > { %v2125_v21 = vpop.f32.mrf.mxu0 }
 0x218   : > { %v2126_v22 = vadd.f32 %v6629_v54, %v2125_v21 }
 0x219   : > { %v5382_v23 = vpop.eup %5381  ;;  %v2127_v24 = vpop.f32.mrf.mxu0 }
 0x21a   : > { %v5384_v25 = vpop.eup %5383  ;;  %5389 = vtanh.f32 %v2126_v22  ;;  %v1839_v27 = vpack.c.bf16 %v5382_v23, %v5376_v18 }
 0x21b   : > { %v5386_v28 = vpop.eup %5385  ;;  %v1840_v43 = vpack.c.bf16 %v5384_v25, %v5378_v19 }
 0x21c   : > { %v2342_v29 = vpack.c.bf16 %v5386_v28, %v5380_v39 }
 0x21d   : > { %2256 = vmatprep.mubr.bf16.mxu0 %v1840_v43  ;;  %v2130_v30 = vpop.f32.mrf.mxu0  ;;  %v5068_v43 = vld [vmem:[%s7311_s7 + $0x10] sm:$0xff]  }
 0x21e   : > { %4701 = vmatmul.mubr.bf16.gmra.mxu1 %v2342_v29  ;;  %2257 = vmatmul.mubr.bf16.gmra.mxu0 %v1839_v27  ;;  %v2131_v31 = vadd.f32 %v6629_v54, %v2130_v30 }
 0x21f   : > { %v2132_v32 = vpop.f32.mrf.mxu0  ;;  %4742 = vmatprep.subr.bf16.mxu1 %v5068_v43 }
 0x220   : > { %5391 = vtanh.f32 %v2131_v31  ;;  %4743 = vmatpush3.bf16.msra.mxu1 %v5068_v43 }
 0x221   : > { %v2133_v3 = vpop.f32.mrf.mxu0 }
 0x222   : > { %v2134_v46 = vadd.f32 %v6629_v54, %v2133_v3  ;;  %v5069_v3 = vld [vmem:[%s7311_s7 + $0x8] sm:$0xff]  }
 0x223   : > { %v2135_v33 = vpop.f32.mrf.mxu0  ;;  %v5388_v34 = vpop.eup %5387  ;;  %4744 = vmatprep.subr.bf16.mxu1 %v5069_v3 }
 0x224   : > { %5393 = vtanh.f32 %v2134_v46  ;;  %4745 = vmatpush3.bf16.msra.mxu1 %v5069_v3 }
 0x227   : > { %v5390_v35 = vpop.eup %5389 }
 0x228   : > { %v2343_v5 = vpack.c.bf16 %v5390_v35, %v5388_v34  ;;  %v5070_v35 = vld [vmem:[%s7311_s7] sm:$0xff]  }
 0x229   : > { %4746 = vmatprep.subr.bf16.mxu1 %v5070_v35 }
 0x22a   : > { %4704 = vmatprep.mubr.bf16.mxu1 %v2343_v5  ;;  %4747 = vmatpush3.bf16.msra.mxu1 %v5070_v35 }
 0x22b   : > { %v2138_v37 = vpop.f32.mrf.mxu0 }
 0x22c   : > { %v2139_v38 = vadd.f32 %v6629_v54, %v2138_v37 }
 0x22d   : > { %v2140_v40 = vpop.f32.mrf.mxu0  ;;  %v5392_v42 = vpop.eup %5391 }
 0x22e   : > { %5395 = vtanh.f32 %v2139_v38 }
 0x22f   : > { %v2141_v41 = vpop.f32.mrf.mxu0 }
 0x230   : > { %v2142_v44 = vadd.f32 %v6629_v54, %v2141_v41 }
 0x231   : > { %v5394_v45 = vpop.eup %5393  ;;  %v2143_v47 = vpop.f32.mrf.mxu0 }
 0x232   : > { %5397 = vtanh.f32 %v2142_v44  ;;  %v2344_v48 = vpack.c.bf16 %v5394_v45, %v5392_v42 }
 0x234   : > { %4705 = vmatmul.mubr.bf16.gmra.mxu1 %v2344_v48 }
 0x235   : > { %v2146_v49 = vpop.f32.mrf.mxu0 }
 0x236   : > { %v2147_v50 = vadd.f32 %v6629_v54, %v2146_v49 }
 0x237   : > { %v2148_v2 = vpop.f32.mrf.mxu0 }
 0x238   : > { %5399 = vtanh.f32 %v2147_v50 }
 0x239   : > { %v2149_v51 = vpop.f32.mrf.mxu0 }
 0x23a   : > { %v2150_v52 = vadd.f32 %v6629_v54, %v2149_v51 }
 0x23b   : > { %v2151_v55 = vpop.f32.mrf.mxu0  ;;  %v5396_v20 = vpop.eup %5395 }
 0x23c   : > { %5401 = vtanh.f32 %v2150_v52 }
 0x23f   : > { %v5398_v57 = vpop.eup %5397 }
 0x240   : > { %v2345_v26 = vpack.c.bf16 %v5398_v57, %v5396_v20 }
 0x242   : > { %4708 = vmatprep.mubr.bf16.mxu1 %v2345_v26 }
 0x244   : > { %v2154_v53 = vpop.f32.mrf.mxu0 }
 0x245   : > { %v2155_v56 = vadd.f32 %v6629_v54, %v2154_v53  ;;  %v5400_v58 = vpop.eup %5399 }
 0x246   : > { %v2156_v4 = vpop.f32.mrf.mxu0 }
 0x247   : > { %5403 = vtanh.f32 %v2155_v56 }
 0x248   : > { %v2157_v59 = vpop.f32.mrf.mxu0 }
 0x249   : > { %v5402_v0 = vpop.eup %5401  ;;  %v2158_v1 = vadd.f32 %v6629_v54, %v2157_v59 }
 0x24a   : > { %v2159_v6 = vpop.f32.mrf.mxu0  ;;  %v2346_v7 = vpack.c.bf16 %v5402_v0, %v5400_v58 }
 0x24b   : > { %5405 = vtanh.f32 %v2158_v1 }
 0x24c   : > { %4709 = vmatmul.mubr.bf16.gmra.mxu1 %v2346_v7 }
 0x24d   : > { %v2162_v8 = vpop.f32.mrf.mxu0 }
 0x24e   : > { %v2163_v63 = vadd.f32 %v6629_v54, %v2162_v8 }
 0x24f   : > { %v2164_v62 = vpop.f32.mrf.mxu0 }
 0x250   : > { %5407 = vtanh.f32 %v2163_v63 }
 0x251   : > { %v2165_v60 = vpop.f32.mrf.mxu0 }
 0x252   : > { %v2166_v9 = vadd.f32 %v6629_v54, %v2165_v60 }
 0x253   : > { %v2167_v61 = vpop.f32.mrf.mxu0 }
 0x254   : > { %5409 = vtanh.f32 %v2166_v9  ;;  %v5404_v12 = vpop.eup %5403  ;;  %v6698_v9 = vpop.f32.mrf.mxu1 }
 0x258   : > { %v5406_v14 = vpop.eup %5405 }
 0x259   : > { %v2347_v15 = vpack.c.bf16 %v5406_v14, %v5404_v12  ;;  %v6701_v14 = vpop.f32.mrf.mxu1 }
 0x25b   : > { %4712 = vmatprep.mubr.bf16.mxu1 %v2347_v15 }
 0x25c   : > { %v2170_v16 = vpop.f32.mrf.mxu0 }
 0x25d   : > { %v2171_v17 = vadd.f32 %v6629_v54, %v2170_v16  ;;  %v5408_v36 = vpop.eup %5407 }
 0x25e   : > { %v2172_v10 = vpop.f32.mrf.mxu0 }
 0x25f   : > { %5411 = vtanh.f32 %v2171_v17 }
 0x260   : > { %v2173_v11 = vpop.f32.mrf.mxu0 }
 0x261   : > { %v2174_v18 = vadd.f32 %v6629_v54, %v2173_v11  ;;  %v5410_v19 = vpop.eup %5409 }
 0x262   : > { %v2175_v21 = vpop.f32.mrf.mxu0  ;;  %v2348_v39 = vpack.c.bf16 %v5410_v19, %v5408_v36  ;;  %v6704_v36 = vpop.f32.mrf.mxu1 }
 0x263   : > { %5413 = vtanh.f32 %v2174_v18 }
 0x264   : > { %4713 = vmatmul.mubr.bf16.gmra.mxu1 %v2348_v39  ;;  %v6706_v19 = vpop.f32.mrf.mxu1 }
 0x265   : > { %v2178_v22 = vpop.f32.mrf.mxu0 }
 0x266   : > { %v2179_v24 = vadd.f32 %v6629_v54, %v2178_v22  ;;  %v6708_v39 = vpop.f32.mrf.mxu1 }
 0x267   : > { %v2180_v23 = vpop.f32.mrf.mxu0 }
 0x268   : > { %5415 = vtanh.f32 %v2179_v24 }
 0x269   : > { %v2181_v25 = vpop.f32.mrf.mxu0 }
 0x26a   : > { %v2182_v27 = vadd.f32 %v6629_v54, %v2181_v25 }
 0x26b   : > { %v2183_v28 = vpop.f32.mrf.mxu0 }
 0x26c   : > { %5417 = vtanh.f32 %v2182_v27  ;;  %v5412_v29 = vpop.eup %5411  ;;  %v6712_v27 = vpop.f32.mrf.mxu1 }
 0x270   : > { %v5414_v30 = vpop.eup %5413 }
 0x271   : > { %v2349_v31 = vpack.c.bf16 %v5414_v30, %v5412_v29  ;;  %v6714_v30 = vpop.f32.mrf.mxu1 }
 0x273   : > { %4716 = vmatprep.mubr.bf16.mxu1 %v2349_v31 }
 0x274   : > { %v2186_v32 = vpop.f32.mrf.mxu0 }
 0x275   : > { %v2187_v46 = vadd.f32 %v6629_v54, %v2186_v32  ;;  %v5416_v5 = vpop.eup %5415  ;;  %v6716_v32 = vpop.f32.mrf.mxu1 }
 0x276   : > { %v2188_v33 = vpop.f32.mrf.mxu0 }
 0x277   : > { %5419 = vtanh.f32 %v2187_v46 }
 0x278   : > { %v2189_v34 = vpop.f32.mrf.mxu0 }
 0x279   : > { %v2190_v37 = vadd.f32 %v6629_v54, %v2189_v34  ;;  %v5418_v38 = vpop.eup %5417 }
 0x27a   : > { %v2191_v40 = vpop.f32.mrf.mxu0  ;;  %v2350_v41 = vpack.c.bf16 %v5418_v38, %v5416_v5 }
 0x27b   : > { %5421 = vtanh.f32 %v2190_v37 }
 0x27c   : > { %4717 = vmatmul.mubr.bf16.gmra.mxu1 %v2350_v41 }
 0x27d   : > { %v2194_v42 = vpop.f32.mrf.mxu0  ;;  %v6718_v46 = vpop.f32.mrf.mxu1 }
 0x27e   : > { %v2195_v45 = vadd.f32 %v6629_v54, %v2194_v42 }
 0x27f   : > { %v2196_v44 = vpop.f32.mrf.mxu0  ;;  %v6722_v40 = vpop.f32.mrf.mxu1 }
 0x280   : > { %5423 = vtanh.f32 %v2195_v45 }
 0x281   : > { %v2197_v47 = vpop.f32.mrf.mxu0  ;;  %v6724_v44 = vpop.f32.mrf.mxu1 }
 0x282   : > { %v2198_v48 = vadd.f32 %v6629_v54, %v2197_v47 }
 0x283   : > { %v2199_v49 = vpop.f32.mrf.mxu0 }
 0x284   : > { %5425 = vtanh.f32 %v2198_v48  ;;  %v5420_v50 = vpop.eup %5419  ;;  %v2501_v49 = vpop.f32.mrf.mxu1 }
 0x288   : > { %v5422_v2 = vpop.eup %5421 }
 0x289   : > { %v2351_v51 = vpack.c.bf16 %v5422_v2, %v5420_v50 }
 0x28b   : > { %4720 = vmatprep.mubr.bf16.mxu1 %v2351_v51 }
 0x28c   : > { %v2202_v52 = vpop.f32.mrf.mxu0 }
 0x28d   : > { %v2203_v55 = vadd.f32 %v6629_v54, %v2202_v52  ;;  %v5424_v26 = vpop.eup %5423 }
 0x28e   : > { %v2204_v20 = vpop.f32.mrf.mxu0 }
 0x28f   : > { %5427 = vtanh.f32 %v2203_v55 }
 0x290   : > { %v2205_v57 = vpop.f32.mrf.mxu0 }
 0x291   : > { %v2206_v53 = vadd.f32 %v6629_v54, %v2205_v57  ;;  %v5426_v56 = vpop.eup %5425 }
 0x292   : > { %v2207_v4 = vpop.f32.mrf.mxu0  ;;  %v2352_v58 = vpack.c.bf16 %v5426_v56, %v5424_v26 }
 0x293   : > { %5429 = vtanh.f32 %v2206_v53 }
 0x294   : > { %4721 = vmatmul.mubr.bf16.gmra.mxu1 %v2352_v58 }
 0x295   : > { %v2210_v59 = vpop.f32.mrf.mxu0  ;;  %v6728_v51 = vpop.f32.mrf.mxu1 }
 0x296   : > { %v2211_v1 = vadd.f32 %v6629_v54, %v2210_v59 }
 0x297   : > { %v2212_v0 = vpop.f32.mrf.mxu0  ;;  %v6730_v57 = vpop.f32.mrf.mxu1 }
 0x298   : > { %5431 = vtanh.f32 %v2211_v1 }
 0x299   : > { %v2213_v6 = vpop.f32.mrf.mxu0  ;;  %v6732_v53 = vpop.f32.mrf.mxu1 }
 0x29a   : > { %v2214_v7 = vadd.f32 %v6629_v54, %v2213_v6 }
 0x29b   : > { %v2215_v8 = vpop.f32.mrf.mxu0  ;;  %v6735_v59 = vpop.f32.mrf.mxu1 }
 0x29c   : > { %5433 = vtanh.f32 %v2214_v7  ;;  %v5428_v62 = vpop.eup %5427 }
 0x2a0   : > { %v5430_v63 = vpop.eup %5429 }
 0x2a1   : > { %v2353_v60 = vpack.c.bf16 %v5430_v63, %v5428_v62 }
 0x2a3   : > { %4724 = vmatprep.mubr.bf16.mxu1 %v2353_v60  ;;  %v2218_v61 = vpop.f32.mrf.mxu0 }
 0x2a4   : > { %v2219_v12 = vadd.f32 %v6629_v54, %v2218_v61 }
 0x2a5   : > { %v2220_v13 = vpop.f32.mrf.mxu0  ;;  %v5432_v17 = vpop.eup %5431 }
 0x2a6   : > { %5435 = vtanh.f32 %v2219_v12  ;;  %v6745_v12 = vld [vmem:[%s7310_s6] ss:$0 sm:$0xff] }
 0x2a7   : > { %v2221_v15 = vpop.f32.mrf.mxu0  ;;  %v2470_v13 = vadd.f32 %v6745_v12, %v6706_v19  ;;  %v2478_v19 = vadd.f32 %v6704_v36, %v6745_v12  ;;  %v2494_v36 = vadd.f32 %v6714_v30, %v6745_v12 }
 0x2a8   : > { %v2222_v16 = vadd.f32 %v6629_v54, %v2221_v15 }
 0x2a9   : > { %v2223_v10 = vpop.f32.mrf.mxu0  ;;  %v5434_v11 = vpop.eup %5433 }
 0x2aa   : > { %5437 = vtanh.f32 %v2222_v16  ;;  %v2354_v18 = vpack.c.bf16 %v5434_v11, %v5432_v17  ;;  %v2467_v11 = vadd.f32 %v6745_v12, %v6701_v14  ;;  %v2483_v14 = vadd.f32 %v6745_v12, %v6712_v27 }
 0x2ab   : > { %v6738_v8 = vpop.f32.mrf.mxu1 }
 0x2ac   : > { %4725 = vmatmul.mubr.bf16.gmra.mxu1 %v2354_v18 }
 0x2ad   : > { %v6740_v60 = vpop.f32.mrf.mxu1 }
 0x2ae   : > { %v2226_v21 = vpop.f32.mrf.mxu0 }
 0x2af   : > { %v2227_v22 = vadd.f32 %v6629_v54, %v2226_v21  ;;  %v6750_v17 = vpop.f32.mrf.mxu1 }
 0x2b0   : > { %v2228_v23 = vpop.f32.mrf.mxu0 }
 0x2b1   : > { %5439 = vtanh.f32 %v2227_v22  ;;  %v2533_v22 = vpop.f32.mrf.mxu1 }
 0x2b2   : > { %v2229_v24 = vpop.f32.mrf.mxu0 }
 0x2b3   : > { %v2230_v25 = vadd.f32 %v6629_v54, %v2229_v24  ;;  %v5436_v43 = vpop.eup %5435 }
 0x2b4   : > { %v2231_v28 = vpop.f32.mrf.mxu0 }
 0x2b5   : > { %5441 = vtanh.f32 %v2230_v25  ;;  %v2486_v28 = vadd.f32 %v6745_v12, %v6716_v32 }
 0x2b7   : > { %v5438_v29 = vpop.eup %5437 }
 0x2b8   : > { %v2355_v31 = vpack.c.bf16 %v5438_v29, %v5436_v43 }
 0x2ba   : > { %4728 = vmatprep.mubr.bf16.mxu1 %v2355_v31 }
 0x2bc   : > { %v2234_v3 = vpop.f32.mrf.mxu0 }
 0x2bd   : > { %v2235_v33 = vadd.f32 %v6629_v54, %v2234_v3  ;;  %v2502_v3 = vadd.f32 %v6745_v12, %v2501_v49  ;;  %v2515_v49 = vadd.f32 %v6745_v12, %v6730_v57  ;;  %v2523_v57 = vadd.f32 %v6728_v51, %v6745_v12 }
 0x2be   : > { %v2236_v34 = vpop.f32.mrf.mxu0  ;;  %v5440_v5 = vpop.eup %5439  ;;  %v2542_v51 = vadd.f32 %v6750_v17, %v6745_v12 }
 0x2bf   : > { %5443 = vtanh.f32 %v2235_v33  ;;  %v2499_v34 = vadd.f32 %v6745_v12, %v6722_v40  ;;  %v2518_v40 = vadd.f32 %v6745_v12, %v6735_v59 }
 0x2c0   : > { %v2237_v35 = vpop.f32.mrf.mxu0 }
 0x2c1   : > { %v2238_v37 = vadd.f32 %v6629_v54, %v2237_v35 }
 0x2c2   : > { %v5442_v38 = vpop.eup %5441  ;;  %v2239_v41 = vpop.f32.mrf.mxu0 }
 0x2c3   : > { %5445 = vtanh.f32 %v2238_v37  ;;  %v2356_v42 = vpack.c.bf16 %v5442_v38, %v5440_v5  ;;  %v6757_v25 = vpop.f32.mrf.mxu1 }
 0x2c5   : > { %4729 = vmatmul.mubr.bf16.gmra.mxu1 %v2356_v42  ;;  %v6765_v29 = vpop.f32.mrf.mxu1 }
 0x2c6   : > { %v2242_v45 = vpop.f32.mrf.mxu0 }
 0x2c7   : > { %v2243_v47 = vadd.f32 %v6629_v54, %v2242_v45  ;;  %v6769_v31 = vpop.f32.mrf.mxu1  ;;  %v2507_v45 = vadd.f32 %v6718_v46, %v6745_v12  ;;  %v2526_v46 = vadd.f32 %v6732_v53, %v6745_v12 }
 0x2c8   : > { %v2244_v48 = vpop.f32.mrf.mxu0  ;;  %v2558_v17 = vadd.f32 %v6769_v31, %v6745_v12 }
 0x2c9   : > { %5447 = vtanh.f32 %v2243_v47  ;;  %v2549_v5 = vpop.f32.mrf.mxu1 }
 0x2ca   : > { %v2245_v50 = vpop.f32.mrf.mxu0 }
 0x2cb   : > { %v2246_v2 = vadd.f32 %v6629_v54, %v2245_v50 }
 0x2cc   : > { %v2247_v52 = vpop.f32.mrf.mxu0  ;;  %v5444_v55 = vpop.eup %5443 }
 0x2cd   : > { %5449 = vtanh.f32 %v2246_v2 }
 0x2d0   : > { %v5446_v20 = vpop.eup %5445 }
 0x2d1   : > { %v2357_v26 = vpack.c.bf16 %v5446_v20, %v5444_v55  ;;  %v2534_v20 = vadd.f32 %v6745_v12, %v2533_v22 }
 0x2d3   : > { %4732 = vmatprep.mubr.bf16.mxu1 %v2357_v26 }
 0x2d4   : > { %v2250_v56 = vpop.f32.mrf.mxu0 }
 0x2d5   : > { %v2251_v4 = vadd.f32 %v6629_v54, %v2250_v56 }
 0x2d6   : > { %v2252_v58 = vpop.f32.mrf.mxu0  ;;  %v5448_v1 = vpop.eup %5447 }
 0x2d7   : > { %5451 = vtanh.f32 %v2251_v4  ;;  %v2531_v58 = vadd.f32 %v6745_v12, %v6740_v60  ;;  %v2539_v60 = vadd.f32 %v6738_v8, %v6745_v12 }
 0x2d8   : > { %v2253_v0 = vpop.f32.mrf.mxu0 }
 0x2d9   : > { %v2254_v6 = vadd.f32 %v6629_v54, %v2253_v0 }
 0x2da   : > { %v5450_v7 = vpop.eup %5449  ;;  %v2255_v62 = vpop.f32.mrf.mxu0 }
 0x2db   : > { %5453 = vtanh.f32 %v2254_v6  ;;  %v2358_v63 = vpack.c.bf16 %v5450_v7, %v5448_v1  ;;  %v2550_v62 = vadd.f32 %v6745_v12, %v2549_v5 }
 0x2dc   : > { %5455 = vtanh.f32 %v2470_v13  ;;  %v2547_v13 = vadd.f32 %v6745_v12, %v6765_v29 }
 0x2dd   : > { %4733 = vmatmul.mubr.bf16.gmra.mxu1 %v2358_v63 }
 0x2de   : > { %v2258_v61 = vpop.f32.mrf.mxu0  ;;  %v6776_v38 = vpop.f32.mrf.mxu1 }
 0x2df   : > { %v2259_v16 = vadd.f32 %v6629_v54, %v2258_v61 }
 0x2e0   : > { %v2260_v15 = vpop.f32.mrf.mxu0  ;;  %v2562_v47 = vpop.f32.mrf.mxu1 }
 0x2e1   : > { %5457 = vtanh.f32 %v2259_v16 }
 0x2e2   : > { %v2261_v10 = vpop.f32.mrf.mxu0 }
 0x2e3   : > { %v2262_v18 = vadd.f32 %v6629_v54, %v2261_v10  ;;  %v2475_v54 = vadd.f32 %v6698_v9, %v6745_v12  ;;  %v2491_v9 = vadd.f32 %v6708_v39, %v6745_v12  ;;  %v2510_v39 = vadd.f32 %v6724_v44, %v6745_v12  ;;  %v4703_v44 = vpop.f32.mrf.mxu1 }
 0x2e4   : > { %v2263_v21 = vpop.f32.mrf.mxu0  ;;  %v5452_v23 = vpop.eup %5451 }
 0x2e5   : > { %5459 = vtanh.f32 %v2262_v18  ;;  %v2565_v56 = vpop.f32.mrf.mxu1 }
 0x2e6   : > { %5461 = vtanh.f32 %v2467_v11  ;;  %v2566_v21 = vadd.f32 %v6745_v12, %v2565_v56 }
 0x2e7   : > { %5463 = vtanh.f32 %v2478_v19 }
 0x2e8   : > { %v5454_v24 = vpop.eup %5453  ;;  %5465 = vtanh.f32 %v2486_v28  ;;  %v2563_v28 = vadd.f32 %v6745_v12, %v2562_v47 }
 0x2e9   : > { %v2359_v43 = vpack.c.bf16 %v5454_v24, %v5452_v23  ;;  %5467 = vtanh.f32 %v2475_v54  ;;  %v5456_v32 = vpop.eup %5455  ;;  %v2555_v23 = vadd.f32 %v6757_v25, %v6745_v12 }
 0x2ea   : > { %5469 = vtanh.f32 %v2483_v14 }
 0x2eb   : > { %4736 = vmatprep.mubr.bf16.mxu1 %v2359_v43  ;;  %5471 = vtanh.f32 %v2494_v36  ;;  %v2574_v36 = vadd.f32 %v4703_v44, %v6745_v12 }
 0x2ec   : > { %5473 = vtanh.f32 %v2502_v3  ;;  %v2571_v3 = vadd.f32 %v6776_v38, %v6745_v12 }
 0x2ed   : > { %5475 = vtanh.f32 %v2491_v9 }
 0x2ee   : > { %v5458_v33 = vpop.eup %5457  ;;  %5477 = vtanh.f32 %v2499_v34 }
 0x2ef   : > { %5479 = vtanh.f32 %v2510_v39 }
 0x2f0   : > { %5481 = vtanh.f32 %v2518_v40 }
 0x2f1   : > { %5483 = vtanh.f32 %v2507_v45 }
 0x2f2   : > { %v5460_v27 = vpop.eup %5459  ;;  %5485 = vtanh.f32 %v2515_v49 }
 0x2f3   : > { %v5462_v35 = vpop.eup %5461  ;;  %v2360_v37 = vpack.c.bf16 %v5460_v27, %v5458_v33  ;;  %5487 = vtanh.f32 %v2526_v46 }
 0x2f4   : > { %v2785_v30 = vpack.c.bf16 %v5456_v32, %v5462_v35  ;;  %v5464_v41 = vpop.eup %5463  ;;  %v6796_v0 = vpop.f32.mrf.mxu1  ;;  %5489 = vtanh.f32 %v2534_v20 }
 0x2f5   : > { %4737 = vmatmul.mubr.bf16.gmra.mxu1 %v2360_v37  ;;  %v5466_v42 = vpop.eup %5465  ;;  %5491 = vtanh.f32 %v2523_v57  ;;  %v2587_v40 = vadd.f32 %v6796_v0, %v6745_v12 }
 0x2f6   : > { %4748 = vmatprep.mubr.msk.bf16.mxu1 %vm2856_vm0, %v2785_v30  ;;  %v5468_v48 = vpop.eup %5467  ;;  %5493 = vtanh.f32 %v2531_v58  ;;  %v2578_v53 = vpop.f32.mrf.mxu1 }
 0x2f7   : > { %v5470_v50 = vpop.eup %5469  ;;  %v2786_v2 = vpack.c.bf16 %v5464_v41, %v5468_v48  ;;  %5495 = vtanh.f32 %v2542_v51  ;;  %v2579_v27 = vadd.f32 %v6745_v12, %v2578_v53 }
 0x2f8   : > { %v2787_v52 = vpack.c.bf16 %v5466_v42, %v5470_v50  ;;  %v5472_v55 = vpop.eup %5471  ;;  %v4707_v16 = vpop.f32.mrf.mxu1  ;;  %5497 = vtanh.f32 %v2550_v62 }
 0x2f9   : > { %v5474_v26 = vpop.eup %5473  ;;  %5499 = vtanh.f32 %v2539_v60  ;;  %v2590_v30 = vadd.f32 %v4707_v16, %v6745_v12 }
 0x2fa   : > { %v5476_v4 = vpop.eup %5475  ;;  %5501 = vtanh.f32 %v2547_v13  ;;  %v2581_v8 = vpop.f32.mrf.mxu1 }
 0x2fb   : > { %v5478_v59 = vpop.eup %5477  ;;  %v2788_v1 = vpack.c.bf16 %v5472_v55, %v5476_v4  ;;  %5503 = vtanh.f32 %v2558_v17  ;;  %v2582_v25 = vadd.f32 %v6745_v12, %v2581_v8 }
 0x2fc   : > { %v2789_v6 = vpack.c.bf16 %v5474_v26, %v5478_v59  ;;  %v5480_v7 = vpop.eup %5479  ;;  %5505 = vtanh.f32 %v2566_v21 }
 0x2fd   : > { %4749 = vmatmul.mubr.msk.bf16.vlgmr.msra.gmra.mxu1 %vm2856_vm0, %v2786_v2  ;;  %v5482_v63 = vpop.eup %5481  ;;  %5507 = vtanh.f32 %v2555_v23  ;;  %v5071_v2 = vld [vmem:[%s7313_s9 + $0x8] sm:$0xff]  }
 0x2fe   : > { %4752 = vmatprep.mubr.msk.bf16.mxu1 %vm2856_vm0, %v2787_v52  ;;  %v5484_v61 = vpop.eup %5483  ;;  %5509 = vtanh.f32 %v2563_v28  ;;  %4812 = vmatprep.subr.bf16.mxu1 %v5071_v2 }
 0x2ff   : > { %v5486_v15 = vpop.eup %5485  ;;  %v2790_v10 = vpack.c.bf16 %v5480_v7, %v5484_v61  ;;  %5511 = vtanh.f32 %v2574_v36  ;;  %4813 = vmatpush3.bf16.msra.mxu1 %v5071_v2 }
 0x300   : > { %v2791_v11 = vpack.c.bf16 %v5482_v63, %v5486_v15  ;;  %v5488_v18 = vpop.eup %5487  ;;  %5513 = vtanh.f32 %v2582_v25 }
 0x301   : > { %v5490_v22 = vpop.eup %5489  ;;  %5515 = vtanh.f32 %v2571_v3 }
 0x302   : > { %v5492_v19 = vpop.eup %5491  ;;  %5517 = vtanh.f32 %v2579_v27 }
 0x303   : > { %v5494_v43 = vpop.eup %5493  ;;  %v2792_v54 = vpack.c.bf16 %v5488_v18, %v5492_v19  ;;  %5519 = vtanh.f32 %v2590_v30 }
 0x304   : > { %v2793_v14 = vpack.c.bf16 %v5490_v22, %v5494_v43  ;;  %v5496_v31 = vpop.eup %5495 }
 0x305   : > { %4753 = vmatmul.mubr.msk.bf16.gmra.mxu1 %vm2856_vm0, %v2788_v1  ;;  %v5498_v32 = vpop.eup %5497 }
 0x306   : > { %4756 = vmatprep.mubr.msk.bf16.mxu1 %vm2856_vm0, %v2789_v6  ;;  %v5500_v9 = vpop.eup %5499 }
 0x307   : > { %v5502_v34 = vpop.eup %5501  ;;  %v2794_v35 = vpack.c.bf16 %v5496_v31, %v5500_v9  ;;  %v5072_v31 = vld [vmem:[%s7313_s9] sm:$0xff]  }
 0x308   : > { %v2795_v5 = vpack.c.bf16 %v5498_v32, %v5502_v34  ;;  %v5504_v39 = vpop.eup %5503  ;;  %4814 = vmatprep.subr.bf16.mxu1 %v5072_v31 }
 0x309   : > { %v5506_v41 = vpop.eup %5505  ;;  %4815 = vmatpush3.bf16.msra.mxu1 %v5072_v31 }
 0x30a   : > { %v5508_v42 = vpop.eup %5507 }
 0x30b   : > { %v5510_v47 = vpop.eup %5509  ;;  %v2796_v48 = vpack.c.bf16 %v5504_v39, %v5508_v42 }
 0x30c   : > { %v4710_v24 = vpop.f32.mrf.mxu1  ;;  %v2797_v50 = vpack.c.bf16 %v5506_v41, %v5510_v47  ;;  %v5512_v55 = vpop.eup %5511 }
 0x30d   : > { %4757 = vmatmul.mubr.msk.bf16.gmra.mxu1 %vm2856_vm0, %v2790_v10  ;;  %v2603_v52 = vadd.f32 %v4710_v24, %v6745_v12  ;;  %v5514_v57 = vpop.eup %5513 }
 0x30e   : > { %4760 = vmatprep.mubr.msk.bf16.mxu1 %vm2856_vm0, %v2791_v11  ;;  %v2594_v29 = vpop.f32.mrf.mxu1  ;;  %v5516_v56 = vpop.eup %5515 }
 0x30f   : > { %v2595_v45 = vadd.f32 %v6745_v12, %v2594_v29  ;;  %v5518_v58 = vpop.eup %5517  ;;  %v2798_v0 = vpack.c.bf16 %v5512_v55, %v5516_v56 }
 0x310   : > { %v4711_v33 = vpop.f32.mrf.mxu1  ;;  %v2799_v1 = vpack.c.bf16 %v5514_v57, %v5518_v58  ;;  %v5520_v51 = vpop.eup %5519 }
 0x311   : > { %v2606_v46 = vadd.f32 %v4711_v33, %v6745_v12 }
 0x312   : > { %v2597_v37 = vpop.f32.mrf.mxu1 }
 0x313   : > { %v2598_v38 = vadd.f32 %v6745_v12, %v2597_v37 }
 0x315   : > { %4761 = vmatmul.mubr.msk.bf16.gmra.mxu1 %vm2856_vm0, %v2792_v54  ;;  %5521 = vtanh.f32 %v2598_v38 }
 0x316   : > { %4764 = vmatprep.mubr.msk.bf16.mxu1 %vm2856_vm0, %v2793_v14  ;;  %5523 = vtanh.f32 %v2587_v40 }
 0x317   : > { %5525 = vtanh.f32 %v2595_v45 }
 0x318   : > { %5527 = vtanh.f32 %v2603_v52 }
 0x319   : > { %5529 = vtanh.f32 %v2606_v46 }
 0x31d   : > { %4765 = vmatmul.mubr.msk.bf16.gmra.mxu1 %vm2856_vm0, %v2794_v35 }
 0x31e   : > { %4768 = vmatprep.mubr.msk.bf16.mxu1 %vm2856_vm0, %v2795_v5 }
 0x322   : > { %v5522_v53 = vpop.eup %5521 }
 0x323   : > { %v5524_v62 = vpop.eup %5523 }
 0x324   : > { %v4714_v49 = vpop.f32.mrf.mxu1  ;;  %v5526_v63 = vpop.eup %5525  ;;  %v2800_v60 = vpack.c.bf16 %v5520_v51, %v5524_v62 }
 0x325   : > { %4769 = vmatmul.mubr.msk.bf16.gmra.mxu1 %vm2856_vm0, %v2796_v48  ;;  %v2619_v7 = vadd.f32 %v4714_v49, %v6745_v12  ;;  %v2801_v61 = vpack.c.bf16 %v5522_v53, %v5526_v63  ;;  %v5528_v13 = vpop.eup %5527 }
 0x326   : > { %4772 = vmatprep.mubr.msk.bf16.mxu1 %vm2856_vm0, %v2797_v50  ;;  %v2610_v44 = vpop.f32.mrf.mxu1  ;;  %v5530_v15 = vpop.eup %5529 }
 0x327   : > { %v2611_v20 = vadd.f32 %v6745_v12, %v2610_v44  ;;  %v2802_v11 = vpack.c.bf16 %v5530_v15, %v5528_v13 }
 0x328   : > { %v4715_v26 = vpop.f32.mrf.mxu1 }
 0x329   : > { %5531 = vtanh.f32 %v2611_v20  ;;  %v2622_v6 = vadd.f32 %v4715_v26, %v6745_v12 }
 0x32a   : > { %v2613_v4 = vpop.f32.mrf.mxu1 }
 0x32b   : > { %v2614_v59 = vadd.f32 %v6745_v12, %v2613_v4 }
 0x32d   : > { %5533 = vtanh.f32 %v2614_v59  ;;  %4773 = vmatmul.mubr.msk.bf16.gmra.mxu1 %vm2856_vm0, %v2798_v0 }
 0x32e   : > { %4776 = vmatprep.mubr.msk.bf16.mxu1 %vm2856_vm0, %v2799_v1  ;;  %5535 = vtanh.f32 %v2622_v6 }
 0x32f   : > { %5537 = vtanh.f32 %v2619_v7 }
 0x335   : > { %4777 = vmatmul.mubr.msk.bf16.gmra.mxu1 %vm2856_vm0, %v2800_v60 }
 0x336   : > { %4780 = vmatprep.mubr.msk.bf16.mxu1 %vm2856_vm0, %v2801_v61  ;;  %v5532_v16 = vpop.eup %5531 }
 0x33a   : > { %v5534_v10 = vpop.eup %5533 }
 0x33b   : > { %v2803_v17 = vpack.c.bf16 %v5534_v10, %v5532_v16  ;;  %v5536_v22 = vpop.eup %5535  ;;  %v6875_v16 = vld [vmem:[%s7315_s11 + $0x8] sm:$0xff]  }
 0x33c   : > { %v4718_v8 = vpop.f32.mrf.mxu1  ;;  %v5538_v19 = vpop.eup %5537  ;;  %4880 = vmatprep.subr.bf16.mxu0 %v6875_v16  ;;  %4948 = vmatprep.subr.bf16.mxu1 %v6875_v16 }
 0x33d   : > { %4781 = vmatmul.mubr.msk.bf16.gmra.mxu1 %vm2856_vm0, %v2802_v11  ;;  %v2635_v28 = vadd.f32 %v4718_v8, %v6745_v12  ;;  %v2804_v14 = vpack.c.bf16 %v5536_v22, %v5538_v19  ;;  %4881 = vmatpush3.bf16.msra.mxu0 %v6875_v16 }
 0x33e   : > { %4784 = vmatprep.mubr.msk.bf16.mxu1 %vm2856_vm0, %v2803_v17  ;;  %v2626_v18 = vpop.f32.mrf.mxu1 }
 0x33f   : > { %v2627_v21 = vadd.f32 %v6745_v12, %v2626_v18 }
 0x340   : > { %v4719_v23 = vpop.f32.mrf.mxu1 }
 0x341   : > { %v2638_v24 = vadd.f32 %v4719_v23, %v6745_v12  ;;  %5539 = vtanh.f32 %v2627_v21 }
 0x342   : > { %v2629_v43 = vpop.f32.mrf.mxu1 }
 0x343   : > { %v2630_v54 = vadd.f32 %v6745_v12, %v2629_v43  ;;  %5541 = vtanh.f32 %v2638_v24 }
 0x345   : > { %5543 = vtanh.f32 %v2630_v54  ;;  %4785 = vmatmul.mubr.msk.bf16.gmra.mxu1 %vm2856_vm0, %v2804_v14 }
 0x346   : > { %5545 = vtanh.f32 %v2635_v28 }
 0x34e   : > { %v5540_v29 = vpop.eup %5539 }
 0x350   : > { %v5542_v36 = vpop.eup %5541 }
 0x352   : > { %v5544_v25 = vpop.eup %5543 }
 0x353   : > { %v5546_v32 = vpop.eup %5545  ;;  %v2805_v3 = vpack.c.bf16 %v5544_v25, %v5540_v29 }
 0x354   : > { %v4722_v33 = vpop.f32.mrf.mxu1  ;;  %v2806_v9 = vpack.c.bf16 %v5542_v36, %v5546_v32 }
 0x355   : > { %4788 = vmatprep.mubr.msk.bf16.mxu1 %vm2856_vm0, %v2805_v3  ;;  %v2651_v37 = vadd.f32 %v4722_v33, %v6745_v12 }
 0x356   : > { %v2642_v27 = vpop.f32.mrf.mxu1  ;;  %4789 = vmatmul.mubr.msk.bf16.gmra.mxu1 %vm2856_vm0, %v2806_v9 }
 0x357   : > { %v2643_v34 = vadd.f32 %v6745_v12, %v2642_v27 }
 0x358   : > { %v4723_v35 = vpop.f32.mrf.mxu1 }
 0x359   : > { %v2654_v5 = vadd.f32 %v4723_v35, %v6745_v12  ;;  %5547 = vtanh.f32 %v2643_v34  ;;  %v6895_v35 = vld [vmem:[%s7312_s8] ss:$0 sm:$0xff] }
 0x35a   : > { %v2645_v30 = vpop.f32.mrf.mxu1 }
 0x35b   : > { %v2646_v39 = vadd.f32 %v6745_v12, %v2645_v30  ;;  %5549 = vtanh.f32 %v2654_v5 }
 0x35d   : > { %5551 = vtanh.f32 %v2646_v39 }
 0x35e   : > { %5553 = vtanh.f32 %v2651_v37 }
 0x366   : > { %v5548_v38 = vpop.eup %5547 }
 0x368   : > { %v5550_v41 = vpop.eup %5549 }
 0x36a   : > { %v5552_v40 = vpop.eup %5551 }
 0x36b   : > { %v5554_v42 = vpop.eup %5553  ;;  %v2807_v45 = vpack.c.bf16 %v5552_v40, %v5548_v38 }
 0x36c   : > { %v4726_v47 = vpop.f32.mrf.mxu1  ;;  %v2808_v48 = vpack.c.bf16 %v5550_v41, %v5554_v42 }
 0x36d   : > { %4792 = vmatprep.mubr.msk.bf16.mxu1 %vm2856_vm0, %v2807_v45  ;;  %v2667_v44 = vadd.f32 %v4726_v47, %v6745_v12 }
 0x36e   : > { %v2658_v49 = vpop.f32.mrf.mxu1  ;;  %4793 = vmatmul.mubr.msk.bf16.gmra.mxu1 %vm2856_vm0, %v2808_v48 }
 0x36f   : > { %v2659_v50 = vadd.f32 %v6745_v12, %v2658_v49 }
 0x370   : > { %v4727_v2 = vpop.f32.mrf.mxu1 }
 0x371   : > { %v2670_v52 = vadd.f32 %v4727_v2, %v6745_v12  ;;  %5555 = vtanh.f32 %v2659_v50 }
 0x372   : > { %v2661_v46 = vpop.f32.mrf.mxu1 }
 0x373   : > { %v2662_v55 = vadd.f32 %v6745_v12, %v2661_v46  ;;  %5557 = vtanh.f32 %v2670_v52 }
 0x375   : > { %5559 = vtanh.f32 %v2662_v55 }
 0x376   : > { %5561 = vtanh.f32 %v2667_v44 }
 0x37e   : > { %v5556_v20 = vpop.eup %5555 }
 0x380   : > { %v5558_v26 = vpop.eup %5557 }
 0x382   : > { %v5560_v57 = vpop.eup %5559 }
 0x383   : > { %v5562_v56 = vpop.eup %5561  ;;  %v2809_v4 = vpack.c.bf16 %v5560_v57, %v5556_v20 }
 0x384   : > { %v2810_v59 = vpack.c.bf16 %v5558_v26, %v5562_v56 }
 0x385   : > { %v4730_v58 = vpop.f32.mrf.mxu1  ;;  %4796 = vmatprep.mubr.msk.bf16.mxu1 %vm2856_vm0, %v2809_v4 }
 0x386   : > { %4797 = vmatmul.mubr.msk.bf16.gmra.mxu1 %vm2856_vm0, %v2810_v59  ;;  %v2683_v53 = vadd.f32 %v4730_v58, %v6745_v12 }
 0x387   : > { %v2674_v0 = vpop.f32.mrf.mxu1 }
 0x388   : > { %v2675_v1 = vadd.f32 %v6745_v12, %v2674_v0 }
 0x389   : > { %v4731_v6 = vpop.f32.mrf.mxu1 }
 0x38a   : > { %v2686_v51 = vadd.f32 %v4731_v6, %v6745_v12  ;;  %5563 = vtanh.f32 %v2675_v1 }
 0x38b   : > { %v2677_v7 = vpop.f32.mrf.mxu1 }
 0x38c   : > { %v2678_v62 = vadd.f32 %v6745_v12, %v2677_v7  ;;  %5565 = vtanh.f32 %v2686_v51 }
 0x38e   : > { %5567 = vtanh.f32 %v2678_v62 }
 0x38f   : > { %5569 = vtanh.f32 %v2683_v53 }
 0x397   : > { %v5564_v63 = vpop.eup %5563 }
 0x399   : > { %v5566_v60 = vpop.eup %5565 }
 0x39b   : > { %v5568_v61 = vpop.eup %5567 }
 0x39c   : > { %v5570_v13 = vpop.eup %5569  ;;  %v2811_v15 = vpack.c.bf16 %v5568_v61, %v5564_v63 }
 0x39d   : > { %v4734_v10 = vpop.f32.mrf.mxu1  ;;  %v2812_v11 = vpack.c.bf16 %v5566_v60, %v5570_v13 }
 0x39e   : > { %4800 = vmatprep.mubr.msk.bf16.mxu1 %vm2856_vm0, %v2811_v15  ;;  %v2699_v22 = vadd.f32 %v4734_v10, %v6745_v12 }
 0x39f   : > { %v2690_v17 = vpop.f32.mrf.mxu1  ;;  %4801 = vmatmul.mubr.msk.bf16.gmra.mxu1 %vm2856_vm0, %v2812_v11 }
 0x3a0   : > { %v2691_v8 = vadd.f32 %v6745_v12, %v2690_v17 }
 0x3a1   : > { %v4735_v18 = vpop.f32.mrf.mxu1 }
 0x3a2   : > { %v2702_v21 = vadd.f32 %v4735_v18, %v6745_v12  ;;  %5571 = vtanh.f32 %v2691_v8 }
 0x3a3   : > { %v2693_v23 = vpop.f32.mrf.mxu1 }
 0x3a4   : > { %v2694_v24 = vadd.f32 %v6745_v12, %v2693_v23  ;;  %5573 = vtanh.f32 %v2702_v21 }
 0x3a6   : > { %5575 = vtanh.f32 %v2694_v24 }
 0x3a7   : > { %5577 = vtanh.f32 %v2699_v22 }
 0x3af   : > { %v5572_v19 = vpop.eup %5571 }
 0x3b1   : > { %v5574_v28 = vpop.eup %5573 }
 0x3b3   : > { %v5576_v43 = vpop.eup %5575 }
 0x3b4   : > { %v5578_v54 = vpop.eup %5577  ;;  %v2813_v14 = vpack.c.bf16 %v5576_v43, %v5572_v19 }
 0x3b5   : > { %v2814_v29 = vpack.c.bf16 %v5574_v28, %v5578_v54  ;;  %v4738_v36 = vpop.f32.mrf.mxu1 }
 0x3b6   : > { %4804 = vmatprep.mubr.msk.bf16.mxu1 %vm2856_vm0, %v2813_v14  ;;  %v2715_v33 = vadd.f32 %v4738_v36, %v6745_v12 }
 0x3b7   : > { %4805 = vmatmul.mubr.msk.bf16.gmra.mxu1 %vm2856_vm0, %v2814_v29  ;;  %v2706_v31 = vpop.f32.mrf.mxu1 }
 0x3b8   : > { %v2707_v25 = vadd.f32 %v6745_v12, %v2706_v31 }
 0x3b9   : > { %v4739_v32 = vpop.f32.mrf.mxu1 }
 0x3ba   : > { %v2718_v3 = vadd.f32 %v4739_v32, %v6745_v12  ;;  %5579 = vtanh.f32 %v2707_v25 }
 0x3bb   : > { %v2709_v9 = vpop.f32.mrf.mxu1 }
 0x3bc   : > { %v2710_v27 = vadd.f32 %v6745_v12, %v2709_v9  ;;  %5581 = vtanh.f32 %v2718_v3 }
 0x3bd   : > { %v4750_v34 = vpop.f32.mrf.mxu1 }
 0x3be   : > { %5583 = vtanh.f32 %v2710_v27  ;;  %v2996_v38 = vadd.f32 %v4750_v34, %v6895_v35 }
 0x3bf   : > { %5585 = vtanh.f32 %v2715_v33  ;;  %v2987_v5 = vpop.f32.mrf.mxu1 }
 0x3c0   : > { %v2988_v37 = vadd.f32 %v6895_v35, %v2987_v5 }
 0x3c1   : > { %v4751_v30 = vpop.f32.mrf.mxu1 }
 0x3c2   : > { %v2999_v39 = vadd.f32 %v4751_v30, %v6895_v35  ;;  %5587 = vtanh.f32 %v2988_v37 }
 0x3c3   : > { %v2990_v41 = vpop.f32.mrf.mxu1 }
 0x3c4   : > { %v2991_v12 = vadd.f32 %v6895_v35, %v2990_v41  ;;  %5589 = vtanh.f32 %v2999_v39 }
 0x3c5   : > { %v4754_v40 = vpop.f32.mrf.mxu1 }
 0x3c6   : > { %5591 = vtanh.f32 %v2991_v12  ;;  %v3012_v52 = vadd.f32 %v4754_v40, %v6895_v35 }
 0x3c7   : > { %5593 = vtanh.f32 %v2996_v38  ;;  %v3003_v42 = vpop.f32.mrf.mxu1  ;;  %v5580_v47 = vpop.eup %5579 }
 0x3c8   : > { %v3004_v45 = vadd.f32 %v6895_v35, %v3003_v42 }
 0x3c9   : > { %v4755_v48 = vpop.f32.mrf.mxu1  ;;  %v5582_v49 = vpop.eup %5581 }
 0x3ca   : > { %v3015_v50 = vadd.f32 %v4755_v48, %v6895_v35  ;;  %5595 = vtanh.f32 %v3004_v45 }
 0x3cb   : > { %v5584_v2 = vpop.eup %5583  ;;  %v3006_v44 = vpop.f32.mrf.mxu1 }
 0x3cc   : > { %v5586_v46 = vpop.eup %5585  ;;  %v3007_v55 = vadd.f32 %v6895_v35, %v3006_v44  ;;  %v2815_v20 = vpack.c.bf16 %v5584_v2, %v5580_v47  ;;  %5597 = vtanh.f32 %v3015_v50 }
 0x3cd   : > { %v4758_v26 = vpop.f32.mrf.mxu1  ;;  %v2816_v57 = vpack.c.bf16 %v5582_v49, %v5586_v46 }
 0x3ce   : > { %5599 = vtanh.f32 %v3007_v55  ;;  %4808 = vmatprep.mubr.msk.bf16.mxu1 %vm2856_vm0, %v2815_v20  ;;  %v3028_v51 = vadd.f32 %v4758_v26, %v6895_v35 }
 0x3cf   : > { %5601 = vtanh.f32 %v3012_v52  ;;  %v3019_v56 = vpop.f32.mrf.mxu1  ;;  %4809 = vmatmul.mubr.msk.bf16.gmra.mxu1 %vm2856_vm0, %v2816_v57  ;;  %v5588_v58 = vpop.eup %5587 }
 0x3d0   : > { %v3020_v4 = vadd.f32 %v6895_v35, %v3019_v56 }
 0x3d1   : > { %v4759_v59 = vpop.f32.mrf.mxu1  ;;  %v5590_v0 = vpop.eup %5589 }
 0x3d2   : > { %v3031_v1 = vadd.f32 %v4759_v59, %v6895_v35  ;;  %5603 = vtanh.f32 %v3020_v4 }
 0x3d3   : > { %v5592_v6 = vpop.eup %5591  ;;  %v3022_v53 = vpop.f32.mrf.mxu1 }
 0x3d4   : > { %v5594_v7 = vpop.eup %5593  ;;  %v3023_v62 = vadd.f32 %v6895_v35, %v3022_v53  ;;  %v3306_v63 = vpack.c.bf16 %v5592_v6, %v5588_v58  ;;  %5605 = vtanh.f32 %v3031_v1 }
 0x3d5   : > { %v3307_v60 = vpack.c.bf16 %v5590_v0, %v5594_v7  ;;  %v4762_v61 = vpop.f32.mrf.mxu1 }
 0x3d6   : > { %5607 = vtanh.f32 %v3023_v62  ;;  %4816 = vmatprep.mubr.msk.bf16.mxu1 %vm3361_vm1, %v3306_v63  ;;  %v3044_v21 = vadd.f32 %v4762_v61, %v6895_v35 }
 0x3d7   : > { %5609 = vtanh.f32 %v3028_v51  ;;  %v3035_v13 = vpop.f32.mrf.mxu1  ;;  %4817 = vmatmul.mubr.msk.bf16.vlgmr.msra.gmra.mxu1 %vm3361_vm1, %v3307_v60  ;;  %v5596_v10 = vpop.eup %5595 }
 0x3d8   : > { %v3036_v15 = vadd.f32 %v6895_v35, %v3035_v13  ;;  %4950 = vmatpush3.bf16.msra.mxu1 %v6875_v16 }
 0x3d9   : > { %v4763_v11 = vpop.f32.mrf.mxu1  ;;  %v5598_v17 = vpop.eup %5597 }
 0x3da   : > { %v3047_v8 = vadd.f32 %v4763_v11, %v6895_v35  ;;  %5611 = vtanh.f32 %v3036_v15 }
 0x3db   : > { %v5600_v18 = vpop.eup %5599  ;;  %v3038_v22 = vpop.f32.mrf.mxu1 }
 0x3dc   : > { %v5602_v23 = vpop.eup %5601  ;;  %v3039_v24 = vadd.f32 %v6895_v35, %v3038_v22  ;;  %v3308_v19 = vpack.c.bf16 %v5600_v18, %v5596_v10  ;;  %5613 = vtanh.f32 %v3047_v8 }
 0x3dd   : > { %v4766_v28 = vpop.f32.mrf.mxu1  ;;  %v3309_v43 = vpack.c.bf16 %v5598_v17, %v5602_v23 }
 0x3de   : > { %5615 = vtanh.f32 %v3039_v24  ;;  %4820 = vmatprep.mubr.msk.bf16.mxu1 %vm3361_vm1, %v3308_v19  ;;  %v3060_v32 = vadd.f32 %v4766_v28, %v6895_v35 }
 0x3df   : > { %5617 = vtanh.f32 %v3044_v21  ;;  %v3051_v16 = vpop.f32.mrf.mxu1  ;;  %4821 = vmatmul.mubr.msk.bf16.gmra.mxu1 %vm3361_vm1, %v3309_v43  ;;  %v5604_v14 = vpop.eup %5603 }
 0x3e0   : > { %v3052_v54 = vadd.f32 %v6895_v35, %v3051_v16 }
 0x3e1   : > { %v4767_v29 = vpop.f32.mrf.mxu1  ;;  %v5606_v36 = vpop.eup %5605 }
 0x3e2   : > { %v3063_v31 = vadd.f32 %v4767_v29, %v6895_v35  ;;  %5619 = vtanh.f32 %v3052_v54 }
 0x3e3   : > { %v5608_v25 = vpop.eup %5607  ;;  %v3054_v3 = vpop.f32.mrf.mxu1 }
 0x3e4   : > { %v5610_v33 = vpop.eup %5609  ;;  %v3055_v9 = vadd.f32 %v6895_v35, %v3054_v3  ;;  %v3310_v27 = vpack.c.bf16 %v5608_v25, %v5604_v14  ;;  %5621 = vtanh.f32 %v3063_v31 }
 0x3e5   : > { %v4770_v34 = vpop.f32.mrf.mxu1  ;;  %v3311_v5 = vpack.c.bf16 %v5606_v36, %v5610_v33 }
 0x3e6   : > { %5623 = vtanh.f32 %v3055_v9  ;;  %4824 = vmatprep.mubr.msk.bf16.mxu1 %vm3361_vm1, %v3310_v27  ;;  %v3076_v42 = vadd.f32 %v4770_v34, %v6895_v35 }
 0x3e7   : > { %5625 = vtanh.f32 %v3060_v32  ;;  %v3067_v37 = vpop.f32.mrf.mxu1  ;;  %4825 = vmatmul.mubr.msk.bf16.gmra.mxu1 %vm3361_vm1, %v3311_v5  ;;  %v5612_v39 = vpop.eup %5611 }
 0x3e8   : > { %v3068_v30 = vadd.f32 %v6895_v35, %v3067_v37 }
 0x3e9   : > { %v4771_v38 = vpop.f32.mrf.mxu1  ;;  %v5614_v41 = vpop.eup %5613 }
 0x3ea   : > { %v3079_v12 = vadd.f32 %v4771_v38, %v6895_v35  ;;  %5627 = vtanh.f32 %v3068_v30 }
 0x3eb   : > { %v5616_v40 = vpop.eup %5615  ;;  %v3070_v45 = vpop.f32.mrf.mxu1 }
 0x3ec   : > { %v5618_v47 = vpop.eup %5617  ;;  %v3071_v48 = vadd.f32 %v6895_v35, %v3070_v45  ;;  %v3312_v49 = vpack.c.bf16 %v5616_v40, %v5612_v39  ;;  %5629 = vtanh.f32 %v3079_v12 }
 0x3ed   : > { %v4774_v50 = vpop.f32.mrf.mxu1  ;;  %v3313_v2 = vpack.c.bf16 %v5614_v41, %v5618_v47 }
 0x3ee   : > { %5631 = vtanh.f32 %v3071_v48  ;;  %4828 = vmatprep.mubr.msk.bf16.mxu1 %vm3361_vm1, %v3312_v49  ;;  %v3092_v56 = vadd.f32 %v4774_v50, %v6895_v35 }
 0x3ef   : > { %5633 = vtanh.f32 %v3076_v42  ;;  %v3083_v52 = vpop.f32.mrf.mxu1  ;;  %4829 = vmatmul.mubr.msk.bf16.gmra.mxu1 %vm3361_vm1, %v3313_v2  ;;  %v5620_v46 = vpop.eup %5619 }
 0x3f0   : > { %v3084_v44 = vadd.f32 %v6895_v35, %v3083_v52 }
 0x3f1   : > { %v4775_v55 = vpop.f32.mrf.mxu1  ;;  %v5622_v20 = vpop.eup %5621 }
 0x3f2   : > { %v3095_v26 = vadd.f32 %v4775_v55, %v6895_v35  ;;  %5635 = vtanh.f32 %v3084_v44 }
 0x3f3   : > { %v5624_v57 = vpop.eup %5623  ;;  %v3086_v4 = vpop.f32.mrf.mxu1 }
 0x3f4   : > { %v5626_v58 = vpop.eup %5625  ;;  %v3087_v59 = vadd.f32 %v6895_v35, %v3086_v4  ;;  %v3314_v0 = vpack.c.bf16 %v5624_v57, %v5620_v46  ;;  %5637 = vtanh.f32 %v3095_v26 }
 0x3f5   : > { %v4778_v1 = vpop.f32.mrf.mxu1  ;;  %v3315_v6 = vpack.c.bf16 %v5622_v20, %v5626_v58 }
 0x3f6   : > { %5639 = vtanh.f32 %v3087_v59  ;;  %4832 = vmatprep.mubr.msk.bf16.mxu1 %vm3361_vm1, %v3314_v0  ;;  %v3108_v13 = vadd.f32 %v4778_v1, %v6895_v35  ;;  %v5074_v59 = vld [vmem:[%s7315_s11] sm:$0xff]  }
 0x3f7   : > { %5641 = vtanh.f32 %v3092_v56  ;;  %v3099_v51 = vpop.f32.mrf.mxu1  ;;  %4833 = vmatmul.mubr.msk.bf16.gmra.mxu1 %vm3361_vm1, %v3315_v6  ;;  %v5628_v7 = vpop.eup %5627  ;;  %4882 = vmatprep.subr.bf16.mxu0 %v5074_v59 }
 0x3f8   : > { %v3100_v53 = vadd.f32 %v6895_v35, %v3099_v51  ;;  %4883 = vmatpush3.bf16.msra.mxu0 %v5074_v59  ;;  %4949 = vmatprep.subr.bf16.mxu1 %v5074_v59 }
 0x3f9   : > { %v4779_v62 = vpop.f32.mrf.mxu1  ;;  %v5630_v63 = vpop.eup %5629  ;;  %4951 = vmatpush3.bf16.msra.mxu1 %v5074_v59 }
 0x3fa   : > { %v3111_v60 = vadd.f32 %v4779_v62, %v6895_v35  ;;  %5643 = vtanh.f32 %v3100_v53 }
 0x3fb   : > { %v5632_v61 = vpop.eup %5631  ;;  %v3102_v15 = vpop.f32.mrf.mxu1 }
 0x3fc   : > { %v5634_v10 = vpop.eup %5633  ;;  %v3103_v11 = vadd.f32 %v6895_v35, %v3102_v15  ;;  %v3316_v17 = vpack.c.bf16 %v5632_v61, %v5628_v7  ;;  %5645 = vtanh.f32 %v3111_v60 }
 0x3fd   : > { %v4782_v8 = vpop.f32.mrf.mxu1  ;;  %v3317_v18 = vpack.c.bf16 %v5630_v63, %v5634_v10 }
 0x3fe   : > { %5647 = vtanh.f32 %v3103_v11  ;;  %4836 = vmatprep.mubr.msk.bf16.mxu1 %vm3361_vm1, %v3316_v17  ;;  %v3124_v16 = vadd.f32 %v4782_v8, %v6895_v35 }
 0x3ff   : > { %5649 = vtanh.f32 %v3108_v13  ;;  %v3115_v21 = vpop.f32.mrf.mxu1  ;;  %4837 = vmatmul.mubr.msk.bf16.gmra.mxu1 %vm3361_vm1, %v3317_v18  ;;  %v5636_v23 = vpop.eup %5635 }
 0x400   : > { %v3116_v22 = vadd.f32 %v6895_v35, %v3115_v21 }
 0x401   : > { %v4783_v24 = vpop.f32.mrf.mxu1  ;;  %v5638_v19 = vpop.eup %5637 }
 0x402   : > { %v3127_v28 = vadd.f32 %v4783_v24, %v6895_v35  ;;  %5651 = vtanh.f32 %v3116_v22 }
 0x403   : > { %v5640_v43 = vpop.eup %5639  ;;  %v3118_v54 = vpop.f32.mrf.mxu1 }
 0x404   : > { %v5642_v14 = vpop.eup %5641  ;;  %v3119_v29 = vadd.f32 %v6895_v35, %v3118_v54  ;;  %v3318_v36 = vpack.c.bf16 %v5640_v43, %v5636_v23  ;;  %5653 = vtanh.f32 %v3127_v28 }
 0x405   : > { %v4786_v31 = vpop.f32.mrf.mxu1  ;;  %v3319_v25 = vpack.c.bf16 %v5638_v19, %v5642_v14 }
 0x406   : > { %5655 = vtanh.f32 %v3119_v29  ;;  %4840 = vmatprep.mubr.msk.bf16.mxu1 %vm3361_vm1, %v3318_v36  ;;  %v3140_v37 = vadd.f32 %v4786_v31, %v6895_v35 }
 0x407   : > { %5657 = vtanh.f32 %v3124_v16  ;;  %v3131_v32 = vpop.f32.mrf.mxu1  ;;  %4841 = vmatmul.mubr.msk.bf16.gmra.mxu1 %vm3361_vm1, %v3319_v25  ;;  %v5644_v33 = vpop.eup %5643 }
 0x408   : > { %v3132_v3 = vadd.f32 %v6895_v35, %v3131_v32 }
 0x409   : > { %v4787_v9 = vpop.f32.mrf.mxu1  ;;  %v5646_v27 = vpop.eup %5645 }
 0x40a   : > { %v3143_v34 = vadd.f32 %v4787_v9, %v6895_v35  ;;  %5659 = vtanh.f32 %v3132_v3 }
 0x40b   : > { %v5648_v5 = vpop.eup %5647  ;;  %v3134_v30 = vpop.f32.mrf.mxu1 }
 0x40c   : > { %v5650_v39 = vpop.eup %5649  ;;  %v3135_v38 = vadd.f32 %v6895_v35, %v3134_v30  ;;  %v3320_v41 = vpack.c.bf16 %v5648_v5, %v5644_v33  ;;  %5661 = vtanh.f32 %v3143_v34 }
 0x40d   : > { %v3321_v12 = vpack.c.bf16 %v5646_v27, %v5650_v39 }
 0x40e   : > { %5663 = vtanh.f32 %v3135_v38  ;;  %4844 = vmatprep.mubr.msk.bf16.mxu1 %vm3361_vm1, %v3320_v41 }
 0x40f   : > { %5665 = vtanh.f32 %v3140_v37  ;;  %4845 = vmatmul.mubr.msk.bf16.gmra.mxu1 %vm3361_vm1, %v3321_v12  ;;  %v5652_v40 = vpop.eup %5651 }
 0x411   : > { %v5654_v42 = vpop.eup %5653 }
 0x413   : > { %v5656_v45 = vpop.eup %5655 }
 0x414   : > { %v5658_v47 = vpop.eup %5657  ;;  %v3322_v48 = vpack.c.bf16 %v5656_v45, %v5652_v40 }
 0x415   : > { %v3323_v49 = vpack.c.bf16 %v5654_v42, %v5658_v47 }
 0x416   : > { %4848 = vmatprep.mubr.msk.bf16.mxu1 %vm3361_vm1, %v3322_v48  ;;  %v4790_v50 = vpop.f32.mrf.mxu1 }
 0x417   : > { %4849 = vmatmul.mubr.msk.bf16.gmra.mxu1 %vm3361_vm1, %v3323_v49  ;;  %v5660_v52 = vpop.eup %5659  ;;  %v3156_v56 = vadd.f32 %v4790_v50, %v6895_v35 }
 0x418   : > { %v3147_v2 = vpop.f32.mrf.mxu1 }
 0x419   : > { %v3148_v44 = vadd.f32 %v6895_v35, %v3147_v2  ;;  %v5662_v46 = vpop.eup %5661 }
 0x41a   : > { %v4791_v55 = vpop.f32.mrf.mxu1 }
 0x41b   : > { %v5664_v20 = vpop.eup %5663  ;;  %v3159_v26 = vadd.f32 %v4791_v55, %v6895_v35  ;;  %5667 = vtanh.f32 %v3148_v44 }
 0x41c   : > { %v5666_v57 = vpop.eup %5665  ;;  %v3150_v4 = vpop.f32.mrf.mxu1  ;;  %v3324_v58 = vpack.c.bf16 %v5664_v20, %v5660_v52 }
 0x41d   : > { %v3151_v0 = vadd.f32 %v6895_v35, %v3150_v4  ;;  %v3325_v1 = vpack.c.bf16 %v5662_v46, %v5666_v57  ;;  %5669 = vtanh.f32 %v3159_v26 }
 0x41e   : > { %4852 = vmatprep.mubr.msk.bf16.mxu1 %vm3361_vm1, %v3324_v58 }
 0x41f   : > { %5671 = vtanh.f32 %v3151_v0  ;;  %4853 = vmatmul.mubr.msk.bf16.gmra.mxu1 %vm3361_vm1, %v3325_v1 }
 0x420   : > { %5673 = vtanh.f32 %v3156_v56 }
 0x428   : > { %v5668_v6 = vpop.eup %5667 }
 0x42a   : > { %v5670_v51 = vpop.eup %5669 }
 0x42c   : > { %v5672_v53 = vpop.eup %5671 }
 0x42d   : > { %v5674_v7 = vpop.eup %5673  ;;  %v3326_v62 = vpack.c.bf16 %v5672_v53, %v5668_v6 }
 0x42e   : > { %v4794_v63 = vpop.f32.mrf.mxu1  ;;  %v3327_v60 = vpack.c.bf16 %v5670_v51, %v5674_v7 }
 0x42f   : > { %4856 = vmatprep.mubr.msk.bf16.mxu1 %vm3361_vm1, %v3326_v62  ;;  %v3172_v11 = vadd.f32 %v4794_v63, %v6895_v35 }
 0x430   : > { %v3163_v61 = vpop.f32.mrf.mxu1  ;;  %4857 = vmatmul.mubr.msk.bf16.gmra.mxu1 %vm3361_vm1, %v3327_v60 }
 0x431   : > { %v3164_v13 = vadd.f32 %v6895_v35, %v3163_v61 }
 0x432   : > { %v4795_v15 = vpop.f32.mrf.mxu1 }
 0x433   : > { %v3175_v10 = vadd.f32 %v4795_v15, %v6895_v35  ;;  %5675 = vtanh.f32 %v3164_v13  ;;  %v7000_v13 = vld [vmem:[%s7314_s10] ss:$0 sm:$0xff] }
 0x434   : > { %v3166_v17 = vpop.f32.mrf.mxu1 }
 0x435   : > { %v3167_v8 = vadd.f32 %v6895_v35, %v3166_v17  ;;  %5677 = vtanh.f32 %v3175_v10 }
 0x437   : > { %5679 = vtanh.f32 %v3167_v8 }
 0x438   : > { %5681 = vtanh.f32 %v3172_v11 }
 0x440   : > { %v5676_v18 = vpop.eup %5675 }
 0x442   : > { %v5678_v21 = vpop.eup %5677 }
 0x444   : > { %v5680_v22 = vpop.eup %5679 }
 0x445   : > { %v5682_v23 = vpop.eup %5681  ;;  %v3328_v24 = vpack.c.bf16 %v5680_v22, %v5676_v18 }
 0x446   : > { %v4798_v19 = vpop.f32.mrf.mxu1  ;;  %v3329_v28 = vpack.c.bf16 %v5678_v21, %v5682_v23 }
 0x447   : > { %4860 = vmatprep.mubr.msk.bf16.mxu1 %vm3361_vm1, %v3328_v24  ;;  %v3188_v29 = vadd.f32 %v4798_v19, %v6895_v35 }
 0x448   : > { %v3179_v43 = vpop.f32.mrf.mxu1  ;;  %4861 = vmatmul.mubr.msk.bf16.gmra.mxu1 %vm3361_vm1, %v3329_v28 }
 0x449   : > { %v3180_v16 = vadd.f32 %v6895_v35, %v3179_v43 }
 0x44a   : > { %v4799_v54 = vpop.f32.mrf.mxu1 }
 0x44b   : > { %v3191_v14 = vadd.f32 %v4799_v54, %v6895_v35  ;;  %5683 = vtanh.f32 %v3180_v16 }
 0x44c   : > { %v3182_v36 = vpop.f32.mrf.mxu1 }
 0x44d   : > { %v3183_v31 = vadd.f32 %v6895_v35, %v3182_v36  ;;  %5685 = vtanh.f32 %v3191_v14 }
 0x44f   : > { %5687 = vtanh.f32 %v3183_v31 }
 0x450   : > { %5689 = vtanh.f32 %v3188_v29 }
 0x458   : > { %v5684_v25 = vpop.eup %5683 }
 0x45a   : > { %v5686_v32 = vpop.eup %5685 }
 0x45c   : > { %v5688_v3 = vpop.eup %5687 }
 0x45d   : > { %v5690_v33 = vpop.eup %5689  ;;  %v3330_v9 = vpack.c.bf16 %v5688_v3, %v5684_v25 }
 0x45e   : > { %v3331_v34 = vpack.c.bf16 %v5686_v32, %v5690_v33 }
 0x45f   : > { %v4802_v27 = vpop.f32.mrf.mxu1  ;;  %4864 = vmatprep.mubr.msk.bf16.mxu1 %vm3361_vm1, %v3330_v9 }
 0x460   : > { %4865 = vmatmul.mubr.msk.bf16.gmra.mxu1 %vm3361_vm1, %v3331_v34  ;;  %v3204_v38 = vadd.f32 %v4802_v27, %v6895_v35 }
 0x461   : > { %v3195_v5 = vpop.f32.mrf.mxu1 }
 0x462   : > { %v3196_v37 = vadd.f32 %v6895_v35, %v3195_v5 }
 0x463   : > { %v4803_v30 = vpop.f32.mrf.mxu1 }
 0x464   : > { %v3207_v39 = vadd.f32 %v4803_v30, %v6895_v35  ;;  %5691 = vtanh.f32 %v3196_v37 }
 0x465   : > { %v3198_v41 = vpop.f32.mrf.mxu1 }
 0x466   : > { %v3199_v12 = vadd.f32 %v6895_v35, %v3198_v41  ;;  %5693 = vtanh.f32 %v3207_v39 }
 0x468   : > { %5695 = vtanh.f32 %v3199_v12 }
 0x469   : > { %5697 = vtanh.f32 %v3204_v38 }
 0x471   : > { %v5692_v40 = vpop.eup %5691 }
 0x473   : > { %v5694_v42 = vpop.eup %5693 }
 0x475   : > { %v5696_v45 = vpop.eup %5695 }
 0x476   : > { %v5698_v47 = vpop.eup %5697  ;;  %v3332_v48 = vpack.c.bf16 %v5696_v45, %v5692_v40 }
 0x477   : > { %v4806_v49 = vpop.f32.mrf.mxu1  ;;  %v3333_v50 = vpack.c.bf16 %v5694_v42, %v5698_v47 }
 0x478   : > { %4868 = vmatprep.mubr.msk.bf16.mxu1 %vm3361_vm1, %v3332_v48  ;;  %v3220_v55 = vadd.f32 %v4806_v49, %v6895_v35 }
 0x479   : > { %v3211_v2 = vpop.f32.mrf.mxu1  ;;  %4869 = vmatmul.mubr.msk.bf16.gmra.mxu1 %vm3361_vm1, %v3333_v50 }
 0x47a   : > { %v3212_v52 = vadd.f32 %v6895_v35, %v3211_v2 }
 0x47b   : > { %v4807_v44 = vpop.f32.mrf.mxu1 }
 0x47c   : > { %v3223_v46 = vadd.f32 %v4807_v44, %v6895_v35  ;;  %5699 = vtanh.f32 %v3212_v52 }
 0x47d   : > { %v3214_v20 = vpop.f32.mrf.mxu1 }
 0x47e   : > { %v3215_v26 = vadd.f32 %v6895_v35, %v3214_v20  ;;  %5701 = vtanh.f32 %v3223_v46 }
 0x480   : > { %5703 = vtanh.f32 %v3215_v26 }
 0x481   : > { %5705 = vtanh.f32 %v3220_v55 }
 0x489   : > { %v5700_v57 = vpop.eup %5699 }
 0x48b   : > { %v5702_v56 = vpop.eup %5701 }
 0x48d   : > { %v5704_v4 = vpop.eup %5703 }
 0x48e   : > { %v5706_v58 = vpop.eup %5705  ;;  %v3334_v59 = vpack.c.bf16 %v5704_v4, %v5700_v57 }
 0x48f   : > { %v3335_v0 = vpack.c.bf16 %v5702_v56, %v5706_v58  ;;  %v4810_v1 = vpop.f32.mrf.mxu1 }
 0x490   : > { %4872 = vmatprep.mubr.msk.bf16.mxu1 %vm3361_vm1, %v3334_v59  ;;  %v3236_v62 = vadd.f32 %v4810_v1, %v6895_v35 }
 0x491   : > { %4873 = vmatmul.mubr.msk.bf16.gmra.mxu1 %vm3361_vm1, %v3335_v0  ;;  %v3227_v6 = vpop.f32.mrf.mxu1 }
 0x492   : > { %v3228_v51 = vadd.f32 %v6895_v35, %v3227_v6 }
 0x493   : > { %v4811_v53 = vpop.f32.mrf.mxu1 }
 0x494   : > { %v3239_v7 = vadd.f32 %v4811_v53, %v6895_v35  ;;  %5707 = vtanh.f32 %v3228_v51 }
 0x495   : > { %v3230_v63 = vpop.f32.mrf.mxu1 }
 0x496   : > { %v3231_v60 = vadd.f32 %v6895_v35, %v3230_v63  ;;  %5709 = vtanh.f32 %v3239_v7 }
 0x497   : > { %v4818_v61 = vpop.f32.mrf.mxu1 }
 0x498   : > { %5711 = vtanh.f32 %v3231_v60  ;;  %v3501_v8 = vadd.f32 %v4818_v61, %v7000_v13 }
 0x499   : > { %5713 = vtanh.f32 %v3236_v62  ;;  %v3492_v15 = vpop.f32.mrf.mxu1 }
 0x49a   : > { %v3493_v10 = vadd.f32 %v7000_v13, %v3492_v15 }
 0x49b   : > { %v4819_v11 = vpop.f32.mrf.mxu1 }
 0x49c   : > { %v3504_v17 = vadd.f32 %v4819_v11, %v7000_v13  ;;  %5715 = vtanh.f32 %v3493_v10 }
 0x49d   : > { %v3495_v18 = vpop.f32.mrf.mxu1 }
 0x49e   : > { %v3496_v35 = vadd.f32 %v7000_v13, %v3495_v18  ;;  %5717 = vtanh.f32 %v3504_v17 }
 0x49f   : > { %v4822_v21 = vpop.f32.mrf.mxu1 }
 0x4a0   : > { %5719 = vtanh.f32 %v3496_v35  ;;  %v3517_v54 = vadd.f32 %v4822_v21, %v7000_v13 }
 0x4a1   : > { %5721 = vtanh.f32 %v3501_v8  ;;  %v3508_v22 = vpop.f32.mrf.mxu1  ;;  %v5708_v24 = vpop.eup %5707 }
 0x4a2   : > { %v3509_v23 = vadd.f32 %v7000_v13, %v3508_v22 }
 0x4a3   : > { %v4823_v19 = vpop.f32.mrf.mxu1  ;;  %v5710_v28 = vpop.eup %5709 }
 0x4a4   : > { %v3520_v43 = vadd.f32 %v4823_v19, %v7000_v13  ;;  %5723 = vtanh.f32 %v3509_v23 }
 0x4a5   : > { %v5712_v16 = vpop.eup %5711  ;;  %v3511_v14 = vpop.f32.mrf.mxu1 }
 0x4a6   : > { %v5714_v29 = vpop.eup %5713  ;;  %v3512_v36 = vadd.f32 %v7000_v13, %v3511_v14  ;;  %v3336_v31 = vpack.c.bf16 %v5712_v16, %v5708_v24  ;;  %5725 = vtanh.f32 %v3520_v43 }
 0x4a7   : > { %v4826_v25 = vpop.f32.mrf.mxu1  ;;  %v3337_v32 = vpack.c.bf16 %v5710_v28, %v5714_v29 }
 0x4a8   : > { %5727 = vtanh.f32 %v3512_v36  ;;  %4876 = vmatprep.mubr.msk.bf16.mxu1 %vm3361_vm1, %v3336_v31  ;;  %v3533_v30 = vadd.f32 %v4826_v25, %v7000_v13 }
 0x4a9   : > { %5729 = vtanh.f32 %v3517_v54  ;;  %v3524_v3 = vpop.f32.mrf.mxu1  ;;  %4877 = vmatmul.mubr.msk.bf16.gmra.mxu1 %vm3361_vm1, %v3337_v32  ;;  %v5716_v9 = vpop.eup %5715 }
 0x4aa   : > { %v3525_v33 = vadd.f32 %v7000_v13, %v3524_v3 }
 0x4ab   : > { %v4827_v27 = vpop.f32.mrf.mxu1  ;;  %v5718_v34 = vpop.eup %5717 }
 0x4ac   : > { %v3536_v5 = vadd.f32 %v4827_v27, %v7000_v13  ;;  %5731 = vtanh.f32 %v3525_v33 }
 0x4ad   : > { %v5720_v37 = vpop.eup %5719  ;;  %v3527_v39 = vpop.f32.mrf.mxu1 }
 0x4ae   : > { %v5722_v38 = vpop.eup %5721  ;;  %v3528_v41 = vadd.f32 %v7000_v13, %v3527_v39  ;;  %v3811_v12 = vpack.c.bf16 %v5720_v37, %v5716_v9  ;;  %5733 = vtanh.f32 %v3536_v5 }
 0x4af   : > { %v3812_v40 = vpack.c.bf16 %v5718_v34, %v5722_v38  ;;  %v4830_v42 = vpop.f32.mrf.mxu1 }
 0x4b0   : > { %5735 = vtanh.f32 %v3528_v41  ;;  %4884 = vmatprep.mubr.msk.bf16.mxu0 %vm3361_vm1, %v3811_v12  ;;  %v3549_v44 = vadd.f32 %v4830_v42, %v7000_v13 }
 0x4b1   : > { %5737 = vtanh.f32 %v3533_v30  ;;  %v3540_v45 = vpop.f32.mrf.mxu1  ;;  %4885 = vmatmul.mubr.msk.bf16.vlgmr.msra.gmra.mxu0 %vm3361_vm1, %v3812_v40  ;;  %v5724_v48 = vpop.eup %5723 }
 0x4b2   : > { %v3541_v47 = vadd.f32 %v7000_v13, %v3540_v45 }
 0x4b3   : > { %v4831_v49 = vpop.f32.mrf.mxu1  ;;  %v5726_v50 = vpop.eup %5725 }
 0x4b4   : > { %v3552_v2 = vadd.f32 %v4831_v49, %v7000_v13  ;;  %5739 = vtanh.f32 %v3541_v47 }
 0x4b5   : > { %v5728_v52 = vpop.eup %5727  ;;  %v3543_v46 = vpop.f32.mrf.mxu1 }
 0x4b6   : > { %v5730_v55 = vpop.eup %5729  ;;  %v3544_v20 = vadd.f32 %v7000_v13, %v3543_v46  ;;  %v3813_v26 = vpack.c.bf16 %v5728_v52, %v5724_v48  ;;  %5741 = vtanh.f32 %v3552_v2 }
 0x4b7   : > { %v4834_v57 = vpop.f32.mrf.mxu1  ;;  %v3814_v56 = vpack.c.bf16 %v5726_v50, %v5730_v55 }
 0x4b8   : > { %5743 = vtanh.f32 %v3544_v20  ;;  %4888 = vmatprep.mubr.msk.bf16.mxu0 %vm3361_vm1, %v3813_v26  ;;  %v3565_v53 = vadd.f32 %v4834_v57, %v7000_v13 }
 0x4b9   : > { %5745 = vtanh.f32 %v3549_v44  ;;  %v3556_v4 = vpop.f32.mrf.mxu1  ;;  %4889 = vmatmul.mubr.msk.bf16.gmra.mxu0 %vm3361_vm1, %v3814_v56  ;;  %v5732_v59 = vpop.eup %5731 }
 0x4ba   : > { %v3557_v58 = vadd.f32 %v7000_v13, %v3556_v4 }
 0x4bb   : > { %v4835_v0 = vpop.f32.mrf.mxu1  ;;  %v5734_v1 = vpop.eup %5733 }
 0x4bc   : > { %v3568_v6 = vadd.f32 %v4835_v0, %v7000_v13  ;;  %5747 = vtanh.f32 %v3557_v58 }
 0x4bd   : > { %v5736_v51 = vpop.eup %5735  ;;  %v3559_v7 = vpop.f32.mrf.mxu1 }
 0x4be   : > { %v5738_v62 = vpop.eup %5737  ;;  %v3560_v63 = vadd.f32 %v7000_v13, %v3559_v7  ;;  %v3815_v60 = vpack.c.bf16 %v5736_v51, %v5732_v59  ;;  %5749 = vtanh.f32 %v3568_v6 }
 0x4bf   : > { %v4838_v61 = vpop.f32.mrf.mxu1  ;;  %v3816_v15 = vpack.c.bf16 %v5734_v1, %v5738_v62 }
 0x4c0   : > { %5751 = vtanh.f32 %v3560_v63  ;;  %4892 = vmatprep.mubr.msk.bf16.mxu0 %vm3361_vm1, %v3815_v60  ;;  %v3581_v22 = vadd.f32 %v4838_v61, %v7000_v13 }
 0x4c1   : > { %5753 = vtanh.f32 %v3565_v53  ;;  %v3572_v10 = vpop.f32.mrf.mxu1  ;;  %4893 = vmatmul.mubr.msk.bf16.gmra.mxu0 %vm3361_vm1, %v3816_v15  ;;  %v5740_v17 = vpop.eup %5739 }
 0x4c2   : > { %v3573_v11 = vadd.f32 %v7000_v13, %v3572_v10 }
 0x4c3   : > { %v4839_v8 = vpop.f32.mrf.mxu1  ;;  %v5742_v18 = vpop.eup %5741 }
 0x4c4   : > { %v3584_v35 = vadd.f32 %v4839_v8, %v7000_v13  ;;  %5755 = vtanh.f32 %v3573_v11 }
 0x4c5   : > { %v5744_v21 = vpop.eup %5743  ;;  %v3575_v23 = vpop.f32.mrf.mxu1 }
 0x4c6   : > { %v5746_v24 = vpop.eup %5745  ;;  %v3576_v19 = vadd.f32 %v7000_v13, %v3575_v23  ;;  %v3817_v28 = vpack.c.bf16 %v5744_v21, %v5740_v17  ;;  %5757 = vtanh.f32 %v3584_v35 }
 0x4c7   : > { %v4842_v43 = vpop.f32.mrf.mxu1  ;;  %v3818_v16 = vpack.c.bf16 %v5742_v18, %v5746_v24 }
 0x4c8   : > { %5759 = vtanh.f32 %v3576_v19  ;;  %4896 = vmatprep.mubr.msk.bf16.mxu0 %vm3361_vm1, %v3817_v28  ;;  %v3597_v3 = vadd.f32 %v4842_v43, %v7000_v13 }
 0x4c9   : > { %5761 = vtanh.f32 %v3581_v22  ;;  %v3588_v54 = vpop.f32.mrf.mxu1  ;;  %4897 = vmatmul.mubr.msk.bf16.gmra.mxu0 %vm3361_vm1, %v3818_v16  ;;  %v5748_v29 = vpop.eup %5747 }
 0x4ca   : > { %v3589_v14 = vadd.f32 %v7000_v13, %v3588_v54 }
 0x4cb   : > { %v4843_v36 = vpop.f32.mrf.mxu1  ;;  %v5750_v31 = vpop.eup %5749 }
 0x4cc   : > { %v3600_v25 = vadd.f32 %v4843_v36, %v7000_v13  ;;  %5763 = vtanh.f32 %v3589_v14 }
 0x4cd   : > { %v5752_v32 = vpop.eup %5751  ;;  %v3591_v33 = vpop.f32.mrf.mxu1 }
 0x4ce   : > { %v5754_v9 = vpop.eup %5753  ;;  %v3592_v27 = vadd.f32 %v7000_v13, %v3591_v33  ;;  %v3819_v34 = vpack.c.bf16 %v5752_v32, %v5748_v29  ;;  %5765 = vtanh.f32 %v3600_v25 }
 0x4cf   : > { %v4846_v5 = vpop.f32.mrf.mxu1  ;;  %v3820_v37 = vpack.c.bf16 %v5750_v31, %v5754_v9 }
 0x4d0   : > { %5767 = vtanh.f32 %v3592_v27  ;;  %4900 = vmatprep.mubr.msk.bf16.mxu0 %vm3361_vm1, %v3819_v34  ;;  %v3613_v45 = vadd.f32 %v4846_v5, %v7000_v13 }
 0x4d1   : > { %5769 = vtanh.f32 %v3597_v3  ;;  %v3604_v30 = vpop.f32.mrf.mxu1  ;;  %4901 = vmatmul.mubr.msk.bf16.gmra.mxu0 %vm3361_vm1, %v3820_v37  ;;  %v5756_v38 = vpop.eup %5755 }
 0x4d2   : > { %v3605_v39 = vadd.f32 %v7000_v13, %v3604_v30 }
 0x4d3   : > { %v4847_v41 = vpop.f32.mrf.mxu1  ;;  %v5758_v12 = vpop.eup %5757 }
 0x4d4   : > { %v3616_v40 = vadd.f32 %v4847_v41, %v7000_v13  ;;  %5771 = vtanh.f32 %v3605_v39 }
 0x4d5   : > { %v5760_v42 = vpop.eup %5759  ;;  %v3607_v47 = vpop.f32.mrf.mxu1 }
 0x4d6   : > { %v5762_v48 = vpop.eup %5761  ;;  %v3608_v49 = vadd.f32 %v7000_v13, %v3607_v47  ;;  %v3821_v50 = vpack.c.bf16 %v5760_v42, %v5756_v38  ;;  %5773 = vtanh.f32 %v3616_v40 }
 0x4d7   : > { %v4850_v2 = vpop.f32.mrf.mxu1  ;;  %v3822_v52 = vpack.c.bf16 %v5758_v12, %v5762_v48 }
 0x4d8   : > { %5775 = vtanh.f32 %v3608_v49  ;;  %4904 = vmatprep.mubr.msk.bf16.mxu0 %vm3361_vm1, %v3821_v50  ;;  %v3629_v4 = vadd.f32 %v4850_v2, %v7000_v13 }
 0x4d9   : > { %5777 = vtanh.f32 %v3613_v45  ;;  %v3620_v44 = vpop.f32.mrf.mxu1  ;;  %4905 = vmatmul.mubr.msk.bf16.gmra.mxu0 %vm3361_vm1, %v3822_v52  ;;  %v5764_v55 = vpop.eup %5763 }
 0x4da   : > { %v3621_v46 = vadd.f32 %v7000_v13, %v3620_v44 }
 0x4db   : > { %v4851_v20 = vpop.f32.mrf.mxu1  ;;  %v5766_v26 = vpop.eup %5765 }
 0x4dc   : > { %v3632_v57 = vadd.f32 %v4851_v20, %v7000_v13  ;;  %5779 = vtanh.f32 %v3621_v46 }
 0x4dd   : > { %v5768_v56 = vpop.eup %5767  ;;  %v3623_v58 = vpop.f32.mrf.mxu1 }
 0x4de   : > { %v5770_v59 = vpop.eup %5769  ;;  %v3624_v0 = vadd.f32 %v7000_v13, %v3623_v58  ;;  %v3823_v1 = vpack.c.bf16 %v5768_v56, %v5764_v55  ;;  %5781 = vtanh.f32 %v3632_v57 }
 0x4df   : > { %v4854_v6 = vpop.f32.mrf.mxu1  ;;  %v3824_v51 = vpack.c.bf16 %v5766_v26, %v5770_v59 }
 0x4e0   : > { %5783 = vtanh.f32 %v3624_v0  ;;  %4908 = vmatprep.mubr.msk.bf16.mxu0 %vm3361_vm1, %v3823_v1  ;;  %v3645_v10 = vadd.f32 %v4854_v6, %v7000_v13 }
 0x4e1   : > { %5785 = vtanh.f32 %v3629_v4  ;;  %v3636_v53 = vpop.f32.mrf.mxu1  ;;  %4909 = vmatmul.mubr.msk.bf16.gmra.mxu0 %vm3361_vm1, %v3824_v51  ;;  %v5772_v62 = vpop.eup %5771 }
 0x4e2   : > { %v3637_v7 = vadd.f32 %v7000_v13, %v3636_v53 }
 0x4e3   : > { %v4855_v63 = vpop.f32.mrf.mxu1  ;;  %v5774_v60 = vpop.eup %5773 }
 0x4e4   : > { %v3648_v61 = vadd.f32 %v4855_v63, %v7000_v13  ;;  %5787 = vtanh.f32 %v3637_v7 }
 0x4e5   : > { %v5776_v15 = vpop.eup %5775  ;;  %v3639_v11 = vpop.f32.mrf.mxu1 }
 0x4e6   : > { %v5778_v17 = vpop.eup %5777  ;;  %v3640_v8 = vadd.f32 %v7000_v13, %v3639_v11  ;;  %v3825_v18 = vpack.c.bf16 %v5776_v15, %v5772_v62  ;;  %5789 = vtanh.f32 %v3648_v61 }
 0x4e7   : > { %v3826_v35 = vpack.c.bf16 %v5774_v60, %v5778_v17 }
 0x4e8   : > { %5791 = vtanh.f32 %v3640_v8  ;;  %4912 = vmatprep.mubr.msk.bf16.mxu0 %vm3361_vm1, %v3825_v18 }
 0x4e9   : > { %5793 = vtanh.f32 %v3645_v10  ;;  %4913 = vmatmul.mubr.msk.bf16.gmra.mxu0 %vm3361_vm1, %v3826_v35  ;;  %v5780_v21 = vpop.eup %5779 }
 0x4eb   : > { %v5782_v22 = vpop.eup %5781 }
 0x4ed   : > { %v5784_v23 = vpop.eup %5783 }
 0x4ee   : > { %v5786_v24 = vpop.eup %5785  ;;  %v3827_v19 = vpack.c.bf16 %v5784_v23, %v5780_v21 }
 0x4ef   : > { %v3828_v28 = vpack.c.bf16 %v5782_v22, %v5786_v24 }
 0x4f0   : > { %4916 = vmatprep.mubr.msk.bf16.mxu0 %vm3361_vm1, %v3827_v19  ;;  %v4858_v43 = vpop.f32.mrf.mxu1 }
 0x4f1   : > { %4917 = vmatmul.mubr.msk.bf16.gmra.mxu0 %vm3361_vm1, %v3828_v28  ;;  %v5788_v54 = vpop.eup %5787  ;;  %v3661_v3 = vadd.f32 %v4858_v43, %v7000_v13 }
 0x4f2   : > { %v3652_v16 = vpop.f32.mrf.mxu1 }
 0x4f3   : > { %v3653_v14 = vadd.f32 %v7000_v13, %v3652_v16  ;;  %v5790_v29 = vpop.eup %5789 }
 0x4f4   : > { %v4859_v36 = vpop.f32.mrf.mxu1 }
 0x4f5   : > { %v5792_v31 = vpop.eup %5791  ;;  %v3664_v25 = vadd.f32 %v4859_v36, %v7000_v13  ;;  %5795 = vtanh.f32 %v3653_v14 }
 0x4f6   : > { %v5794_v32 = vpop.eup %5793  ;;  %v3655_v33 = vpop.f32.mrf.mxu1  ;;  %v3829_v9 = vpack.c.bf16 %v5792_v31, %v5788_v54 }
 0x4f7   : > { %v3656_v27 = vadd.f32 %v7000_v13, %v3655_v33  ;;  %v3830_v34 = vpack.c.bf16 %v5790_v29, %v5794_v32  ;;  %5797 = vtanh.f32 %v3664_v25 }
 0x4f8   : > { %4920 = vmatprep.mubr.msk.bf16.mxu0 %vm3361_vm1, %v3829_v9 }
 0x4f9   : > { %5799 = vtanh.f32 %v3656_v27  ;;  %4921 = vmatmul.mubr.msk.bf16.gmra.mxu0 %vm3361_vm1, %v3830_v34 }
 0x4fa   : > { %5801 = vtanh.f32 %v3661_v3 }
 0x502   : > { %v5796_v5 = vpop.eup %5795 }
 0x504   : > { %v5798_v37 = vpop.eup %5797 }
 0x506   : > { %v5800_v30 = vpop.eup %5799 }
 0x507   : > { %v5802_v39 = vpop.eup %5801  ;;  %v3831_v38 = vpack.c.bf16 %v5800_v30, %v5796_v5 }
 0x508   : > { %v4862_v41 = vpop.f32.mrf.mxu1  ;;  %v3832_v12 = vpack.c.bf16 %v5798_v37, %v5802_v39 }
 0x509   : > { %4924 = vmatprep.mubr.msk.bf16.mxu0 %vm3361_vm1, %v3831_v38  ;;  %v3677_v48 = vadd.f32 %v4862_v41, %v7000_v13 }
 0x50a   : > { %v3668_v40 = vpop.f32.mrf.mxu1  ;;  %4925 = vmatmul.mubr.msk.bf16.gmra.mxu0 %vm3361_vm1, %v3832_v12  ;;  %v7097_v12 = vld [vmem:[#allocation2] ss:$0 sm:$0xff] }
 0x50b   : > { %v3669_v42 = vadd.f32 %v7000_v13, %v3668_v40 }
 0x50c   : > { %v4863_v45 = vpop.f32.mrf.mxu1 }
 0x50d   : > { %v3680_v47 = vadd.f32 %v4863_v45, %v7000_v13  ;;  %5803 = vtanh.f32 %v3669_v42 }
 0x50e   : > { %v3671_v49 = vpop.f32.mrf.mxu1 }
 0x50f   : > { %v3672_v50 = vadd.f32 %v7000_v13, %v3671_v49  ;;  %5805 = vtanh.f32 %v3680_v47 }
 0x511   : > { %5807 = vtanh.f32 %v3672_v50 }
 0x512   : > { %5809 = vtanh.f32 %v3677_v48 }
 0x51a   : > { %v5804_v2 = vpop.eup %5803 }
 0x51c   : > { %v5806_v52 = vpop.eup %5805 }
 0x51e   : > { %v5808_v44 = vpop.eup %5807 }
 0x51f   : > { %v5810_v46 = vpop.eup %5809  ;;  %v3833_v55 = vpack.c.bf16 %v5808_v44, %v5804_v2 }
 0x520   : > { %v4866_v20 = vpop.f32.mrf.mxu1  ;;  %v3834_v26 = vpack.c.bf16 %v5806_v52, %v5810_v46 }
 0x521   : > { %4928 = vmatprep.mubr.msk.bf16.mxu0 %vm3361_vm1, %v3833_v55  ;;  %v3693_v59 = vadd.f32 %v4866_v20, %v7000_v13 }
 0x522   : > { %v3684_v57 = vpop.f32.mrf.mxu1  ;;  %4929 = vmatmul.mubr.msk.bf16.gmra.mxu0 %vm3361_vm1, %v3834_v26 }
 0x523   : > { %v3685_v56 = vadd.f32 %v7000_v13, %v3684_v57 }
 0x524   : > { %v4867_v4 = vpop.f32.mrf.mxu1 }
 0x525   : > { %v3696_v58 = vadd.f32 %v4867_v4, %v7000_v13  ;;  %5811 = vtanh.f32 %v3685_v56 }
 0x526   : > { %v3687_v0 = vpop.f32.mrf.mxu1 }
 0x527   : > { %v3688_v1 = vadd.f32 %v7000_v13, %v3687_v0  ;;  %5813 = vtanh.f32 %v3696_v58 }
 0x529   : > { %5815 = vtanh.f32 %v3688_v1 }
 0x52a   : > { %5817 = vtanh.f32 %v3693_v59 }
 0x532   : > { %v5812_v6 = vpop.eup %5811 }
 0x534   : > { %v5814_v51 = vpop.eup %5813 }
 0x536   : > { %v5816_v53 = vpop.eup %5815 }
 0x537   : > { %v5818_v7 = vpop.eup %5817  ;;  %v3835_v62 = vpack.c.bf16 %v5816_v53, %v5812_v6 }
 0x538   : > { %v3836_v60 = vpack.c.bf16 %v5814_v51, %v5818_v7 }
 0x539   : > { %v4870_v63 = vpop.f32.mrf.mxu1  ;;  %4932 = vmatprep.mubr.msk.bf16.mxu0 %vm3361_vm1, %v3835_v62 }
 0x53a   : > { %4933 = vmatmul.mubr.msk.bf16.gmra.mxu0 %vm3361_vm1, %v3836_v60  ;;  %v3709_v17 = vadd.f32 %v4870_v63, %v7000_v13 }
 0x53b   : > { %v3700_v61 = vpop.f32.mrf.mxu1 }
 0x53c   : > { %v3701_v15 = vadd.f32 %v7000_v13, %v3700_v61 }
 0x53d   : > { %v4871_v10 = vpop.f32.mrf.mxu1 }
 0x53e   : > { %v3712_v11 = vadd.f32 %v4871_v10, %v7000_v13  ;;  %5819 = vtanh.f32 %v3701_v15 }
 0x53f   : > { %v3703_v8 = vpop.f32.mrf.mxu1 }
 0x540   : > { %v3704_v18 = vadd.f32 %v7000_v13, %v3703_v8  ;;  %5821 = vtanh.f32 %v3712_v11 }
 0x542   : > { %5823 = vtanh.f32 %v3704_v18 }
 0x543   : > { %5825 = vtanh.f32 %v3709_v17 }
 0x54b   : > { %v5820_v35 = vpop.eup %5819 }
 0x54d   : > { %v5822_v21 = vpop.eup %5821 }
 0x54f   : > { %v5824_v22 = vpop.eup %5823 }
 0x550   : > { %v5826_v23 = vpop.eup %5825  ;;  %v3837_v24 = vpack.c.bf16 %v5824_v22, %v5820_v35 }
 0x551   : > { %v4874_v19 = vpop.f32.mrf.mxu1  ;;  %v3838_v28 = vpack.c.bf16 %v5822_v21, %v5826_v23 }
 0x552   : > { %4936 = vmatprep.mubr.msk.bf16.mxu0 %vm3361_vm1, %v3837_v24  ;;  %v3725_v29 = vadd.f32 %v4874_v19, %v7000_v13 }
 0x553   : > { %v3716_v43 = vpop.f32.mrf.mxu1  ;;  %4937 = vmatmul.mubr.msk.bf16.gmra.mxu0 %vm3361_vm1, %v3838_v28 }
 0x554   : > { %v3717_v16 = vadd.f32 %v7000_v13, %v3716_v43 }
 0x555   : > { %v4875_v54 = vpop.f32.mrf.mxu1 }
 0x556   : > { %v3728_v14 = vadd.f32 %v4875_v54, %v7000_v13  ;;  %5827 = vtanh.f32 %v3717_v16 }
 0x557   : > { %v3719_v36 = vpop.f32.mrf.mxu1 }
 0x558   : > { %v3720_v31 = vadd.f32 %v7000_v13, %v3719_v36  ;;  %5829 = vtanh.f32 %v3728_v14 }
 0x55a   : > { %5831 = vtanh.f32 %v3720_v31 }
 0x55b   : > { %5833 = vtanh.f32 %v3725_v29 }
 0x563   : > { %v5828_v25 = vpop.eup %5827 }
 0x565   : > { %v5830_v32 = vpop.eup %5829 }
 0x567   : > { %v5832_v3 = vpop.eup %5831 }
 0x568   : > { %v5834_v33 = vpop.eup %5833  ;;  %v3839_v9 = vpack.c.bf16 %v5832_v3, %v5828_v25 }
 0x569   : > { %v3840_v27 = vpack.c.bf16 %v5830_v32, %v5834_v33  ;;  %v4878_v34 = vpop.f32.mrf.mxu1 }
 0x56a   : > { %4940 = vmatprep.mubr.msk.bf16.mxu1 %vm3361_vm1, %v3839_v9  ;;  %v3741_v38 = vadd.f32 %v4878_v34, %v7000_v13 }
 0x56b   : > { %4941 = vmatmul.mubr.msk.bf16.vlgmr.msra.gmra.mxu1 %vm3361_vm1, %v3840_v27  ;;  %v3732_v5 = vpop.f32.mrf.mxu1 }
 0x56c   : > { %v3733_v37 = vadd.f32 %v7000_v13, %v3732_v5 }
 0x56d   : > { %v4879_v30 = vpop.f32.mrf.mxu1 }
 0x56e   : > { %v3744_v39 = vadd.f32 %v4879_v30, %v7000_v13  ;;  %5835 = vtanh.f32 %v3733_v37 }
 0x56f   : > { %v3735_v41 = vpop.f32.mrf.mxu1 }
 0x570   : > { %v3736_v40 = vadd.f32 %v7000_v13, %v3735_v41  ;;  %5837 = vtanh.f32 %v3744_v39 }
 0x571   : > { %v4886_v42 = vpop.f32.mrf.mxu0 }
 0x572   : > { %5839 = vtanh.f32 %v3736_v40  ;;  %v4005_v45 = vadd.f32 %v4886_v42, %v7097_v12 }
 0x573   : > { %5841 = vtanh.f32 %v3741_v38  ;;  %v3996_v47 = vpop.f32.mrf.mxu0 }
 0x574   : > { %4254 = vst.msk [vmem:[%s7105_s24 + $0x10] sm:$0xff] %vm4251_vm2, %v4005_v45  ;;  %v3997_v13 = vadd.f32 %v7097_v12, %v3996_v47 }
 0x575   : > { %v4887_v48 = vpop.f32.mrf.mxu0 }
 0x576   : > { %4252 = vst.msk [vmem:[%s7105_s24] sm:$0xff] %vm4251_vm2, %v3997_v13  ;;  %v4008_v49 = vadd.f32 %v4887_v48, %v7097_v12 }
 0x577   : > { %v3999_v50 = vpop.f32.mrf.mxu0 }
 0x578   : > { %4255 = vst.msk [vmem:[%s7105_s24 + $0x18] sm:$0xff] %vm4251_vm2, %v4008_v49  ;;  %v4000_v2 = vadd.f32 %v7097_v12, %v3999_v50 }
 0x579   : > { %v4890_v52 = vpop.f32.mrf.mxu0 }
 0x57a   : > { %4253 = vst.msk [vmem:[%s7105_s24 + $0x8] sm:$0xff] %vm4251_vm2, %v4000_v2  ;;  %v4021_v44 = vadd.f32 %v4890_v52, %v7097_v12 }
 0x57b   : > { %v4012_v46 = vpop.f32.mrf.mxu0  ;;  %v5836_v20 = vpop.eup %5835 }
 0x57c   : > { %4258 = vst.msk [vmem:[%s7105_s24 + $0x30] sm:$0xff] %vm4251_vm2, %v4021_v44  ;;  %v4013_v55 = vadd.f32 %v7097_v12, %v4012_v46 }
 0x57d   : > { %v4891_v26 = vpop.f32.mrf.mxu0  ;;  %v5838_v57 = vpop.eup %5837 }
 0x57e   : > { %4256 = vst.msk [vmem:[%s7105_s24 + $0x20] sm:$0xff] %vm4251_vm2, %v4013_v55  ;;  %v4024_v56 = vadd.f32 %v4891_v26, %v7097_v12 }
 0x57f   : > { %v5840_v4 = vpop.eup %5839  ;;  %v4015_v58 = vpop.f32.mrf.mxu0 }
 0x580   : > { %v5842_v59 = vpop.eup %5841  ;;  %4259 = vst.msk [vmem:[%s7105_s24 + $0x38] sm:$0xff] %vm4251_vm2, %v4024_v56  ;;  %v4016_v0 = vadd.f32 %v7097_v12, %v4015_v58  ;;  %v3841_v1 = vpack.c.bf16 %v5840_v4, %v5836_v20 }
 0x581   : > { %v4894_v6 = vpop.f32.mrf.mxu0  ;;  %v3842_v51 = vpack.c.bf16 %v5838_v57, %v5842_v59 }
 0x582   : > { %4257 = vst.msk [vmem:[%s7105_s24 + $0x28] sm:$0xff] %vm4251_vm2, %v4016_v0  ;;  %v4037_v53 = vadd.f32 %v4894_v6, %v7097_v12  ;;  %4944 = vmatprep.mubr.msk.bf16.mxu1 %vm3361_vm1, %v3841_v1 }
 0x583   : > { %v4028_v7 = vpop.f32.mrf.mxu0  ;;  %4945 = vmatmul.mubr.msk.bf16.gmra.mxu1 %vm3361_vm1, %v3842_v51 }
 0x584   : > { %4262 = vst.msk [vmem:[%s7105_s24 + $0x50] sm:$0xff] %vm4251_vm2, %v4037_v53  ;;  %v4029_v62 = vadd.f32 %v7097_v12, %v4028_v7 }
 0x585   : > { %v4895_v63 = vpop.f32.mrf.mxu0 }
 0x586   : > { %4260 = vst.msk [vmem:[%s7105_s24 + $0x40] sm:$0xff] %vm4251_vm2, %v4029_v62  ;;  %v4040_v60 = vadd.f32 %v4895_v63, %v7097_v12 }
 0x587   : > { %v4031_v61 = vpop.f32.mrf.mxu0 }
 0x588   : > { %4263 = vst.msk [vmem:[%s7105_s24 + $0x58] sm:$0xff] %vm4251_vm2, %v4040_v60  ;;  %v4032_v15 = vadd.f32 %v7097_v12, %v4031_v61 }
 0x589   : > { %v4898_v10 = vpop.f32.mrf.mxu0 }
 0x58a   : > { %4261 = vst.msk [vmem:[%s7105_s24 + $0x48] sm:$0xff] %vm4251_vm2, %v4032_v15  ;;  %v4053_v11 = vadd.f32 %v4898_v10, %v7097_v12 }
 0x58b   : > { %v4044_v17 = vpop.f32.mrf.mxu0 }
 0x58c   : > { %4266 = vst.msk [vmem:[%s7105_s24 + $0x70] sm:$0xff] %vm4251_vm2, %v4053_v11  ;;  %v4045_v8 = vadd.f32 %v7097_v12, %v4044_v17 }
 0x58d   : > { %v4899_v18 = vpop.f32.mrf.mxu0 }
 0x58e   : > { %4264 = vst.msk [vmem:[%s7105_s24 + $0x60] sm:$0xff] %vm4251_vm2, %v4045_v8  ;;  %v4056_v35 = vadd.f32 %v4899_v18, %v7097_v12 }
 0x58f   : > { %v4047_v21 = vpop.f32.mrf.mxu0 }
 0x590   : > { %4267 = vst.msk [vmem:[%s7105_s24 + $0x78] sm:$0xff] %vm4251_vm2, %v4056_v35  ;;  %v4048_v22 = vadd.f32 %v7097_v12, %v4047_v21 }
 0x591   : > { %v4902_v23 = vpop.f32.mrf.mxu0 }
 0x592   : > { %4265 = vst.msk [vmem:[%s7105_s24 + $0x68] sm:$0xff] %vm4251_vm2, %v4048_v22  ;;  %v4069_v24 = vadd.f32 %v4902_v23, %v7097_v12 }
 0x593   : > { %v4060_v19 = vpop.f32.mrf.mxu0 }
 0x594   : > { %4270 = vst.msk [vmem:[%s7105_s24 + $0x90] sm:$0xff] %vm4251_vm2, %v4069_v24  ;;  %v4061_v28 = vadd.f32 %v7097_v12, %v4060_v19 }
 0x595   : > { %v4903_v43 = vpop.f32.mrf.mxu0 }
 0x596   : > { %4268 = vst.msk [vmem:[%s7105_s24 + $0x80] sm:$0xff] %vm4251_vm2, %v4061_v28  ;;  %v4072_v16 = vadd.f32 %v4903_v43, %v7097_v12 }
 0x597   : > { %v4063_v54 = vpop.f32.mrf.mxu0 }
 0x598   : > { %4271 = vst.msk [vmem:[%s7105_s24 + $0x98] sm:$0xff] %vm4251_vm2, %v4072_v16  ;;  %v4064_v14 = vadd.f32 %v7097_v12, %v4063_v54 }
 0x599   : > { %v4906_v29 = vpop.f32.mrf.mxu0 }
 0x59a   : > { %4269 = vst.msk [vmem:[%s7105_s24 + $0x88] sm:$0xff] %vm4251_vm2, %v4064_v14  ;;  %v4085_v36 = vadd.f32 %v4906_v29, %v7097_v12 }
 0x59b   : > { %v4076_v31 = vpop.f32.mrf.mxu0 }
 0x59c   : > { %4274 = vst.msk [vmem:[%s7105_s24 + $0xb0] sm:$0xff] %vm4251_vm2, %v4085_v36  ;;  %v4077_v25 = vadd.f32 %v7097_v12, %v4076_v31 }
 0x59d   : > { %v4907_v32 = vpop.f32.mrf.mxu0 }
 0x59e   : > { %4272 = vst.msk [vmem:[%s7105_s24 + $0xa0] sm:$0xff] %vm4251_vm2, %v4077_v25  ;;  %v4088_v3 = vadd.f32 %v4907_v32, %v7097_v12 }
 0x59f   : > { %v4079_v33 = vpop.f32.mrf.mxu0 }
 0x5a0   : > { %4275 = vst.msk [vmem:[%s7105_s24 + $0xb8] sm:$0xff] %vm4251_vm2, %v4088_v3  ;;  %v4080_v9 = vadd.f32 %v7097_v12, %v4079_v33 }
 0x5a1   : > { %v4910_v27 = vpop.f32.mrf.mxu0 }
 0x5a2   : > { %4273 = vst.msk [vmem:[%s7105_s24 + $0xa8] sm:$0xff] %vm4251_vm2, %v4080_v9  ;;  %v4101_v34 = vadd.f32 %v4910_v27, %v7097_v12 }
 0x5a3   : > { %v4092_v5 = vpop.f32.mrf.mxu0 }
 0x5a4   : > { %4278 = vst.msk [vmem:[%s7105_s24 + $0xd0] sm:$0xff] %vm4251_vm2, %v4101_v34  ;;  %v4093_v37 = vadd.f32 %v7097_v12, %v4092_v5 }
 0x5a5   : > { %v4911_v30 = vpop.f32.mrf.mxu0 }
 0x5a6   : > { %4276 = vst.msk [vmem:[%s7105_s24 + $0xc0] sm:$0xff] %vm4251_vm2, %v4093_v37  ;;  %v4104_v39 = vadd.f32 %v4911_v30, %v7097_v12 }
 0x5a7   : > { %v4095_v38 = vpop.f32.mrf.mxu0 }
 0x5a8   : > { %4279 = vst.msk [vmem:[%s7105_s24 + $0xd8] sm:$0xff] %vm4251_vm2, %v4104_v39  ;;  %v4096_v41 = vadd.f32 %v7097_v12, %v4095_v38 }
 0x5a9   : > { %v4914_v40 = vpop.f32.mrf.mxu0 }
 0x5aa   : > { %4277 = vst.msk [vmem:[%s7105_s24 + $0xc8] sm:$0xff] %vm4251_vm2, %v4096_v41  ;;  %v4117_v42 = vadd.f32 %v4914_v40, %v7097_v12 }
 0x5ab   : > { %v4108_v45 = vpop.f32.mrf.mxu0 }
 0x5ac   : > { %4282 = vst.msk [vmem:[%s7105_s24 + $0xf0] sm:$0xff] %vm4251_vm2, %v4117_v42  ;;  %v4109_v47 = vadd.f32 %v7097_v12, %v4108_v45 }
 0x5ad   : > { %v4915_v13 = vpop.f32.mrf.mxu0 }
 0x5ae   : > { %4280 = vst.msk [vmem:[%s7105_s24 + $0xe0] sm:$0xff] %vm4251_vm2, %v4109_v47  ;;  %v4120_v48 = vadd.f32 %v4915_v13, %v7097_v12 }
 0x5af   : > { %v4111_v49 = vpop.f32.mrf.mxu0 }
 0x5b0   : > { %4283 = vst.msk [vmem:[%s7105_s24 + $0xf8] sm:$0xff] %vm4251_vm2, %v4120_v48  ;;  %v4112_v50 = vadd.f32 %v7097_v12, %v4111_v49 }
 0x5b1   : > { %v4918_v2 = vpop.f32.mrf.mxu0 }
 0x5b2   : > { %4281 = vst.msk [vmem:[%s7105_s24 + $0xe8] sm:$0xff] %vm4251_vm2, %v4112_v50  ;;  %v4133_v52 = vadd.f32 %v4918_v2, %v7097_v12 }
 0x5b3   : > { %v4124_v44 = vpop.f32.mrf.mxu0 }
 0x5b4   : > { %4286 = vst.msk [vmem:[%s7105_s24 + $0x110] sm:$0xff] %vm4251_vm2, %v4133_v52  ;;  %v4125_v46 = vadd.f32 %v7097_v12, %v4124_v44 }
 0x5b5   : > { %v4919_v55 = vpop.f32.mrf.mxu0 }
 0x5b6   : > { %4284 = vst.msk [vmem:[%s7105_s24 + $0x100] sm:$0xff] %vm4251_vm2, %v4125_v46  ;;  %v4136_v20 = vadd.f32 %v4919_v55, %v7097_v12 }
 0x5b7   : > { %v4127_v26 = vpop.f32.mrf.mxu0 }
 0x5b8   : > { %4287 = vst.msk [vmem:[%s7105_s24 + $0x118] sm:$0xff] %vm4251_vm2, %v4136_v20  ;;  %v4128_v57 = vadd.f32 %v7097_v12, %v4127_v26 }
 0x5b9   : > { %v4922_v56 = vpop.f32.mrf.mxu0 }
 0x5ba   : > { %4285 = vst.msk [vmem:[%s7105_s24 + $0x108] sm:$0xff] %vm4251_vm2, %v4128_v57  ;;  %v4149_v4 = vadd.f32 %v4922_v56, %v7097_v12 }
 0x5bb   : > { %v4140_v58 = vpop.f32.mrf.mxu0 }
 0x5bc   : > { %4290 = vst.msk [vmem:[%s7105_s24 + $0x130] sm:$0xff] %vm4251_vm2, %v4149_v4  ;;  %v4141_v59 = vadd.f32 %v7097_v12, %v4140_v58 }
 0x5bd   : > { %v4923_v0 = vpop.f32.mrf.mxu0 }
 0x5be   : > { %4288 = vst.msk [vmem:[%s7105_s24 + $0x120] sm:$0xff] %vm4251_vm2, %v4141_v59  ;;  %v4152_v1 = vadd.f32 %v4923_v0, %v7097_v12 }
 0x5bf   : > { %v4143_v6 = vpop.f32.mrf.mxu0 }
 0x5c0   : > { %4291 = vst.msk [vmem:[%s7105_s24 + $0x138] sm:$0xff] %vm4251_vm2, %v4152_v1  ;;  %v4144_v51 = vadd.f32 %v7097_v12, %v4143_v6 }
 0x5c2   : > { %4289 = vst.msk [vmem:[%s7105_s24 + $0x128] sm:$0xff] %vm4251_vm2, %v4144_v51 }
 0x5ca   : > { %v4926_v53 = vpop.f32.mrf.mxu0 }
 0x5cb   : > { %v4165_v7 = vadd.f32 %v4926_v53, %v7097_v12 }
 0x5cc   : > { %v4156_v62 = vpop.f32.mrf.mxu0 }
 0x5cd   : > { %4294 = vst.msk [vmem:[%s7105_s24 + $0x150] sm:$0xff] %vm4251_vm2, %v4165_v7  ;;  %v4157_v63 = vadd.f32 %v7097_v12, %v4156_v62 }
 0x5ce   : > { %v4927_v60 = vpop.f32.mrf.mxu0 }
 0x5cf   : > { %4292 = vst.msk [vmem:[%s7105_s24 + $0x140] sm:$0xff] %vm4251_vm2, %v4157_v63  ;;  %v4168_v61 = vadd.f32 %v4927_v60, %v7097_v12 }
 0x5d0   : > { %v4159_v15 = vpop.f32.mrf.mxu0 }
 0x5d1   : > { %4295 = vst.msk [vmem:[%s7105_s24 + $0x158] sm:$0xff] %vm4251_vm2, %v4168_v61  ;;  %v4160_v10 = vadd.f32 %v7097_v12, %v4159_v15 }
 0x5d3   : > { %4293 = vst.msk [vmem:[%s7105_s24 + $0x148] sm:$0xff] %vm4251_vm2, %v4160_v10 }
 0x5e2   : > { %v4930_v11 = vpop.f32.mrf.mxu0 }
 0x5e3   : > { %v4181_v17 = vadd.f32 %v4930_v11, %v7097_v12 }
 0x5e4   : > { %v4172_v8 = vpop.f32.mrf.mxu0 }
 0x5e5   : > { %4298 = vst.msk [vmem:[%s7105_s24 + $0x170] sm:$0xff] %vm4251_vm2, %v4181_v17  ;;  %v4173_v18 = vadd.f32 %v7097_v12, %v4172_v8 }
 0x5e6   : > { %v4931_v35 = vpop.f32.mrf.mxu0 }
 0x5e7   : > { %4296 = vst.msk [vmem:[%s7105_s24 + $0x160] sm:$0xff] %vm4251_vm2, %v4173_v18  ;;  %v4184_v21 = vadd.f32 %v4931_v35, %v7097_v12 }
 0x5e8   : > { %v4175_v22 = vpop.f32.mrf.mxu0 }
 0x5e9   : > { %4299 = vst.msk [vmem:[%s7105_s24 + $0x178] sm:$0xff] %vm4251_vm2, %v4184_v21  ;;  %v4176_v23 = vadd.f32 %v7097_v12, %v4175_v22 }
 0x5eb   : > { %4297 = vst.msk [vmem:[%s7105_s24 + $0x168] sm:$0xff] %vm4251_vm2, %v4176_v23 }
 0x5fa   : > { %v4934_v24 = vpop.f32.mrf.mxu0 }
 0x5fb   : > { %v4197_v19 = vadd.f32 %v4934_v24, %v7097_v12 }
 0x5fc   : > { %v4188_v28 = vpop.f32.mrf.mxu0 }
 0x5fd   : > { %4302 = vst.msk [vmem:[%s7105_s24 + $0x190] sm:$0xff] %vm4251_vm2, %v4197_v19  ;;  %v4189_v43 = vadd.f32 %v7097_v12, %v4188_v28 }
 0x5fe   : > { %v4935_v16 = vpop.f32.mrf.mxu0 }
 0x5ff   : > { %4300 = vst.msk [vmem:[%s7105_s24 + $0x180] sm:$0xff] %vm4251_vm2, %v4189_v43  ;;  %v4200_v54 = vadd.f32 %v4935_v16, %v7097_v12 }
 0x600   : > { %v4191_v14 = vpop.f32.mrf.mxu0 }
 0x601   : > { %4303 = vst.msk [vmem:[%s7105_s24 + $0x198] sm:$0xff] %vm4251_vm2, %v4200_v54  ;;  %v4192_v29 = vadd.f32 %v7097_v12, %v4191_v14 }
 0x603   : > { %4301 = vst.msk [vmem:[%s7105_s24 + $0x188] sm:$0xff] %vm4251_vm2, %v4192_v29 }
 0x613   : > { %v4938_v36 = vpop.f32.mrf.mxu0 }
 0x614   : > { %v4213_v31 = vadd.f32 %v4938_v36, %v7097_v12 }
 0x615   : > { %v4204_v25 = vpop.f32.mrf.mxu0 }
 0x616   : > { %4306 = vst.msk [vmem:[%s7105_s24 + $0x1b0] sm:$0xff] %vm4251_vm2, %v4213_v31  ;;  %v4205_v32 = vadd.f32 %v7097_v12, %v4204_v25 }
 0x617   : > { %v4939_v3 = vpop.f32.mrf.mxu0 }
 0x618   : > { %4304 = vst.msk [vmem:[%s7105_s24 + $0x1a0] sm:$0xff] %vm4251_vm2, %v4205_v32  ;;  %v4216_v33 = vadd.f32 %v4939_v3, %v7097_v12 }
 0x619   : > { %v4207_v9 = vpop.f32.mrf.mxu0 }
 0x61a   : > { %4307 = vst.msk [vmem:[%s7105_s24 + $0x1b8] sm:$0xff] %vm4251_vm2, %v4216_v33  ;;  %v4208_v27 = vadd.f32 %v7097_v12, %v4207_v9 }
 0x61c   : > { %4305 = vst.msk [vmem:[%s7105_s24 + $0x1a8] sm:$0xff] %vm4251_vm2, %v4208_v27 }
 0x62b   : > { %v4942_v34 = vpop.f32.mrf.mxu1 }
 0x62c   : > { %v4229_v5 = vadd.f32 %v4942_v34, %v7097_v12 }
 0x62d   : > { %v4220_v37 = vpop.f32.mrf.mxu1 }
 0x62e   : > { %4310 = vst.msk [vmem:[%s7105_s24 + $0x1d0] sm:$0xff] %vm4251_vm2, %v4229_v5  ;;  %v4221_v30 = vadd.f32 %v7097_v12, %v4220_v37 }
 0x62f   : > { %v4943_v39 = vpop.f32.mrf.mxu1 }
 0x630   : > { %4308 = vst.msk [vmem:[%s7105_s24 + $0x1c0] sm:$0xff] %vm4251_vm2, %v4221_v30  ;;  %v4232_v38 = vadd.f32 %v4943_v39, %v7097_v12 }
 0x631   : > { %v4223_v41 = vpop.f32.mrf.mxu1 }
 0x632   : > { %4311 = vst.msk [vmem:[%s7105_s24 + $0x1d8] sm:$0xff] %vm4251_vm2, %v4232_v38  ;;  %v4224_v40 = vadd.f32 %v7097_v12, %v4223_v41 }
 0x634   : > { %4309 = vst.msk [vmem:[%s7105_s24 + $0x1c8] sm:$0xff] %vm4251_vm2, %v4224_v40 }
 0x643   : > { %v4946_v42 = vpop.f32.mrf.mxu1 }
 0x644   : > { %v4245_v45 = vadd.f32 %v4946_v42, %v7097_v12 }
 0x645   : > { %v4236_v47 = vpop.f32.mrf.mxu1 }
 0x646   : > { %4314 = vst.msk [vmem:[%s7105_s24 + $0x1f0] sm:$0xff] %vm4251_vm2, %v4245_v45  ;;  %v4237_v13 = vadd.f32 %v7097_v12, %v4236_v47 }
 0x647   : > { %v4947_v48 = vpop.f32.mrf.mxu1 }
 0x648   : > { %4312 = vst.msk [vmem:[%s7105_s24 + $0x1e0] sm:$0xff] %vm4251_vm2, %v4237_v13  ;;  %v4248_v49 = vadd.f32 %v4947_v48, %v7097_v12 }
 0x649   : > { %v4239_v50 = vpop.f32.mrf.mxu1 }
 0x64a   : > { %4315 = vst.msk [vmem:[%s7105_s24 + $0x1f8] sm:$0xff] %vm4251_vm2, %v4248_v49  ;;  %v4240_v2 = vadd.f32 %v7097_v12, %v4239_v50 }
 0x64c   : > { %4313 = vst.msk [vmem:[%s7105_s24 + $0x1e8] sm:$0xff] %vm4251_vm2, %v4240_v2 }
 0x64d PF: > { %s25_s27 = sadd.s32 1, %s5850_s27  }
 0x64e   : > { %p22_p4 = scmp.ge.s32.totalorder %s25_s27, 4  }
 0x650   :  { %24 = sbr.rel (!%p22_p4) target bundleno = 3 (0x3), region = 102 }

</bundles_post_ra>
